<compile_context>
chip_gen: v5e
topology: v5e:2x2
jax: 0.10.0
libtpu: 0.0.40
codegen_flags: <defaults>
</compile_context>

<pallas_src>
import math

import jax
import jax.numpy as jnp
from jax.experimental import pallas as pl
from jax.experimental.pallas import tpu as pltpu


# ----------------------------- model config --------------------------------
B = 2            # batch
C = 3            # RGB channels (DINO takes RGB)
H = W = 16       # image spatial
PATCH = 8        # patch size -> 2x2 = 4 patches
D = 128          # embed_dim == feature_dim (multiple of 128 -> lane aligned)
NH = 2           # attention heads
DH = D // NH     # true head dim (64)
DHP = 128        # per-head padded dim (lane-aligned slices; padded cols/rows are zero)
DEPTH = 2        # transformer blocks
MLP = 4 * D      # MLP hidden (512)
NUM_CLASSES = 3
NC_PAD = 128     # classifier output padded to a lane-dense 128-wide slab
NUM_PATCHES = (H // PATCH) * (W // PATCH)
SEQ = NUM_PATCHES + 1          # + cls token
BSEQ = B * SEQ                 # all images' tokens stacked into one M dimension
CPP = C * PATCH * PATCH        # 192
LN_EPS = 1e-6
ATTN_SCALE = 1.0 / math.sqrt(DH)


# ----------------------------- kernel helpers -------------------------------
def _layernorm(x, g, b):
    # Single-pass LN: E[x] and E[x^2] are independent reductions (overlap on the 2 XLUs).
    x = x.astype(jnp.float32)
    mu = jnp.mean(x, axis=-1, keepdims=True)
    ex2 = jnp.mean(x * x, axis=-1, keepdims=True)
    var = ex2 - mu * mu
    return (x - mu) * jax.lax.rsqrt(var + LN_EPS) * g + b


def _mm(x, w):
    # bf16 MXU operands, fp32 accumulation.
    return jnp.dot(x.astype(jnp.bfloat16), w.astype(jnp.bfloat16),
                   preferred_element_type=jnp.float32)


# ----------------------------- fused kernel --------------------------------
def _dino_fused_kernel(
    xp_ref, tok_bias_ref, attn_bias_ref, patch_w_ref,
    ln1_g_ref, ln1_b_ref, qkv_w_ref, qkv_b_ref, proj_w_ref, proj_b_ref,
    ln2_g_ref, ln2_b_ref, fc1_w_ref, fc1_b_ref, fc2_w_ref, fc2_b_ref,
    norm_g_ref, norm_b_ref, cls_w_ref, cls_b_ref,
    out_ref,
):
    # ---- patch embedding + token assembly in ONE matmul + add (no scratch / concat) ----
    # xp rows at each image's CLS slot are zero so they contribute nothing; tok_bias
    # carries cls_token / pos_embed / patch bias per row (parameter folding).
    tok = _mm(xp_ref[...], patch_w_ref[...]) + tok_bias_ref[...]        # [BSEQ, D] f32

    attn_bias = attn_bias_ref[...]                                      # [BSEQ, BSEQ] f32

    # ---- transformer blocks (DEPTH small & static -> unrolled; see NOTE at top) ----
    for d in range(DEPTH):
        # pre-LN multi-head self-attention over the whole [BSEQ, D] block
        h = _layernorm(tok, ln1_g_ref[d], ln1_b_ref[d])
        qkv = _mm(h, qkv_w_ref[d]) + qkv_b_ref[d]                       # [BSEQ, NH*3*DHP]
        pw = proj_w_ref[d]                                              # [NH*DHP, D] bf16
        attn = jnp.zeros((BSEQ, D), jnp.float32)
        for hh in range(NH):
            base = hh * 3 * DHP                                         # 128-lane aligned
            q = qkv[:, base:base + DHP]                                 # scale folded in q
            k = qkv[:, base + DHP:base + 2 * DHP]
            v = qkv[:, base + 2 * DHP:base + 3 * DHP]
            s = jax.lax.dot_general(                                    # q @ k^T [BSEQ,BSEQ]
                q.astype(jnp.bfloat16), k.astype(jnp.bfloat16),
                (((1,), (1,)), ((), ())),
                preferred_element_type=jnp.float32) + attn_bias
            s = s - jnp.max(s, axis=-1, keepdims=True)
            p = jnp.exp(s)
            p = p * pl.reciprocal(jnp.sum(p, axis=-1, keepdims=True), approx=True)
            ho = jnp.dot(p.astype(jnp.bfloat16), v.astype(jnp.bfloat16),
                         preferred_element_type=jnp.float32)            # [BSEQ, DHP]
            # Accumulate this head straight into the output projection (no head_scr).
            attn = attn + _mm(ho, pw[hh * DHP:(hh + 1) * DHP, :])
        tok = tok + attn + proj_b_ref[d]                                # residual

        # pre-LN MLP
        h = _layernorm(tok, ln2_g_ref[d], ln2_b_ref[d])
        # TODO(synk): PyTorch nn.GELU default is the exact erf form; tanh approximation used.
        hmid = jax.nn.gelu(_mm(h, fc1_w_ref[d]) + fc1_b_ref[d], approximate=True)
        tok = tok + _mm(hmid, fc2_w_ref[d]) + fc2_b_ref[d]              # residual

    # ---- final LayerNorm + classifier on ALL rows (rows are independent; the wrapper
    #      keeps only each image's CLS row) -> stays lane-dense, no sublane gather. ----
    normed = _layernorm(tok, norm_g_ref[...], norm_b_ref[...])          # [BSEQ, D]
    logits = _mm(normed, cls_w_ref[...]) + cls_b_ref[...]               # [BSEQ, NC_PAD]
    out_ref[...] = logits.astype(out_ref.dtype)


# ----------------------------- parameter init ------------------------------
def init_params(key):
    f32, bf = jnp.float32, jnp.bfloat16

    def nrm(k, shape, scale=0.02):
        return (scale * jax.random.normal(k, shape)).astype(f32)

    keys = jax.random.split(key, 8 + DEPTH)
    params = {
        # Conv2d(C, D, kernel=PATCH, stride=PATCH) weight flattened to [C*p*p, D]
        "patch_w": nrm(keys[0], (CPP, D)).astype(bf),
        "patch_b": jnp.zeros((1, D), f32),
        "cls_token": nrm(keys[1], (1, D)),
        "pos_embed": nrm(keys[2], (SEQ, D)),
        "norm_g": jnp.ones((1, D), f32),
        "norm_b": jnp.zeros((1, D), f32),
        # classifier padded to NC_PAD output lanes (extra columns zero, sliced off later)
        "cls_w": jnp.pad(nrm(keys[3], (D, NUM_CLASSES)),
                         ((0, 0), (0, NC_PAD - NUM_CLASSES))).astype(bf),
        "cls_b": jnp.zeros((1, NC_PAD), f32),
    }

    qkv_w, qkv_b, proj_w, fc1_w, fc2_w = [], [], [], [], []
    for d in range(DEPTH):
        bk = jax.random.split(keys[8 + d], 4)
        qw_raw = nrm(bk[0], (D, 3 * D))          # column blocks [q | k | v], DH per head
        qb_raw = jnp.zeros((3 * D,), f32)
        # Lane-aligned per-head layout: [q_pad128 | k_pad128 | v_pad128] per head, with
        # the softmax scale folded into the q columns (and q bias).
        wcols, bcols = [], []
        for hh in range(NH):
            qw = qw_raw[:, hh * DH:(hh + 1) * DH] * ATTN_SCALE
            kw = qw_raw[:, D + hh * DH:D + (hh + 1) * DH]
            vw = qw_raw[:, 2 * D + hh * DH:2 * D + (hh + 1) * DH]
            qb = qb_raw[hh * DH:(hh + 1) * DH] * ATTN_SCALE
            kb = qb_raw[D + hh * DH:D + (hh + 1) * DH]
            vb = qb_raw[2 * D + hh * DH:2 * D + (hh + 1) * DH]
            for wcol, bcol in ((qw, qb), (kw, kb), (vw, vb)):
                wcols.append(jnp.pad(wcol, ((0, 0), (0, DHP - DH))))
                bcols.append(jnp.pad(bcol, (0, DHP - DH)))
        qkv_w.append(jnp.concatenate(wcols, axis=1))                    # [D, NH*3*DHP]
        qkv_b.append(jnp.concatenate(bcols)[None, :])                   # [1, NH*3*DHP]

        pw_raw = nrm(bk[1], (D, D))              # rows head-major: head hh -> hh*DH:(hh+1)*DH
        prows = [jnp.pad(pw_raw[hh * DH:(hh + 1) * DH, :], ((0, DHP - DH), (0, 0)))
                 for hh in range(NH)]
        proj_w.append(jnp.concatenate(prows, axis=0))                   # [NH*DHP, D]

        fc1_w.append(nrm(bk[2], (D, MLP)))
        fc2_w.append(nrm(bk[3], (MLP, D)))

    params.update({
        "ln1_g": jnp.ones((DEPTH, 1, D), f32), "ln1_b": jnp.zeros((DEPTH, 1, D), f32),
        "ln2_g": jnp.ones((DEPTH, 1, D), f32), "ln2_b": jnp.zeros((DEPTH, 1, D), f32),
        "qkv_w": jnp.stack(qkv_w).astype(bf),                           # [DEPTH, D, NH*3*DHP]
        "qkv_b": jnp.stack(qkv_b),                                      # [DEPTH, 1, NH*3*DHP]
        "proj_w": jnp.stack(proj_w).astype(bf),                         # [DEPTH, NH*DHP, D]
        "proj_b": jnp.zeros((DEPTH, 1, D), f32),
        "fc1_w": jnp.stack(fc1_w).astype(bf), "fc1_b": jnp.zeros((DEPTH, 1, MLP), f32),
        "fc2_w": jnp.stack(fc2_w).astype(bf), "fc2_b": jnp.zeros((DEPTH, 1, D), f32),
    })
    return params


# ----------------------------- forward (one pallas_call, one grid step) -----
_WEIGHT_ORDER = ("patch_w",
                 "ln1_g", "ln1_b", "qkv_w", "qkv_b", "proj_w", "proj_b",
                 "ln2_g", "ln2_b", "fc1_w", "fc1_b", "fc2_w", "fc2_b",
                 "norm_g", "norm_b", "cls_w", "cls_b")


def finetuned_dino_forward(params, x):
    b, c, h, w = x.shape
    assert b == B and c == C and h == H and w == W
    p = PATCH

    # Patchify (layout glue; channel-major per patch, matching PyTorch Conv2d weight
    # [D, C, p, p] flattening). Allowed to fuse into the kernel's input DMA below.
    xp = x.reshape(b, c, h // p, p, w // p, p).transpose(0, 2, 4, 1, 3, 5)
    xp = xp.reshape(b, NUM_PATCHES, CPP)
    # Insert a zero row at each image's CLS slot so the (padded) patch matmul leaves it 0.
    xp_full = jnp.zeros((b, SEQ, CPP), x.dtype).at[:, 1:, :].set(xp).reshape(BSEQ, CPP)

    # Parameter folding: per-row additive template (cls_token + pos[0] on CLS rows,
    # pos[1:] + patch bias on patch rows), tiled over the batch.
    tok_bias = jnp.tile(
        jnp.concatenate([params["cls_token"] + params["pos_embed"][0:1],
                         params["pos_embed"][1:] + params["patch_b"]], axis=0),
        (b, 1))                                                          # [BSEQ, D] f32

    # Block-diagonal additive attention bias: tokens only attend within their own image.
    img_id = jnp.arange(BSEQ) // SEQ
    attn_bias = jnp.where(img_id[:, None] == img_id[None, :], 0.0, -1e30
                          ).astype(jnp.float32)                         # [BSEQ, BSEQ]

    weights = [params[k] for k in _WEIGHT_ORDER]
    inputs = [xp_full, tok_bias, attn_bias] + weights

    def full_spec(arr):  # whole-array block, single grid step
        nd = arr.ndim
        return pl.BlockSpec(arr.shape, lambda i, nd=nd: (0,) * nd)

    grid_spec = pltpu.PrefetchScalarGridSpec(
        num_scalar_prefetch=0,
        grid=(1,),                                   # batch fused into matmul M dimension
        in_specs=[full_spec(a) for a in inputs],
        out_specs=pl.BlockSpec((BSEQ, NC_PAD), lambda i: (0, 0)),
    )
    out = pl.pallas_call(
        _dino_fused_kernel,
        out_shape=jax.ShapeDtypeStruct((BSEQ, NC_PAD), jnp.float32),
        grid_spec=grid_spec,
        compiler_params=pltpu.CompilerParams(
            dimension_semantics=("arbitrary",),
            vmem_limit_bytes=32 * 1024 * 1024,
            # Let XLA fuse the patchify/pad/template producers into the input DMAs.
            allow_input_fusion=[True, True, True] + [False] * len(weights),
        ),
    )(*inputs)

    # Keep each image's CLS row; drop the lane padding of the classifier head.
    return out[0::SEQ, :NUM_CLASSES]


if __name__ == "__main__":
    key = jax.random.PRNGKey(0)
    pkey, xkey = jax.random.split(key)
    params = init_params(pkey)
    x = jax.random.normal(xkey, (B, C, H, W), dtype=jnp.float32)

    fwd = jax.jit(finetuned_dino_forward)
    logits = fwd(params, x)
    jax.block_until_ready(logits)
    assert logits.shape == (B, NUM_CLASSES)
    assert bool(jnp.all(jnp.isfinite(logits)))
    print("KERNEL_OK")
</pallas_src>

<mosaic_0001>
module attributes {stable_mosaic.version = 11 : i64} {
  func.func @_dino_fused_kernel(%arg0: i32, %arg1: memref<10x192xf32, #tpu.memory_space<vmem>>, %arg2: memref<10x128xf32, #tpu.memory_space<vmem>>, %arg3: memref<10x10xf32, #tpu.memory_space<vmem>>, %arg4: memref<192x128xbf16, #tpu.memory_space<vmem>>, %arg5: memref<2x1x128xf32, #tpu.memory_space<vmem>>, %arg6: memref<2x1x128xf32, #tpu.memory_space<vmem>>, %arg7: memref<2x128x768xbf16, #tpu.memory_space<vmem>>, %arg8: memref<2x1x768xf32, #tpu.memory_space<vmem>>, %arg9: memref<2x256x128xbf16, #tpu.memory_space<vmem>>, %arg10: memref<2x1x128xf32, #tpu.memory_space<vmem>>, %arg11: memref<2x1x128xf32, #tpu.memory_space<vmem>>, %arg12: memref<2x1x128xf32, #tpu.memory_space<vmem>>, %arg13: memref<2x128x512xbf16, #tpu.memory_space<vmem>>, %arg14: memref<2x1x512xf32, #tpu.memory_space<vmem>>, %arg15: memref<2x512x128xbf16, #tpu.memory_space<vmem>>, %arg16: memref<2x1x128xf32, #tpu.memory_space<vmem>>, %arg17: memref<1x128xf32, #tpu.memory_space<vmem>>, %arg18: memref<1x128xf32, #tpu.memory_space<vmem>>, %arg19: memref<128x128xbf16, #tpu.memory_space<vmem>>, %arg20: memref<1x128xf32, #tpu.memory_space<vmem>>, %arg21: memref<10x128xf32, #tpu.memory_space<vmem>>) attributes {dimension_semantics = [#tpu.dimension_semantics<arbitrary>], iteration_bounds = array<i64: 1>, scalar_prefetch = 0 : i64, scratch_operands = 0 : i64, tpu.core_type = #tpu.core_type<tc>, window_params = [{pipeline_mode = #tpu.pipeline_mode<synchronous>, transform_indices = @transform_0, window_bounds = array<i64: 10, 192>}, {pipeline_mode = #tpu.pipeline_mode<synchronous>, transform_indices = @transform_1, window_bounds = array<i64: 10, 128>}, {pipeline_mode = #tpu.pipeline_mode<synchronous>, transform_indices = @transform_2, window_bounds = array<i64: 10, 10>}, {pipeline_mode = #tpu.pipeline_mode<synchronous>, transform_indices = @transform_3, window_bounds = array<i64: 192, 128>}, {pipeline_mode = #tpu.pipeline_mode<synchronous>, transform_indices = @transform_4, window_bounds = array<i64: 2, 1, 128>}, {pipeline_mode = #tpu.pipeline_mode<synchronous>, transform_indices = @transform_5, window_bounds = array<i64: 2, 1, 128>}, {pipeline_mode = #tpu.pipeline_mode<synchronous>, transform_indices = @transform_6, window_bounds = array<i64: 2, 128, 768>}, {pipeline_mode = #tpu.pipeline_mode<synchronous>, transform_indices = @transform_7, window_bounds = array<i64: 2, 1, 768>}, {pipeline_mode = #tpu.pipeline_mode<synchronous>, transform_indices = @transform_8, window_bounds = array<i64: 2, 256, 128>}, {pipeline_mode = #tpu.pipeline_mode<synchronous>, transform_indices = @transform_9, window_bounds = array<i64: 2, 1, 128>}, {pipeline_mode = #tpu.pipeline_mode<synchronous>, transform_indices = @transform_10, window_bounds = array<i64: 2, 1, 128>}, {pipeline_mode = #tpu.pipeline_mode<synchronous>, transform_indices = @transform_11, window_bounds = array<i64: 2, 1, 128>}, {pipeline_mode = #tpu.pipeline_mode<synchronous>, transform_indices = @transform_12, window_bounds = array<i64: 2, 128, 512>}, {pipeline_mode = #tpu.pipeline_mode<synchronous>, transform_indices = @transform_13, window_bounds = array<i64: 2, 1, 512>}, {pipeline_mode = #tpu.pipeline_mode<synchronous>, transform_indices = @transform_14, window_bounds = array<i64: 2, 512, 128>}, {pipeline_mode = #tpu.pipeline_mode<synchronous>, transform_indices = @transform_15, window_bounds = array<i64: 2, 1, 128>}, {pipeline_mode = #tpu.pipeline_mode<synchronous>, transform_indices = @transform_16, window_bounds = array<i64: 1, 128>}, {pipeline_mode = #tpu.pipeline_mode<synchronous>, transform_indices = @transform_17, window_bounds = array<i64: 1, 128>}, {pipeline_mode = #tpu.pipeline_mode<synchronous>, transform_indices = @transform_18, window_bounds = array<i64: 128, 128>}, {pipeline_mode = #tpu.pipeline_mode<synchronous>, transform_indices = @transform_19, window_bounds = array<i64: 1, 128>}, {pipeline_mode = #tpu.pipeline_mode<synchronous>, transform_indices = @transform_20, window_bounds = array<i64: 10, 128>}]} {
    %c0 = arith.constant 0 : index
    %c0_0 = arith.constant 0 : index
    %0 = vector.load %arg1[%c0, %c0_0] : memref<10x192xf32, #tpu.memory_space<vmem>>, vector<10x192xf32>
    %c0_1 = arith.constant 0 : index
    %c0_2 = arith.constant 0 : index
    %1 = vector.load %arg4[%c0_1, %c0_2] : memref<192x128xbf16, #tpu.memory_space<vmem>>, vector<192x128xbf16>
    %2 = arith.truncf %0 : vector<10x192xf32> to vector<10x192xbf16>
    %cst = arith.constant dense<0.000000e+00> : vector<10x128xf32>
    %3 = tpu.matmul %2, %1, %cst {dimension_numbers = #tpu.dot_dimension_numbers<[1], [0], [0], [1], [0, 0, 1, 1], [], []>} : vector<10x192xbf16>, vector<192x128xbf16>, vector<10x128xf32> -> vector<10x128xf32>
    %c0_3 = arith.constant 0 : index
    %c0_4 = arith.constant 0 : index
    %4 = vector.load %arg2[%c0_3, %c0_4] : memref<10x128xf32, #tpu.memory_space<vmem>>, vector<10x128xf32>
    %5 = arith.addf %3, %4 : vector<10x128xf32>
    %c0_5 = arith.constant 0 : index
    %c0_6 = arith.constant 0 : index
    %6 = vector.load %arg3[%c0_5, %c0_6] : memref<10x10xf32, #tpu.memory_space<vmem>>, vector<10x10xf32>
    %c0_7 = arith.constant 0 : index
    %c0_8 = arith.constant 0 : index
    %c0_9 = arith.constant 0 : index
    %7 = vector.load %arg5[%c0_7, %c0_8, %c0_9] : memref<2x1x128xf32, #tpu.memory_space<vmem>>, vector<1x1x128xf32>
    %8 = vector.shape_cast %7 : vector<1x1x128xf32> to vector<1x128xf32>
    %c0_10 = arith.constant 0 : index
    %c0_11 = arith.constant 0 : index
    %c0_12 = arith.constant 0 : index
    %9 = vector.load %arg6[%c0_10, %c0_11, %c0_12] : memref<2x1x128xf32, #tpu.memory_space<vmem>>, vector<1x1x128xf32>
    %10 = vector.shape_cast %9 : vector<1x1x128xf32> to vector<1x128xf32>
    %cst_13 = arith.constant dense<0.000000e+00> : vector<10xf32>
    %11 = vector.multi_reduction <add>, %5, %cst_13 [1] : vector<10x128xf32> to vector<10xf32>
    %12 = vector.shape_cast %11 : vector<10xf32> to vector<10x1xf32>
    %cst_14 = arith.constant 1.280000e+02 : f32
    %13 = vector.broadcast %cst_14 : f32 to vector<10x1xf32>
    %14 = arith.divf %12, %13 : vector<10x1xf32>
    %15 = arith.mulf %5, %5 : vector<10x128xf32>
    %cst_15 = arith.constant dense<0.000000e+00> : vector<10xf32>
    %16 = vector.multi_reduction <add>, %15, %cst_15 [1] : vector<10x128xf32> to vector<10xf32>
    %17 = vector.shape_cast %16 : vector<10xf32> to vector<10x1xf32>
    %cst_16 = arith.constant 1.280000e+02 : f32
    %18 = vector.broadcast %cst_16 : f32 to vector<10x1xf32>
    %19 = arith.divf %17, %18 : vector<10x1xf32>
    %20 = arith.mulf %14, %14 : vector<10x1xf32>
    %21 = arith.subf %19, %20 : vector<10x1xf32>
    %22 = vector.broadcast %14 : vector<10x1xf32> to vector<10x128xf32>
    %23 = arith.subf %5, %22 : vector<10x128xf32>
    %cst_17 = arith.constant 9.99999997E-7 : f32
    %24 = vector.broadcast %cst_17 : f32 to vector<10x1xf32>
    %25 = arith.addf %21, %24 : vector<10x1xf32>
    %26 = math.rsqrt %25 : vector<10x1xf32>
    %27 = vector.broadcast %26 : vector<10x1xf32> to vector<10x128xf32>
    %28 = arith.mulf %23, %27 : vector<10x128xf32>
    %29 = vector.broadcast %8 : vector<1x128xf32> to vector<10x128xf32>
    %30 = arith.mulf %28, %29 : vector<10x128xf32>
    %31 = vector.broadcast %10 : vector<1x128xf32> to vector<10x128xf32>
    %32 = arith.addf %30, %31 : vector<10x128xf32>
    %c0_18 = arith.constant 0 : index
    %c0_19 = arith.constant 0 : index
    %c0_20 = arith.constant 0 : index
    %33 = vector.load %arg7[%c0_18, %c0_19, %c0_20] : memref<2x128x768xbf16, #tpu.memory_space<vmem>>, vector<1x128x768xbf16>
    %34 = vector.shape_cast %33 : vector<1x128x768xbf16> to vector<128x768xbf16>
    %35 = arith.truncf %32 : vector<10x128xf32> to vector<10x128xbf16>
    %cst_21 = arith.constant dense<0.000000e+00> : vector<10x768xf32>
    %36 = tpu.matmul %35, %34, %cst_21 {dimension_numbers = #tpu.dot_dimension_numbers<[1], [0], [0], [1], [0, 0, 1, 1], [], []>} : vector<10x128xbf16>, vector<128x768xbf16>, vector<10x768xf32> -> vector<10x768xf32>
    %c0_22 = arith.constant 0 : index
    %c0_23 = arith.constant 0 : index
    %c0_24 = arith.constant 0 : index
    %37 = vector.load %arg8[%c0_22, %c0_23, %c0_24] : memref<2x1x768xf32, #tpu.memory_space<vmem>>, vector<1x1x768xf32>
    %38 = vector.shape_cast %37 : vector<1x1x768xf32> to vector<1x768xf32>
    %39 = vector.broadcast %38 : vector<1x768xf32> to vector<10x768xf32>
    %40 = arith.addf %36, %39 : vector<10x768xf32>
    %c0_25 = arith.constant 0 : index
    %c0_26 = arith.constant 0 : index
    %c0_27 = arith.constant 0 : index
    %41 = vector.load %arg9[%c0_25, %c0_26, %c0_27] : memref<2x256x128xbf16, #tpu.memory_space<vmem>>, vector<1x256x128xbf16>
    %42 = vector.shape_cast %41 : vector<1x256x128xbf16> to vector<256x128xbf16>
    %cst_28 = arith.constant 0.000000e+00 : f32
    %43 = vector.broadcast %cst_28 : f32 to vector<10x128xf32>
    %44 = vector.extract_strided_slice %40 {offsets = [0, 0], sizes = [10, 128], strides = [1, 1]} : vector<10x768xf32> to vector<10x128xf32>
    %45 = vector.extract_strided_slice %40 {offsets = [0, 128], sizes = [10, 128], strides = [1, 1]} : vector<10x768xf32> to vector<10x128xf32>
    %46 = vector.extract_strided_slice %40 {offsets = [0, 256], sizes = [10, 128], strides = [1, 1]} : vector<10x768xf32> to vector<10x128xf32>
    %47 = arith.truncf %44 : vector<10x128xf32> to vector<10x128xbf16>
    %48 = arith.truncf %45 : vector<10x128xf32> to vector<10x128xbf16>
    %cst_29 = arith.constant dense<0.000000e+00> : vector<10x10xf32>
    %49 = tpu.matmul %47, %48, %cst_29 {dimension_numbers = #tpu.dot_dimension_numbers<[1], [1], [0], [0], [0, 0, 1, 0], [], []>} : vector<10x128xbf16>, vector<10x128xbf16>, vector<10x10xf32> -> vector<10x10xf32>
    %50 = arith.addf %49, %6 : vector<10x10xf32>
    %cst_30 = arith.constant dense<0xFF800000> : vector<10xf32>
    %51 = vector.multi_reduction <maximumf>, %50, %cst_30 [1] : vector<10x10xf32> to vector<10xf32>
    %52 = vector.shape_cast %51 : vector<10xf32> to vector<10x1xf32>
    %53 = vector.broadcast %52 : vector<10x1xf32> to vector<10x10xf32>
    %54 = arith.subf %50, %53 : vector<10x10xf32>
    %55 = math.exp %54 : vector<10x10xf32>
    %cst_31 = arith.constant dense<0.000000e+00> : vector<10xf32>
    %56 = vector.multi_reduction <add>, %55, %cst_31 [1] : vector<10x10xf32> to vector<10xf32>
    %57 = vector.shape_cast %56 : vector<10xf32> to vector<10x1xf32>
    %58 = tpu.reciprocal %57 {approx = true} : vector<10x1xf32> -> vector<10x1xf32>
    %59 = vector.broadcast %58 : vector<10x1xf32> to vector<10x10xf32>
    %60 = arith.mulf %55, %59 : vector<10x10xf32>
    %61 = arith.truncf %60 : vector<10x10xf32> to vector<10x10xbf16>
    %62 = arith.truncf %46 : vector<10x128xf32> to vector<10x128xbf16>
    %cst_32 = arith.constant dense<0.000000e+00> : vector<10x128xf32>
    %63 = tpu.matmul %61, %62, %cst_32 {dimension_numbers = #tpu.dot_dimension_numbers<[1], [0], [0], [1], [0, 0, 1, 1], [], []>} : vector<10x10xbf16>, vector<10x128xbf16>, vector<10x128xf32> -> vector<10x128xf32>
    %64 = vector.extract_strided_slice %42 {offsets = [0, 0], sizes = [128, 128], strides = [1, 1]} : vector<256x128xbf16> to vector<128x128xbf16>
    %65 = arith.truncf %63 : vector<10x128xf32> to vector<10x128xbf16>
    %cst_33 = arith.constant dense<0.000000e+00> : vector<10x128xf32>
    %66 = tpu.matmul %65, %64, %cst_33 {dimension_numbers = #tpu.dot_dimension_numbers<[1], [0], [0], [1], [0, 0, 1, 1], [], []>} : vector<10x128xbf16>, vector<128x128xbf16>, vector<10x128xf32> -> vector<10x128xf32>
    %67 = arith.addf %43, %66 : vector<10x128xf32>
    %68 = vector.extract_strided_slice %40 {offsets = [0, 384], sizes = [10, 128], strides = [1, 1]} : vector<10x768xf32> to vector<10x128xf32>
    %69 = vector.extract_strided_slice %40 {offsets = [0, 512], sizes = [10, 128], strides = [1, 1]} : vector<10x768xf32> to vector<10x128xf32>
    %70 = vector.extract_strided_slice %40 {offsets = [0, 640], sizes = [10, 128], strides = [1, 1]} : vector<10x768xf32> to vector<10x128xf32>
    %71 = arith.truncf %68 : vector<10x128xf32> to vector<10x128xbf16>
    %72 = arith.truncf %69 : vector<10x128xf32> to vector<10x128xbf16>
    %cst_34 = arith.constant dense<0.000000e+00> : vector<10x10xf32>
    %73 = tpu.matmul %71, %72, %cst_34 {dimension_numbers = #tpu.dot_dimension_numbers<[1], [1], [0], [0], [0, 0, 1, 0], [], []>} : vector<10x128xbf16>, vector<10x128xbf16>, vector<10x10xf32> -> vector<10x10xf32>
    %74 = arith.addf %73, %6 : vector<10x10xf32>
    %cst_35 = arith.constant dense<0xFF800000> : vector<10xf32>
    %75 = vector.multi_reduction <maximumf>, %74, %cst_35 [1] : vector<10x10xf32> to vector<10xf32>
    %76 = vector.shape_cast %75 : vector<10xf32> to vector<10x1xf32>
    %77 = vector.broadcast %76 : vector<10x1xf32> to vector<10x10xf32>
    %78 = arith.subf %74, %77 : vector<10x10xf32>
    %79 = math.exp %78 : vector<10x10xf32>
    %cst_36 = arith.constant dense<0.000000e+00> : vector<10xf32>
    %80 = vector.multi_reduction <add>, %79, %cst_36 [1] : vector<10x10xf32> to vector<10xf32>
    %81 = vector.shape_cast %80 : vector<10xf32> to vector<10x1xf32>
    %82 = tpu.reciprocal %81 {approx = true} : vector<10x1xf32> -> vector<10x1xf32>
    %83 = vector.broadcast %82 : vector<10x1xf32> to vector<10x10xf32>
    %84 = arith.mulf %79, %83 : vector<10x10xf32>
    %85 = arith.truncf %84 : vector<10x10xf32> to vector<10x10xbf16>
    %86 = arith.truncf %70 : vector<10x128xf32> to vector<10x128xbf16>
    %cst_37 = arith.constant dense<0.000000e+00> : vector<10x128xf32>
    %87 = tpu.matmul %85, %86, %cst_37 {dimension_numbers = #tpu.dot_dimension_numbers<[1], [0], [0], [1], [0, 0, 1, 1], [], []>} : vector<10x10xbf16>, vector<10x128xbf16>, vector<10x128xf32> -> vector<10x128xf32>
    %88 = vector.extract_strided_slice %42 {offsets = [128, 0], sizes = [128, 128], strides = [1, 1]} : vector<256x128xbf16> to vector<128x128xbf16>
    %89 = arith.truncf %87 : vector<10x128xf32> to vector<10x128xbf16>
    %cst_38 = arith.constant dense<0.000000e+00> : vector<10x128xf32>
    %90 = tpu.matmul %89, %88, %cst_38 {dimension_numbers = #tpu.dot_dimension_numbers<[1], [0], [0], [1], [0, 0, 1, 1], [], []>} : vector<10x128xbf16>, vector<128x128xbf16>, vector<10x128xf32> -> vector<10x128xf32>
    %91 = arith.addf %67, %90 : vector<10x128xf32>
    %92 = arith.addf %5, %91 : vector<10x128xf32>
    %c0_39 = arith.constant 0 : index
    %c0_40 = arith.constant 0 : index
    %c0_41 = arith.constant 0 : index
    %93 = vector.load %arg10[%c0_39, %c0_40, %c0_41] : memref<2x1x128xf32, #tpu.memory_space<vmem>>, vector<1x1x128xf32>
    %94 = vector.shape_cast %93 : vector<1x1x128xf32> to vector<1x128xf32>
    %95 = vector.broadcast %94 : vector<1x128xf32> to vector<10x128xf32>
    %96 = arith.addf %92, %95 : vector<10x128xf32>
    %c0_42 = arith.constant 0 : index
    %c0_43 = arith.constant 0 : index
    %c0_44 = arith.constant 0 : index
    %97 = vector.load %arg11[%c0_42, %c0_43, %c0_44] : memref<2x1x128xf32, #tpu.memory_space<vmem>>, vector<1x1x128xf32>
    %98 = vector.shape_cast %97 : vector<1x1x128xf32> to vector<1x128xf32>
    %c0_45 = arith.constant 0 : index
    %c0_46 = arith.constant 0 : index
    %c0_47 = arith.constant 0 : index
    %99 = vector.load %arg12[%c0_45, %c0_46, %c0_47] : memref<2x1x128xf32, #tpu.memory_space<vmem>>, vector<1x1x128xf32>
    %100 = vector.shape_cast %99 : vector<1x1x128xf32> to vector<1x128xf32>
    %cst_48 = arith.constant dense<0.000000e+00> : vector<10xf32>
    %101 = vector.multi_reduction <add>, %96, %cst_48 [1] : vector<10x128xf32> to vector<10xf32>
    %102 = vector.shape_cast %101 : vector<10xf32> to vector<10x1xf32>
    %cst_49 = arith.constant 1.280000e+02 : f32
    %103 = vector.broadcast %cst_49 : f32 to vector<10x1xf32>
    %104 = arith.divf %102, %103 : vector<10x1xf32>
    %105 = arith.mulf %96, %96 : vector<10x128xf32>
    %cst_50 = arith.constant dense<0.000000e+00> : vector<10xf32>
    %106 = vector.multi_reduction <add>, %105, %cst_50 [1] : vector<10x128xf32> to vector<10xf32>
    %107 = vector.shape_cast %106 : vector<10xf32> to vector<10x1xf32>
    %cst_51 = arith.constant 1.280000e+02 : f32
    %108 = vector.broadcast %cst_51 : f32 to vector<10x1xf32>
    %109 = arith.divf %107, %108 : vector<10x1xf32>
    %110 = arith.mulf %104, %104 : vector<10x1xf32>
    %111 = arith.subf %109, %110 : vector<10x1xf32>
    %112 = vector.broadcast %104 : vector<10x1xf32> to vector<10x128xf32>
    %113 = arith.subf %96, %112 : vector<10x128xf32>
    %cst_52 = arith.constant 9.99999997E-7 : f32
    %114 = vector.broadcast %cst_52 : f32 to vector<10x1xf32>
    %115 = arith.addf %111, %114 : vector<10x1xf32>
    %116 = math.rsqrt %115 : vector<10x1xf32>
    %117 = vector.broadcast %116 : vector<10x1xf32> to vector<10x128xf32>
    %118 = arith.mulf %113, %117 : vector<10x128xf32>
    %119 = vector.broadcast %98 : vector<1x128xf32> to vector<10x128xf32>
    %120 = arith.mulf %118, %119 : vector<10x128xf32>
    %121 = vector.broadcast %100 : vector<1x128xf32> to vector<10x128xf32>
    %122 = arith.addf %120, %121 : vector<10x128xf32>
    %c0_53 = arith.constant 0 : index
    %c0_54 = arith.constant 0 : index
    %c0_55 = arith.constant 0 : index
    %123 = vector.load %arg13[%c0_53, %c0_54, %c0_55] : memref<2x128x512xbf16, #tpu.memory_space<vmem>>, vector<1x128x512xbf16>
    %124 = vector.shape_cast %123 : vector<1x128x512xbf16> to vector<128x512xbf16>
    %125 = arith.truncf %122 : vector<10x128xf32> to vector<10x128xbf16>
    %cst_56 = arith.constant dense<0.000000e+00> : vector<10x512xf32>
    %126 = tpu.matmul %125, %124, %cst_56 {dimension_numbers = #tpu.dot_dimension_numbers<[1], [0], [0], [1], [0, 0, 1, 1], [], []>} : vector<10x128xbf16>, vector<128x512xbf16>, vector<10x512xf32> -> vector<10x512xf32>
    %c0_57 = arith.constant 0 : index
    %c0_58 = arith.constant 0 : index
    %c0_59 = arith.constant 0 : index
    %127 = vector.load %arg14[%c0_57, %c0_58, %c0_59] : memref<2x1x512xf32, #tpu.memory_space<vmem>>, vector<1x1x512xf32>
    %128 = vector.shape_cast %127 : vector<1x1x512xf32> to vector<1x512xf32>
    %129 = vector.broadcast %128 : vector<1x512xf32> to vector<10x512xf32>
    %130 = arith.addf %126, %129 : vector<10x512xf32>
    %131 = arith.mulf %130, %130 : vector<10x512xf32>
    %132 = arith.mulf %130, %131 : vector<10x512xf32>
    %cst_60 = arith.constant 4.471500e-02 : f32
    %133 = vector.broadcast %cst_60 : f32 to vector<10x512xf32>
    %134 = arith.mulf %133, %132 : vector<10x512xf32>
    %135 = arith.addf %130, %134 : vector<10x512xf32>
    %cst_61 = arith.constant 0.797884583 : f32
    %136 = vector.broadcast %cst_61 : f32 to vector<10x512xf32>
    %137 = arith.mulf %136, %135 : vector<10x512xf32>
    %138 = math.tanh %137 : vector<10x512xf32>
    %cst_62 = arith.constant 1.000000e+00 : f32
    %139 = vector.broadcast %cst_62 : f32 to vector<10x512xf32>
    %140 = arith.addf %139, %138 : vector<10x512xf32>
    %cst_63 = arith.constant 5.000000e-01 : f32
    %141 = vector.broadcast %cst_63 : f32 to vector<10x512xf32>
    %142 = arith.mulf %141, %140 : vector<10x512xf32>
    %143 = arith.mulf %130, %142 : vector<10x512xf32>
    %c0_64 = arith.constant 0 : index
    %c0_65 = arith.constant 0 : index
    %c0_66 = arith.constant 0 : index
    %144 = vector.load %arg15[%c0_64, %c0_65, %c0_66] : memref<2x512x128xbf16, #tpu.memory_space<vmem>>, vector<1x512x128xbf16>
    %145 = vector.shape_cast %144 : vector<1x512x128xbf16> to vector<512x128xbf16>
    %146 = arith.truncf %143 : vector<10x512xf32> to vector<10x512xbf16>
    %cst_67 = arith.constant dense<0.000000e+00> : vector<10x128xf32>
    %147 = tpu.matmul %146, %145, %cst_67 {dimension_numbers = #tpu.dot_dimension_numbers<[1], [0], [0], [1], [0, 0, 1, 1], [], []>} : vector<10x512xbf16>, vector<512x128xbf16>, vector<10x128xf32> -> vector<10x128xf32>
    %148 = arith.addf %96, %147 : vector<10x128xf32>
    %c0_68 = arith.constant 0 : index
    %c0_69 = arith.constant 0 : index
    %c0_70 = arith.constant 0 : index
    %149 = vector.load %arg16[%c0_68, %c0_69, %c0_70] : memref<2x1x128xf32, #tpu.memory_space<vmem>>, vector<1x1x128xf32>
    %150 = vector.shape_cast %149 : vector<1x1x128xf32> to vector<1x128xf32>
    %151 = vector.broadcast %150 : vector<1x128xf32> to vector<10x128xf32>
    %152 = arith.addf %148, %151 : vector<10x128xf32>
    %c1 = arith.constant 1 : index
    %c0_71 = arith.constant 0 : index
    %c0_72 = arith.constant 0 : index
    %153 = vector.load %arg5[%c1, %c0_71, %c0_72] : memref<2x1x128xf32, #tpu.memory_space<vmem>>, vector<1x1x128xf32>
    %154 = vector.shape_cast %153 : vector<1x1x128xf32> to vector<1x128xf32>
    %c1_73 = arith.constant 1 : index
    %c0_74 = arith.constant 0 : index
    %c0_75 = arith.constant 0 : index
    %155 = vector.load %arg6[%c1_73, %c0_74, %c0_75] : memref<2x1x128xf32, #tpu.memory_space<vmem>>, vector<1x1x128xf32>
    %156 = vector.shape_cast %155 : vector<1x1x128xf32> to vector<1x128xf32>
    %cst_76 = arith.constant dense<0.000000e+00> : vector<10xf32>
    %157 = vector.multi_reduction <add>, %152, %cst_76 [1] : vector<10x128xf32> to vector<10xf32>
    %158 = vector.shape_cast %157 : vector<10xf32> to vector<10x1xf32>
    %cst_77 = arith.constant 1.280000e+02 : f32
    %159 = vector.broadcast %cst_77 : f32 to vector<10x1xf32>
    %160 = arith.divf %158, %159 : vector<10x1xf32>
    %161 = arith.mulf %152, %152 : vector<10x128xf32>
    %cst_78 = arith.constant dense<0.000000e+00> : vector<10xf32>
    %162 = vector.multi_reduction <add>, %161, %cst_78 [1] : vector<10x128xf32> to vector<10xf32>
    %163 = vector.shape_cast %162 : vector<10xf32> to vector<10x1xf32>
    %cst_79 = arith.constant 1.280000e+02 : f32
    %164 = vector.broadcast %cst_79 : f32 to vector<10x1xf32>
    %165 = arith.divf %163, %164 : vector<10x1xf32>
    %166 = arith.mulf %160, %160 : vector<10x1xf32>
    %167 = arith.subf %165, %166 : vector<10x1xf32>
    %168 = vector.broadcast %160 : vector<10x1xf32> to vector<10x128xf32>
    %169 = arith.subf %152, %168 : vector<10x128xf32>
    %cst_80 = arith.constant 9.99999997E-7 : f32
    %170 = vector.broadcast %cst_80 : f32 to vector<10x1xf32>
    %171 = arith.addf %167, %170 : vector<10x1xf32>
    %172 = math.rsqrt %171 : vector<10x1xf32>
    %173 = vector.broadcast %172 : vector<10x1xf32> to vector<10x128xf32>
    %174 = arith.mulf %169, %173 : vector<10x128xf32>
    %175 = vector.broadcast %154 : vector<1x128xf32> to vector<10x128xf32>
    %176 = arith.mulf %174, %175 : vector<10x128xf32>
    %177 = vector.broadcast %156 : vector<1x128xf32> to vector<10x128xf32>
    %178 = arith.addf %176, %177 : vector<10x128xf32>
    %c1_81 = arith.constant 1 : index
    %c0_82 = arith.constant 0 : index
    %c0_83 = arith.constant 0 : index
    %179 = vector.load %arg7[%c1_81, %c0_82, %c0_83] : memref<2x128x768xbf16, #tpu.memory_space<vmem>>, vector<1x128x768xbf16>
    %180 = vector.shape_cast %179 : vector<1x128x768xbf16> to vector<128x768xbf16>
    %181 = arith.truncf %178 : vector<10x128xf32> to vector<10x128xbf16>
    %cst_84 = arith.constant dense<0.000000e+00> : vector<10x768xf32>
    %182 = tpu.matmul %181, %180, %cst_84 {dimension_numbers = #tpu.dot_dimension_numbers<[1], [0], [0], [1], [0, 0, 1, 1], [], []>} : vector<10x128xbf16>, vector<128x768xbf16>, vector<10x768xf32> -> vector<10x768xf32>
    %c1_85 = arith.constant 1 : index
    %c0_86 = arith.constant 0 : index
    %c0_87 = arith.constant 0 : index
    %183 = vector.load %arg8[%c1_85, %c0_86, %c0_87] : memref<2x1x768xf32, #tpu.memory_space<vmem>>, vector<1x1x768xf32>
    %184 = vector.shape_cast %183 : vector<1x1x768xf32> to vector<1x768xf32>
    %185 = vector.broadcast %184 : vector<1x768xf32> to vector<10x768xf32>
    %186 = arith.addf %182, %185 : vector<10x768xf32>
    %c1_88 = arith.constant 1 : index
    %c0_89 = arith.constant 0 : index
    %c0_90 = arith.constant 0 : index
    %187 = vector.load %arg9[%c1_88, %c0_89, %c0_90] : memref<2x256x128xbf16, #tpu.memory_space<vmem>>, vector<1x256x128xbf16>
    %188 = vector.shape_cast %187 : vector<1x256x128xbf16> to vector<256x128xbf16>
    %cst_91 = arith.constant 0.000000e+00 : f32
    %189 = vector.broadcast %cst_91 : f32 to vector<10x128xf32>
    %190 = vector.extract_strided_slice %186 {offsets = [0, 0], sizes = [10, 128], strides = [1, 1]} : vector<10x768xf32> to vector<10x128xf32>
    %191 = vector.extract_strided_slice %186 {offsets = [0, 128], sizes = [10, 128], strides = [1, 1]} : vector<10x768xf32> to vector<10x128xf32>
    %192 = vector.extract_strided_slice %186 {offsets = [0, 256], sizes = [10, 128], strides = [1, 1]} : vector<10x768xf32> to vector<10x128xf32>
    %193 = arith.truncf %190 : vector<10x128xf32> to vector<10x128xbf16>
    %194 = arith.truncf %191 : vector<10x128xf32> to vector<10x128xbf16>
    %cst_92 = arith.constant dense<0.000000e+00> : vector<10x10xf32>
    %195 = tpu.matmul %193, %194, %cst_92 {dimension_numbers = #tpu.dot_dimension_numbers<[1], [1], [0], [0], [0, 0, 1, 0], [], []>} : vector<10x128xbf16>, vector<10x128xbf16>, vector<10x10xf32> -> vector<10x10xf32>
    %196 = arith.addf %195, %6 : vector<10x10xf32>
    %cst_93 = arith.constant dense<0xFF800000> : vector<10xf32>
    %197 = vector.multi_reduction <maximumf>, %196, %cst_93 [1] : vector<10x10xf32> to vector<10xf32>
    %198 = vector.shape_cast %197 : vector<10xf32> to vector<10x1xf32>
    %199 = vector.broadcast %198 : vector<10x1xf32> to vector<10x10xf32>
    %200 = arith.subf %196, %199 : vector<10x10xf32>
    %201 = math.exp %200 : vector<10x10xf32>
    %cst_94 = arith.constant dense<0.000000e+00> : vector<10xf32>
    %202 = vector.multi_reduction <add>, %201, %cst_94 [1] : vector<10x10xf32> to vector<10xf32>
    %203 = vector.shape_cast %202 : vector<10xf32> to vector<10x1xf32>
    %204 = tpu.reciprocal %203 {approx = true} : vector<10x1xf32> -> vector<10x1xf32>
    %205 = vector.broadcast %204 : vector<10x1xf32> to vector<10x10xf32>
    %206 = arith.mulf %201, %205 : vector<10x10xf32>
    %207 = arith.truncf %206 : vector<10x10xf32> to vector<10x10xbf16>
    %208 = arith.truncf %192 : vector<10x128xf32> to vector<10x128xbf16>
    %cst_95 = arith.constant dense<0.000000e+00> : vector<10x128xf32>
    %209 = tpu.matmul %207, %208, %cst_95 {dimension_numbers = #tpu.dot_dimension_numbers<[1], [0], [0], [1], [0, 0, 1, 1], [], []>} : vector<10x10xbf16>, vector<10x128xbf16>, vector<10x128xf32> -> vector<10x128xf32>
    %210 = vector.extract_strided_slice %188 {offsets = [0, 0], sizes = [128, 128], strides = [1, 1]} : vector<256x128xbf16> to vector<128x128xbf16>
    %211 = arith.truncf %209 : vector<10x128xf32> to vector<10x128xbf16>
    %cst_96 = arith.constant dense<0.000000e+00> : vector<10x128xf32>
    %212 = tpu.matmul %211, %210, %cst_96 {dimension_numbers = #tpu.dot_dimension_numbers<[1], [0], [0], [1], [0, 0, 1, 1], [], []>} : vector<10x128xbf16>, vector<128x128xbf16>, vector<10x128xf32> -> vector<10x128xf32>
    %213 = arith.addf %189, %212 : vector<10x128xf32>
    %214 = vector.extract_strided_slice %186 {offsets = [0, 384], sizes = [10, 128], strides = [1, 1]} : vector<10x768xf32> to vector<10x128xf32>
    %215 = vector.extract_strided_slice %186 {offsets = [0, 512], sizes = [10, 128], strides = [1, 1]} : vector<10x768xf32> to vector<10x128xf32>
    %216 = vector.extract_strided_slice %186 {offsets = [0, 640], sizes = [10, 128], strides = [1, 1]} : vector<10x768xf32> to vector<10x128xf32>
    %217 = arith.truncf %214 : vector<10x128xf32> to vector<10x128xbf16>
    %218 = arith.truncf %215 : vector<10x128xf32> to vector<10x128xbf16>
    %cst_97 = arith.constant dense<0.000000e+00> : vector<10x10xf32>
    %219 = tpu.matmul %217, %218, %cst_97 {dimension_numbers = #tpu.dot_dimension_numbers<[1], [1], [0], [0], [0, 0, 1, 0], [], []>} : vector<10x128xbf16>, vector<10x128xbf16>, vector<10x10xf32> -> vector<10x10xf32>
    %220 = arith.addf %219, %6 : vector<10x10xf32>
    %cst_98 = arith.constant dense<0xFF800000> : vector<10xf32>
    %221 = vector.multi_reduction <maximumf>, %220, %cst_98 [1] : vector<10x10xf32> to vector<10xf32>
    %222 = vector.shape_cast %221 : vector<10xf32> to vector<10x1xf32>
    %223 = vector.broadcast %222 : vector<10x1xf32> to vector<10x10xf32>
    %224 = arith.subf %220, %223 : vector<10x10xf32>
    %225 = math.exp %224 : vector<10x10xf32>
    %cst_99 = arith.constant dense<0.000000e+00> : vector<10xf32>
    %226 = vector.multi_reduction <add>, %225, %cst_99 [1] : vector<10x10xf32> to vector<10xf32>
    %227 = vector.shape_cast %226 : vector<10xf32> to vector<10x1xf32>
    %228 = tpu.reciprocal %227 {approx = true} : vector<10x1xf32> -> vector<10x1xf32>
    %229 = vector.broadcast %228 : vector<10x1xf32> to vector<10x10xf32>
    %230 = arith.mulf %225, %229 : vector<10x10xf32>
    %231 = arith.truncf %230 : vector<10x10xf32> to vector<10x10xbf16>
    %232 = arith.truncf %216 : vector<10x128xf32> to vector<10x128xbf16>
    %cst_100 = arith.constant dense<0.000000e+00> : vector<10x128xf32>
    %233 = tpu.matmul %231, %232, %cst_100 {dimension_numbers = #tpu.dot_dimension_numbers<[1], [0], [0], [1], [0, 0, 1, 1], [], []>} : vector<10x10xbf16>, vector<10x128xbf16>, vector<10x128xf32> -> vector<10x128xf32>
    %234 = vector.extract_strided_slice %188 {offsets = [128, 0], sizes = [128, 128], strides = [1, 1]} : vector<256x128xbf16> to vector<128x128xbf16>
    %235 = arith.truncf %233 : vector<10x128xf32> to vector<10x128xbf16>
    %cst_101 = arith.constant dense<0.000000e+00> : vector<10x128xf32>
    %236 = tpu.matmul %235, %234, %cst_101 {dimension_numbers = #tpu.dot_dimension_numbers<[1], [0], [0], [1], [0, 0, 1, 1], [], []>} : vector<10x128xbf16>, vector<128x128xbf16>, vector<10x128xf32> -> vector<10x128xf32>
    %237 = arith.addf %213, %236 : vector<10x128xf32>
    %238 = arith.addf %152, %237 : vector<10x128xf32>
    %c1_102 = arith.constant 1 : index
    %c0_103 = arith.constant 0 : index
    %c0_104 = arith.constant 0 : index
    %239 = vector.load %arg10[%c1_102, %c0_103, %c0_104] : memref<2x1x128xf32, #tpu.memory_space<vmem>>, vector<1x1x128xf32>
    %240 = vector.shape_cast %239 : vector<1x1x128xf32> to vector<1x128xf32>
    %241 = vector.broadcast %240 : vector<1x128xf32> to vector<10x128xf32>
    %242 = arith.addf %238, %241 : vector<10x128xf32>
    %c1_105 = arith.constant 1 : index
    %c0_106 = arith.constant 0 : index
    %c0_107 = arith.constant 0 : index
    %243 = vector.load %arg11[%c1_105, %c0_106, %c0_107] : memref<2x1x128xf32, #tpu.memory_space<vmem>>, vector<1x1x128xf32>
    %244 = vector.shape_cast %243 : vector<1x1x128xf32> to vector<1x128xf32>
    %c1_108 = arith.constant 1 : index
    %c0_109 = arith.constant 0 : index
    %c0_110 = arith.constant 0 : index
    %245 = vector.load %arg12[%c1_108, %c0_109, %c0_110] : memref<2x1x128xf32, #tpu.memory_space<vmem>>, vector<1x1x128xf32>
    %246 = vector.shape_cast %245 : vector<1x1x128xf32> to vector<1x128xf32>
    %cst_111 = arith.constant dense<0.000000e+00> : vector<10xf32>
    %247 = vector.multi_reduction <add>, %242, %cst_111 [1] : vector<10x128xf32> to vector<10xf32>
    %248 = vector.shape_cast %247 : vector<10xf32> to vector<10x1xf32>
    %cst_112 = arith.constant 1.280000e+02 : f32
    %249 = vector.broadcast %cst_112 : f32 to vector<10x1xf32>
    %250 = arith.divf %248, %249 : vector<10x1xf32>
    %251 = arith.mulf %242, %242 : vector<10x128xf32>
    %cst_113 = arith.constant dense<0.000000e+00> : vector<10xf32>
    %252 = vector.multi_reduction <add>, %251, %cst_113 [1] : vector<10x128xf32> to vector<10xf32>
    %253 = vector.shape_cast %252 : vector<10xf32> to vector<10x1xf32>
    %cst_114 = arith.constant 1.280000e+02 : f32
    %254 = vector.broadcast %cst_114 : f32 to vector<10x1xf32>
    %255 = arith.divf %253, %254 : vector<10x1xf32>
    %256 = arith.mulf %250, %250 : vector<10x1xf32>
    %257 = arith.subf %255, %256 : vector<10x1xf32>
    %258 = vector.broadcast %250 : vector<10x1xf32> to vector<10x128xf32>
    %259 = arith.subf %242, %258 : vector<10x128xf32>
    %cst_115 = arith.constant 9.99999997E-7 : f32
    %260 = vector.broadcast %cst_115 : f32 to vector<10x1xf32>
    %261 = arith.addf %257, %260 : vector<10x1xf32>
    %262 = math.rsqrt %261 : vector<10x1xf32>
    %263 = vector.broadcast %262 : vector<10x1xf32> to vector<10x128xf32>
    %264 = arith.mulf %259, %263 : vector<10x128xf32>
    %265 = vector.broadcast %244 : vector<1x128xf32> to vector<10x128xf32>
    %266 = arith.mulf %264, %265 : vector<10x128xf32>
    %267 = vector.broadcast %246 : vector<1x128xf32> to vector<10x128xf32>
    %268 = arith.addf %266, %267 : vector<10x128xf32>
    %c1_116 = arith.constant 1 : index
    %c0_117 = arith.constant 0 : index
    %c0_118 = arith.constant 0 : index
    %269 = vector.load %arg13[%c1_116, %c0_117, %c0_118] : memref<2x128x512xbf16, #tpu.memory_space<vmem>>, vector<1x128x512xbf16>
    %270 = vector.shape_cast %269 : vector<1x128x512xbf16> to vector<128x512xbf16>
    %271 = arith.truncf %268 : vector<10x128xf32> to vector<10x128xbf16>
    %cst_119 = arith.constant dense<0.000000e+00> : vector<10x512xf32>
    %272 = tpu.matmul %271, %270, %cst_119 {dimension_numbers = #tpu.dot_dimension_numbers<[1], [0], [0], [1], [0, 0, 1, 1], [], []>} : vector<10x128xbf16>, vector<128x512xbf16>, vector<10x512xf32> -> vector<10x512xf32>
    %c1_120 = arith.constant 1 : index
    %c0_121 = arith.constant 0 : index
    %c0_122 = arith.constant 0 : index
    %273 = vector.load %arg14[%c1_120, %c0_121, %c0_122] : memref<2x1x512xf32, #tpu.memory_space<vmem>>, vector<1x1x512xf32>
    %274 = vector.shape_cast %273 : vector<1x1x512xf32> to vector<1x512xf32>
    %275 = vector.broadcast %274 : vector<1x512xf32> to vector<10x512xf32>
    %276 = arith.addf %272, %275 : vector<10x512xf32>
    %277 = arith.mulf %276, %276 : vector<10x512xf32>
    %278 = arith.mulf %276, %277 : vector<10x512xf32>
    %cst_123 = arith.constant 4.471500e-02 : f32
    %279 = vector.broadcast %cst_123 : f32 to vector<10x512xf32>
    %280 = arith.mulf %279, %278 : vector<10x512xf32>
    %281 = arith.addf %276, %280 : vector<10x512xf32>
    %cst_124 = arith.constant 0.797884583 : f32
    %282 = vector.broadcast %cst_124 : f32 to vector<10x512xf32>
    %283 = arith.mulf %282, %281 : vector<10x512xf32>
    %284 = math.tanh %283 : vector<10x512xf32>
    %cst_125 = arith.constant 1.000000e+00 : f32
    %285 = vector.broadcast %cst_125 : f32 to vector<10x512xf32>
    %286 = arith.addf %285, %284 : vector<10x512xf32>
    %cst_126 = arith.constant 5.000000e-01 : f32
    %287 = vector.broadcast %cst_126 : f32 to vector<10x512xf32>
    %288 = arith.mulf %287, %286 : vector<10x512xf32>
    %289 = arith.mulf %276, %288 : vector<10x512xf32>
    %c1_127 = arith.constant 1 : index
    %c0_128 = arith.constant 0 : index
    %c0_129 = arith.constant 0 : index
    %290 = vector.load %arg15[%c1_127, %c0_128, %c0_129] : memref<2x512x128xbf16, #tpu.memory_space<vmem>>, vector<1x512x128xbf16>
    %291 = vector.shape_cast %290 : vector<1x512x128xbf16> to vector<512x128xbf16>
    %292 = arith.truncf %289 : vector<10x512xf32> to vector<10x512xbf16>
    %cst_130 = arith.constant dense<0.000000e+00> : vector<10x128xf32>
    %293 = tpu.matmul %292, %291, %cst_130 {dimension_numbers = #tpu.dot_dimension_numbers<[1], [0], [0], [1], [0, 0, 1, 1], [], []>} : vector<10x512xbf16>, vector<512x128xbf16>, vector<10x128xf32> -> vector<10x128xf32>
    %294 = arith.addf %242, %293 : vector<10x128xf32>
    %c1_131 = arith.constant 1 : index
    %c0_132 = arith.constant 0 : index
    %c0_133 = arith.constant 0 : index
    %295 = vector.load %arg16[%c1_131, %c0_132, %c0_133] : memref<2x1x128xf32, #tpu.memory_space<vmem>>, vector<1x1x128xf32>
    %296 = vector.shape_cast %295 : vector<1x1x128xf32> to vector<1x128xf32>
    %297 = vector.broadcast %296 : vector<1x128xf32> to vector<10x128xf32>
    %298 = arith.addf %294, %297 : vector<10x128xf32>
    %c0_134 = arith.constant 0 : index
    %c0_135 = arith.constant 0 : index
    %299 = vector.load %arg17[%c0_134, %c0_135] : memref<1x128xf32, #tpu.memory_space<vmem>>, vector<1x128xf32>
    %c0_136 = arith.constant 0 : index
    %c0_137 = arith.constant 0 : index
    %300 = vector.load %arg18[%c0_136, %c0_137] : memref<1x128xf32, #tpu.memory_space<vmem>>, vector<1x128xf32>
    %cst_138 = arith.constant dense<0.000000e+00> : vector<10xf32>
    %301 = vector.multi_reduction <add>, %298, %cst_138 [1] : vector<10x128xf32> to vector<10xf32>
    %302 = vector.shape_cast %301 : vector<10xf32> to vector<10x1xf32>
    %cst_139 = arith.constant 1.280000e+02 : f32
    %303 = vector.broadcast %cst_139 : f32 to vector<10x1xf32>
    %304 = arith.divf %302, %303 : vector<10x1xf32>
    %305 = arith.mulf %298, %298 : vector<10x128xf32>
    %cst_140 = arith.constant dense<0.000000e+00> : vector<10xf32>
    %306 = vector.multi_reduction <add>, %305, %cst_140 [1] : vector<10x128xf32> to vector<10xf32>
    %307 = vector.shape_cast %306 : vector<10xf32> to vector<10x1xf32>
    %cst_141 = arith.constant 1.280000e+02 : f32
    %308 = vector.broadcast %cst_141 : f32 to vector<10x1xf32>
    %309 = arith.divf %307, %308 : vector<10x1xf32>
    %310 = arith.mulf %304, %304 : vector<10x1xf32>
    %311 = arith.subf %309, %310 : vector<10x1xf32>
    %312 = vector.broadcast %304 : vector<10x1xf32> to vector<10x128xf32>
    %313 = arith.subf %298, %312 : vector<10x128xf32>
    %cst_142 = arith.constant 9.99999997E-7 : f32
    %314 = vector.broadcast %cst_142 : f32 to vector<10x1xf32>
    %315 = arith.addf %311, %314 : vector<10x1xf32>
    %316 = math.rsqrt %315 : vector<10x1xf32>
    %317 = vector.broadcast %316 : vector<10x1xf32> to vector<10x128xf32>
    %318 = arith.mulf %313, %317 : vector<10x128xf32>
    %319 = vector.broadcast %299 : vector<1x128xf32> to vector<10x128xf32>
    %320 = arith.mulf %318, %319 : vector<10x128xf32>
    %321 = vector.broadcast %300 : vector<1x128xf32> to vector<10x128xf32>
    %322 = arith.addf %320, %321 : vector<10x128xf32>
    %c0_143 = arith.constant 0 : index
    %c0_144 = arith.constant 0 : index
    %323 = vector.load %arg19[%c0_143, %c0_144] : memref<128x128xbf16, #tpu.memory_space<vmem>>, vector<128x128xbf16>
    %324 = arith.truncf %322 : vector<10x128xf32> to vector<10x128xbf16>
    %cst_145 = arith.constant dense<0.000000e+00> : vector<10x128xf32>
    %325 = tpu.matmul %324, %323, %cst_145 {dimension_numbers = #tpu.dot_dimension_numbers<[1], [0], [0], [1], [0, 0, 1, 1], [], []>} : vector<10x128xbf16>, vector<128x128xbf16>, vector<10x128xf32> -> vector<10x128xf32>
    %c0_146 = arith.constant 0 : index
    %c0_147 = arith.constant 0 : index
    %326 = vector.load %arg20[%c0_146, %c0_147] : memref<1x128xf32, #tpu.memory_space<vmem>>, vector<1x128xf32>
    %327 = vector.broadcast %326 : vector<1x128xf32> to vector<10x128xf32>
    %328 = arith.addf %325, %327 : vector<10x128xf32>
    %c0_148 = arith.constant 0 : index
    %c0_149 = arith.constant 0 : index
    %329 = vector.load %arg21[%c0_148, %c0_149] : memref<10x128xf32, #tpu.memory_space<vmem>>, vector<10x128xf32>
    tpu.vector_store %arg21[%c0_148, %c0_149], %328 {strides = array<i32>} : memref<10x128xf32, #tpu.memory_space<vmem>>, vector<10x128xf32>,
    return
  }
  func.func @transform_0(%arg0: i32) -> (i32, i32) {
    %c0_i32 = arith.constant 0 : i32
    %c0_i32_0 = arith.constant 0 : i32
    %c0_i32_1 = arith.constant 0 : i32
    return %c0_i32, %c0_i32_0 : i32, i32
  }
  func.func @transform_1(%arg0: i32) -> (i32, i32) {
    %c0_i32 = arith.constant 0 : i32
    %c0_i32_0 = arith.constant 0 : i32
    %c0_i32_1 = arith.constant 0 : i32
    return %c0_i32, %c0_i32_0 : i32, i32
  }
  func.func @transform_2(%arg0: i32) -> (i32, i32) {
    %c0_i32 = arith.constant 0 : i32
    %c0_i32_0 = arith.constant 0 : i32
    %c0_i32_1 = arith.constant 0 : i32
    return %c0_i32, %c0_i32_0 : i32, i32
  }
  func.func @transform_3(%arg0: i32) -> (i32, i32) {
    %c0_i32 = arith.constant 0 : i32
    %c0_i32_0 = arith.constant 0 : i32
    %c0_i32_1 = arith.constant 0 : i32
    return %c0_i32, %c0_i32_0 : i32, i32
  }
  func.func @transform_4(%arg0: i32) -> (i32, i32, i32) {
    %c0_i32 = arith.constant 0 : i32
    %c0_i32_0 = arith.constant 0 : i32
    %c0_i32_1 = arith.constant 0 : i32
    %c0_i32_2 = arith.constant 0 : i32
    return %c0_i32, %c0_i32_0, %c0_i32_1 : i32, i32, i32
  }
  func.func @transform_5(%arg0: i32) -> (i32, i32, i32) {
    %c0_i32 = arith.constant 0 : i32
    %c0_i32_0 = arith.constant 0 : i32
    %c0_i32_1 = arith.constant 0 : i32
    %c0_i32_2 = arith.constant 0 : i32
    return %c0_i32, %c0_i32_0, %c0_i32_1 : i32, i32, i32
  }
  func.func @transform_6(%arg0: i32) -> (i32, i32, i32) {
    %c0_i32 = arith.constant 0 : i32
    %c0_i32_0 = arith.constant 0 : i32
    %c0_i32_1 = arith.constant 0 : i32
    %c0_i32_2 = arith.constant 0 : i32
    return %c0_i32, %c0_i32_0, %c0_i32_1 : i32, i32, i32
  }
  func.func @transform_7(%arg0: i32) -> (i32, i32, i32) {
    %c0_i32 = arith.constant 0 : i32
    %c0_i32_0 = arith.constant 0 : i32
    %c0_i32_1 = arith.constant 0 : i32
    %c0_i32_2 = arith.constant 0 : i32
    return %c0_i32, %c0_i32_0, %c0_i32_1 : i32, i32, i32
  }
  func.func @transform_8(%arg0: i32) -> (i32, i32, i32) {
    %c0_i32 = arith.constant 0 : i32
    %c0_i32_0 = arith.constant 0 : i32
    %c0_i32_1 = arith.constant 0 : i32
    %c0_i32_2 = arith.constant 0 : i32
    return %c0_i32, %c0_i32_0, %c0_i32_1 : i32, i32, i32
  }
  func.func @transform_9(%arg0: i32) -> (i32, i32, i32) {
    %c0_i32 = arith.constant 0 : i32
    %c0_i32_0 = arith.constant 0 : i32
    %c0_i32_1 = arith.constant 0 : i32
    %c0_i32_2 = arith.constant 0 : i32
    return %c0_i32, %c0_i32_0, %c0_i32_1 : i32, i32, i32
  }
  func.func @transform_10(%arg0: i32) -> (i32, i32, i32) {
    %c0_i32 = arith.constant 0 : i32
    %c0_i32_0 = arith.constant 0 : i32
    %c0_i32_1 = arith.constant 0 : i32
    %c0_i32_2 = arith.constant 0 : i32
    return %c0_i32, %c0_i32_0, %c0_i32_1 : i32, i32, i32
  }
  func.func @transform_11(%arg0: i32) -> (i32, i32, i32) {
    %c0_i32 = arith.constant 0 : i32
    %c0_i32_0 = arith.constant 0 : i32
    %c0_i32_1 = arith.constant 0 : i32
    %c0_i32_2 = arith.constant 0 : i32
    return %c0_i32, %c0_i32_0, %c0_i32_1 : i32, i32, i32
  }
  func.func @transform_12(%arg0: i32) -> (i32, i32, i32) {
    %c0_i32 = arith.constant 0 : i32
    %c0_i32_0 = arith.constant 0 : i32
    %c0_i32_1 = arith.constant 0 : i32
    %c0_i32_2 = arith.constant 0 : i32
    return %c0_i32, %c0_i32_0, %c0_i32_1 : i32, i32, i32
  }
  func.func @transform_13(%arg0: i32) -> (i32, i32, i32) {
    %c0_i32 = arith.constant 0 : i32
    %c0_i32_0 = arith.constant 0 : i32
    %c0_i32_1 = arith.constant 0 : i32
    %c0_i32_2 = arith.constant 0 : i32
    return %c0_i32, %c0_i32_0, %c0_i32_1 : i32, i32, i32
  }
  func.func @transform_14(%arg0: i32) -> (i32, i32, i32) {
    %c0_i32 = arith.constant 0 : i32
    %c0_i32_0 = arith.constant 0 : i32
    %c0_i32_1 = arith.constant 0 : i32
    %c0_i32_2 = arith.constant 0 : i32
    return %c0_i32, %c0_i32_0, %c0_i32_1 : i32, i32, i32
  }
  func.func @transform_15(%arg0: i32) -> (i32, i32, i32) {
    %c0_i32 = arith.constant 0 : i32
    %c0_i32_0 = arith.constant 0 : i32
    %c0_i32_1 = arith.constant 0 : i32
    %c0_i32_2 = arith.constant 0 : i32
    return %c0_i32, %c0_i32_0, %c0_i32_1 : i32, i32, i32
  }
  func.func @transform_16(%arg0: i32) -> (i32, i32) {
    %c0_i32 = arith.constant 0 : i32
    %c0_i32_0 = arith.constant 0 : i32
    %c0_i32_1 = arith.constant 0 : i32
    return %c0_i32, %c0_i32_0 : i32, i32
  }
  func.func @transform_17(%arg0: i32) -> (i32, i32) {
    %c0_i32 = arith.constant 0 : i32
    %c0_i32_0 = arith.constant 0 : i32
    %c0_i32_1 = arith.constant 0 : i32
    return %c0_i32, %c0_i32_0 : i32, i32
  }
  func.func @transform_18(%arg0: i32) -> (i32, i32) {
    %c0_i32 = arith.constant 0 : i32
    %c0_i32_0 = arith.constant 0 : i32
    %c0_i32_1 = arith.constant 0 : i32
    return %c0_i32, %c0_i32_0 : i32, i32
  }
  func.func @transform_19(%arg0: i32) -> (i32, i32) {
    %c0_i32 = arith.constant 0 : i32
    %c0_i32_0 = arith.constant 0 : i32
    %c0_i32_1 = arith.constant 0 : i32
    return %c0_i32, %c0_i32_0 : i32, i32
  }
  func.func @transform_20(%arg0: i32) -> (i32, i32) {
    %c0_i32 = arith.constant 0 : i32
    %c0_i32_0 = arith.constant 0 : i32
    %c0_i32_1 = arith.constant 0 : i32
    return %c0_i32, %c0_i32_0 : i32, i32
  }
}

</mosaic_0001>

<bundles_post_ra>
// kernel: tile.9
= control target key start
LH: loop header
LB: loop body
LE: loop exit
PB: predicated region body
PF: predicated region fallthrough
CT: control target
= control target key end

     0   :  { %s32_s0 = inlined_call_operand.vmem [shape: f32[2,5,128], index: 0, kind: input, shape index: {}]   ;;  %s33_s1 = inlined_call_operand.vmem [shape: f32[10,128], index: 1, kind: output, shape index: {}]  }
   0x1   :  { %v2_v0 = vld [vmem:[%s32_s0] sm:$0x1f]   ;;  %v8_v1 = vld [vmem:[%s32_s0 + $0x8] sm:$0x1f]  }
   0x2   :  { %3 = vst [vmem:[%s33_s1] sm:$0x1f] %v2_v0  }
   0x3   :  { %9 = vst [vmem:[%s33_s1 + $0x5] sm:$0x1f] %v8_v1  }

// kernel: finetuned_dino_forward.2
= control target key start
LH: loop header
LB: loop body
LE: loop exit
PB: predicated region body
PF: predicated region fallthrough
CT: control target
= control target key end

     0   :  { %s6649_s0 = inlined_call_operand.vmem [shape: f32[10,192], index: 0, kind: input, shape index: {}]   ;;  %s6650_s1 = inlined_call_operand.vmem [shape: f32[10,128], index: 1, kind: input, shape index: {}]   ;;  %s6651_s2 = inlined_call_operand.hbm [shape: bf16[192,128], index: 2, kind: input, shape index: {}]   ;;  %s6652_s3 = inlined_call_operand.hbm [shape: f32[2,1,128], index: 3, kind: input, shape index: {}]   ;;  %s6653_s4 = inlined_call_operand.hbm [shape: f32[2,1,128], index: 4, kind: input, shape index: {}]   ;;  %s6654_s5 = inlined_call_operand.vmem [shape: bf16[2,128,768], index: 5, kind: input, shape index: {}]   ;;  %s6655_s6 = inlined_call_operand.hbm [shape: f32[2,1,768], index: 6, kind: input, shape index: {}]   ;;  %s6656_s7 = inlined_call_operand.vmem [shape: bf16[2,256,128], index: 7, kind: input, shape index: {}]   ;;  %s6657_s8 = inlined_call_operand.hbm [shape: f32[2,1,128], index: 8, kind: input, shape index: {}]   ;;  %s6658_s9 = inlined_call_operand.hbm [shape: f32[2,1,128], index: 9, kind: input, shape index: {}]   ;;  %s6659_s10 = inlined_call_operand.hbm [shape: f32[2,1,128], index: 10, kind: input, shape index: {}]   ;;  %s6660_s11 = inlined_call_operand.hbm [shape: bf16[2,128,512], index: 11, kind: input, shape index: {}]   ;;  %s6661_s12 = inlined_call_operand.hbm [shape: f32[2,1,512], index: 12, kind: input, shape index: {}]   ;;  %s6662_s13 = inlined_call_operand.hbm [shape: bf16[2,512,128], index: 13, kind: input, shape index: {}]   ;;  %s6663_s14 = inlined_call_operand.hbm [shape: f32[2,1,128], index: 14, kind: input, shape index: {}]   ;;  %s6664_s15 = inlined_call_operand.vmem [shape: f32[1,128], index: 15, kind: input, shape index: {}]   ;;  %s6665_s16 = inlined_call_operand.hbm [shape: f32[1,128], index: 16, kind: input, shape index: {}]   ;;  %s6666_s17 = inlined_call_operand.vmem [shape: bf16[128,128], index: 17, kind: input, shape index: {}]   ;;  %s6667_s18 = inlined_call_operand.hbm [shape: f32[1,128], index: 18, kind: input, shape index: {}]   ;;  %s6668_s19 = inlined_call_operand.<no memory space> [shape: f32[], index: 19, kind: input, shape index: {}]   ;;  %s6669_s20 = inlined_call_operand.<no memory space> [shape: f32[], index: 20, kind: input, shape index: {}]   ;;  %s6670_s21 = inlined_call_operand.vmem [shape: s32[10], index: 21, kind: input, shape index: {}]   ;;  %s6671_s22 = inlined_call_operand.vmem [shape: f32[10,128], index: 22, kind: output, shape index: {}]  }
   0x1   :  { %6676 = sst [smem:[#allocation30_spill]] %s6649_s0  ;;  %v27_v0 = vstv %s6668_s19  ;;  %v28_v1 = vstv %s6669_s20 }
   0x2   :  { %6677 = sst [smem:[#allocation31_spill]] %s6650_s1 }
   0x3   :  { %6678 = sst [smem:[#allocation32_spill]] %s6651_s2 }
   0x4   :  { %6679 = sst [smem:[#allocation33_spill]] %s6652_s3 }
   0x5   :  { %6680 = sst [smem:[#allocation34_spill]] %s6653_s4 }
   0x6   :  { %6681 = sst [smem:[#allocation35_spill]] %s6654_s5 }
   0x7   :  { %6682 = sst [smem:[#allocation36_spill]] %s6655_s6 }
   0x8   :  { %6683 = sst [smem:[#allocation37_spill]] %s6664_s15 }
   0x9   :  { %6684 = sst [smem:[#allocation38_spill]] %s6671_s22 }
   0xa   :  { %29 = vsyncpa [#allocation3], 0 }
   0xb   :  { %30 = vsyncpa [#allocation5], 0 }
   0xc   :  { %31 = vsyncpa [#allocation8], 0 }
   0xd   :  { %32 = vsyncpa [#allocation11], 0 }
   0xe   :  { %33 = vsyncpa [#allocation14], 0 }
   0xf   :  { %34 = vsyncpa [#allocation17], 0  ;;  %s6685_s23 = sld [smem:[#allocation33_spill]] }
  0x15   :  { %s61_s1 = sshll.u32 %s6685_s23, 4  ;;  %s62_s1 = int_to_ptr.hbm [resolvable:$true] %s61_s1 }
  0x16   :  { %35 = vsyncpa [#allocation20], 0  ;;  %s5431_s5 = smov [#allocation4]   ;;  %s6686_s26 = sld [smem:[#allocation36_spill]] }
  0x17   :  { %s63_s24 = sshll.u32 %s5431_s5, 4  ;;  %s5432_s27 = smov 16   ;;  %s64_s24 = int_to_ptr.vmem [resolvable:$true] %s63_s24 }
  0x18   :  { %s5433_s3 = smov 1   ;;  %s5434_s28 = smov [#allocation7]  }
  0x19   :  { %69 = dma.hbm_to_vmem [thread:$0]  %s62_s1, 32, %s64_s24, [#allocation5], %s5432_s27, %s5432_s27, %s5433_s3  }
  0x1a   :  { %s91_s29 = sshll.u32 %s5434_s28, 4  ;;  %s5435_s30 = smov 96   ;;  %s92_s29 = int_to_ptr.vmem [resolvable:$true] %s91_s29 }
  0x1b   :  { %s5436_s4 = smov 6   ;;  %s117_s5 = sshll.u32 %s6658_s9, 4  ;;  %s118_s5 = int_to_ptr.hbm [resolvable:$true] %s117_s5 }
  0x1c   :  { %s89_s2 = sshll.u32 %s6686_s26, 4  ;;  %s5437_s6 = smov [#allocation10]   ;;  %s90_s2 = int_to_ptr.hbm [resolvable:$true] %s89_s2 }
  0x1d   :  { %97 = dma.hbm_to_vmem [thread:$0]  %s90_s2, 192, %s92_s29, [#allocation8], %s5435_s30, %s5435_s30, %s5436_s4  }
  0x1e   :  { %s119_s25 = sshll.u32 %s5437_s6, 4  ;;  %s143_s15 = sshll.u32 %s6660_s11, 4  ;;  %s120_s25 = int_to_ptr.vmem [resolvable:$true] %s119_s25  ;;  %s144_s15 = int_to_ptr.hbm [resolvable:$true] %s143_s15 }
  0x1f   :  { %125 = dma.hbm_to_vmem [thread:$0]  %s118_s5, 32, %s120_s25, [#allocation11], %s5432_s27, %s5432_s27, %s5433_s3  }
  0x20   :  { %s5438_s1 = smov [#allocation13]   ;;  %s5439_s2 = smov 256  }
  0x21   :  { %s145_s24 = sshll.u32 %s5438_s1, 4  ;;  %s169_s29 = sshll.u32 %s6662_s13, 4  ;;  %s146_s24 = int_to_ptr.vmem [resolvable:$true] %s145_s24  ;;  %s170_s29 = int_to_ptr.hbm [resolvable:$true] %s169_s29 }
  0x22   :  { %151 = dma.hbm_to_vmem [thread:$0]  %s144_s15, 8192, %s146_s24, [#allocation14], %s5439_s2, %s5439_s2, %s5432_s27  }
  0x23   :  { %s5440_s30 = smov [#allocation16]   ;;  %s198_s0 = sshll.u32 %s6665_s16, 4  ;;  %s199_s0 = int_to_ptr.hbm [resolvable:$true] %s198_s0 }
  0x24   :  { %s171_s4 = sshll.u32 %s5440_s30, 4  ;;  %s5441_s23 = smov 64   ;;  %s172_s4 = int_to_ptr.vmem [resolvable:$true] %s171_s4 }
  0x25   :  { %s5442_s5 = smov 4   ;;  %s6687_s25 = sld [smem:[#allocation32_spill]] }
  0x26   :  { %177 = dma.hbm_to_vmem [thread:$0]  %s170_s29, 8192, %s172_s4, [#allocation17], %s5441_s23, %s5441_s23, %s5442_s5  }
  0x27   :  { %s5443_s13 = smov [#allocation19]   ;;  %s5444_s24 = smov [#allocation2]  }
  0x28   :  { %s200_s1 = sshll.u32 %s5443_s13, 4  ;;  %s50_s2 = sshll.u32 %s5444_s24, 4  ;;  %s201_s1 = int_to_ptr.vmem [resolvable:$true] %s200_s1  ;;  %s51_s2 = int_to_ptr.vmem [resolvable:$true] %s50_s2 }
  0x29   :  { %203 = dma.hbm_to_vmem [thread:$0]  %s199_s0, 16, %s201_s1, [#allocation20]  }
  0x2a   :  { %s6688_s28 = sld [smem:[#allocation34_spill]]  ;;  %s104_s22 = sshll.u32 %s6657_s8, 4  ;;  %s105_s22 = int_to_ptr.hbm [resolvable:$true] %s104_s22 }
  0x2b   :  { %s48_s26 = sshll.u32 %s6687_s25, 4  ;;  %s5445_s11 = smov [#allocation6]   ;;  %s49_s26 = int_to_ptr.hbm [resolvable:$true] %s48_s26 }
  0x2c   :  { %56 = dma.hbm_to_vmem [thread:$0]  %s49_s26, 1536, %s51_s2, [#allocation3], %s5441_s23, %s5441_s23, %s5442_s5  }
  0x2d   :  { %s76_s15 = sshll.u32 %s5445_s11, 4  ;;  %s5446_s0 = smov [#allocation9]   ;;  %s77_s15 = int_to_ptr.vmem [resolvable:$true] %s76_s15 }
  0x2e   :  { %s106_s6 = sshll.u32 %s5446_s0, 4  ;;  %s130_s1 = sshll.u32 %s6659_s10, 4  ;;  %s107_s6 = int_to_ptr.vmem [resolvable:$true] %s106_s6  ;;  %s131_s1 = int_to_ptr.hbm [resolvable:$true] %s130_s1 }
  0x2f   :  { %112 = dma.hbm_to_vmem [thread:$0]  %s105_s22, 32, %s107_s6, [#allocation8], %s5432_s27, %s5432_s27, %s5433_s3  }
  0x30   :  { %s74_s30 = sshll.u32 %s6688_s28, 4  ;;  %s156_s24 = sshll.u32 %s6661_s12, 4  ;;  %s75_s30 = int_to_ptr.hbm [resolvable:$true] %s74_s30  ;;  %s157_s24 = int_to_ptr.hbm [resolvable:$true] %s156_s24 }
  0x31   :  { %82 = dma.hbm_to_vmem [thread:$0]  %s75_s30, 32, %s77_s15, [#allocation5], %s5432_s27, %s5432_s27, %s5433_s3  }
  0x32   :  { %s5447_s2 = smov [#allocation12]   ;;  %s5448_s9 = smov [#allocation15]  }
  0x33   :  { %s132_s16 = sshll.u32 %s5447_s2, 4  ;;  %s158_s10 = sshll.u32 %s5448_s9, 4  ;;  %s133_s16 = int_to_ptr.vmem [resolvable:$true] %s132_s16  ;;  %s159_s10 = int_to_ptr.vmem [resolvable:$true] %s158_s10 }
  0x34   :  { %138 = dma.hbm_to_vmem [thread:$0]  %s131_s1, 32, %s133_s16, [#allocation11], %s5432_s27, %s5432_s27, %s5433_s3  }
  0x35   :  { %s182_s29 = sshll.u32 %s6663_s14, 4  ;;  %s211_s22 = sshll.u32 %s6667_s18, 4  ;;  %s183_s29 = int_to_ptr.hbm [resolvable:$true] %s182_s29  ;;  %s212_s22 = int_to_ptr.hbm [resolvable:$true] %s211_s22 }
  0x36   :  { %164 = dma.hbm_to_vmem [thread:$0]  %s157_s24, 128, %s159_s10, [#allocation14], %s5441_s23, %s5441_s23, %s5442_s5  }
  0x37   :  { %s5449_s11 = smov [#allocation18]   ;;  %s5450_s0 = smov [#allocation21]  }
  0x38   :  { %s184_s15 = sshll.u32 %s5449_s11, 4  ;;  %s213_s14 = sshll.u32 %s5450_s0, 4  ;;  %s185_s15 = int_to_ptr.vmem [resolvable:$true] %s184_s15  ;;  %s214_s14 = int_to_ptr.vmem [resolvable:$true] %s213_s14 }
  0x39   :  { %190 = dma.hbm_to_vmem [thread:$0]  %s183_s29, 32, %s185_s15, [#allocation17], %s5432_s27, %s5432_s27, %s5433_s3  }
  0x3a   :  { %216 = dma.hbm_to_vmem [thread:$0]  %s212_s22, 16, %s214_s14, [#allocation20]  }
  0x3b   :  { %5417 = dma.done.wait [#allocation3], 1536  }
  0x3c   :  { %5418 = vsyncadd [#allocation3], 4294965760 }
  0x3d   :  { %5419 = dma.done.wait [#allocation5], 64  }
  0x3e   :  { %5420 = vsyncadd [#allocation5], 4294967232 }
  0x3f   :  { %5421 = dma.done.wait [#allocation8], 224  }
  0x40   :  { %5422 = vsyncadd [#allocation8], 4294967072 }
  0x41   :  { %5423 = dma.done.wait [#allocation11], 64  }
  0x42   :  { %5424 = vsyncadd [#allocation11], 4294967232 }
  0x43   :  { %5425 = dma.done.wait [#allocation14], 8320  }
  0x44   :  { %5426 = vsyncadd [#allocation14], 4294958976 }
  0x45   :  { %5427 = dma.done.wait [#allocation17], 8224  }
  0x46   :  { %5428 = vsyncadd [#allocation17], 4294959072 }
  0x47   :  { %5429 = dma.done.wait [#allocation20], 32  }
  0x48   :  { %5430 = vsyncadd [#allocation20], 4294967264  ;;  %v4709_v2 = vld [vmem:[#allocation2 + $0x38] sm:$0xff]  ;;  %v4708_v4 = vld [vmem:[#allocation2 + $0x30] sm:$0xff]  ;;  %s6689_s3 = sld [smem:[#allocation30_spill]]  ;;  %vm414_vm0 = vcmask 523264  }
  0x49   :  { %v4713_v3 = vld [vmem:[#allocation2 + $0x58] sm:$0xff]  ;;  %418 = vmatpush.bf16.msra.mxu0 %v4709_v2  ;;  %v4712_v5 = vld [vmem:[#allocation2 + $0x50] sm:$0xff]  ;;  %v4707_v6 = vld [vmem:[#allocation2 + $0x28] sm:$0xff]  ;;  %s6690_s24 = sld [smem:[#allocation35_spill]]  ;;  %vm452_vm1 = vcmask 1041408   ;;  %v5451_v45 = vmov 128.0  }
  0x4a   :  { %436 = vmatpush.bf16.msra.mxu1 %v4713_v3  ;;  %v4711_v7 = vld [vmem:[#allocation2 + $0x48] sm:$0xff]  ;;  %v4706_v8 = vld [vmem:[#allocation2 + $0x20] sm:$0xff]  ;;  %v4705_v12 = vld [vmem:[#allocation2 + $0x18] sm:$0xff]  ;;  %s6691_s4 = sld [smem:[#allocation31_spill]]  ;;  %5017 = vrcp.f32 %v5451_v45  ;;  %vm978_vm9 = vcmask 1044480   ;;  %vm949_vm12 = vcmask 80896  }
  0x4b   :  { %v4710_v9 = vld [vmem:[#allocation2 + $0x40] sm:$0xff]  ;;  %v4704_v14 = vld [vmem:[#allocation2 + $0x10] sm:$0xff]  ;;  %v4703_v15 = vld [vmem:[#allocation2 + $0x8] sm:$0xff]  ;;  %vm953_vm13 = vcmask 74752   ;;  %s6692_s25 = sld [smem:[#allocation37_spill]] }
  0x4c   :  { %v4702_v16 = vld [vmem:[#allocation2] sm:$0xff]  ;;  %s6693_s1 = sld [smem:[#allocation38_spill]] }
  0x4d   :  { %419 = vmatpush.bf16.msra.mxu0 %v4708_v4 }
  0x4e   :  { %437 = vmatpush.bf16.msra.mxu1 %v4712_v5  ;;  %v311_v10 = vld [vmem:[%s6689_s3 + $0x8] sm:$0xff]  ;;  %v313_v11 = vld [vmem:[%s6689_s3 + $0x18] sm:$0x3]  ;;  %v310_v17 = vld [vmem:[%s6689_s3] sm:$0xff] }
  0x4f   :  { %v339_v13 = vpack.c.bf16 %v313_v11, %v311_v10  ;;  %v312_v18 = vld [vmem:[%s6689_s3 + $0x10] sm:$0x3]  ;;  %v4759_v21 = vld [vmem:[%s6690_s24 + $0x164] sm:$0xf0]  ;;  %v4756_v22 = vld [vmem:[%s6690_s24 + $0x154] sm:$0xf] }
  0x50   :  { %v338_v19 = vpack.c.bf16 %v312_v18, %v310_v17  ;;  %v3732_v20 = vld [vmem:[%s6690_s24 + $0x150] sm:$0xf]  ;;  %v3734_v24 = vld [vmem:[%s6690_s24 + $0x168] sm:$0xf0]  ;;  %v340_v26 = vld [vmem:[%s6691_s4] sm:$0xff]  ;;  %v5706_v53 = vpop.eup %5017 }
  0x51   :  { %420 = vmatpush.bf16.msra.mxu0 %v4707_v6  ;;  %v3733_v23 = vor.u32 %v4759_v21, %v3732_v20  ;;  %v3737_v25 = vor.u32 %v4756_v22, %v3734_v24  ;;  %v341_v32 = vld [vmem:[%s6691_s4 + $0x8] sm:$0x3]  ;;  %v3708_v40 = vld [vmem:[%s6690_s24 + $0x120] sm:$0xf]  ;;  %v4753_v41 = vld [vmem:[%s6690_s24 + $0x134] sm:$0xf0]  ;;  %vm461_vm2 = vweird.f32 %v5706_v53 }
  0x52   :  { %438 = vmatpush.bf16.msra.mxu1 %v4711_v7  ;;  %v4750_v42 = vld [vmem:[%s6690_s24 + $0x124] sm:$0xf]  ;;  %v3709_v43 = vor.u32 %v4753_v41, %v3708_v40  ;;  %v3710_v44 = vld [vmem:[%s6690_s24 + $0x138] sm:$0xf0]  ;;  %v3684_v47 = vld [vmem:[%s6690_s24 + $0xf0] sm:$0xf] }
  0x53   :  { %817 = vmatpush.bf16.msra.mxu2 %v3733_v23  ;;  %831 = vmatpush.bf16.msra.mxu3 %v3737_v25  ;;  %v3713_v46 = vor.u32 %v4750_v42, %v3710_v44  ;;  %v4747_v48 = vld [vmem:[%s6690_s24 + $0x104] sm:$0xf0]  ;;  %v4744_v49 = vld [vmem:[%s6690_s24 + $0xf4] sm:$0xf]  ;;  %v3686_v51 = vld [vmem:[%s6690_s24 + $0x108] sm:$0xf0] }
  0x54   :  { %v3685_v50 = vor.u32 %v4747_v48, %v3684_v47  ;;  %v3689_v52 = vor.u32 %v4744_v49, %v3686_v51  ;;  %v3660_v54 = vld [vmem:[%s6690_s24 + $0xc0] sm:$0xf]  ;;  %v4741_v55 = vld [vmem:[%s6690_s24 + $0xd4] sm:$0xf0]  ;;  %v4738_v56 = vld [vmem:[%s6690_s24 + $0xc4] sm:$0xf] }
  0x55   :  { %421 = vmatpush.bf16.msra.mxu0 %v4706_v8  ;;  %v3661_v57 = vor.u32 %v4741_v55, %v3660_v54  ;;  %v3662_v58 = vld [vmem:[%s6690_s24 + $0xd8] sm:$0xf0]  ;;  %v3740_v59 = vld [vmem:[%s6690_s24 + $0x158] sm:$0xf]  ;;  %v4760_v60 = vld [vmem:[%s6690_s24 + $0x16c] sm:$0xf0] }
  0x56   :  { %439 = vmatpush.bf16.msra.mxu1 %v4710_v9  ;;  %v3665_v61 = vor.u32 %v4738_v56, %v3662_v58  ;;  %v3741_v62 = vor.u32 %v4760_v60, %v3740_v59  ;;  %v4757_v63 = vld [vmem:[%s6690_s24 + $0x15c] sm:$0xf]  ;;  %v3742_v2 = vld [vmem:[%s6690_s24 + $0x170] sm:$0xf0]  ;;  %v457_v3 = vmul.f32 128.0, %v5706_v53 }
  0x57   :  { %818 = vmatpush.bf16.msra.mxu2 %v3709_v43  ;;  %832 = vmatpush.bf16.msra.mxu3 %v3713_v46  ;;  %v3745_v4 = vor.u32 %v4757_v63, %v3742_v2  ;;  %v3636_v5 = vld [vmem:[%s6690_s24 + $0x90] sm:$0xf]  ;;  %v4735_v6 = vld [vmem:[%s6690_s24 + $0xa4] sm:$0xf0]  ;;  %v4732_v7 = vld [vmem:[%s6690_s24 + $0x94] sm:$0xf] }
  0x58   :  { %v3637_v8 = vor.u32 %v4735_v6, %v3636_v5  ;;  %v3638_v9 = vld [vmem:[%s6690_s24 + $0xa8] sm:$0xf0]  ;;  %v3716_v10 = vld [vmem:[%s6690_s24 + $0x128] sm:$0xf]  ;;  %v4754_v11 = vld [vmem:[%s6690_s24 + $0x13c] sm:$0xf0] }
  0x59   :  { %422 = vmatpush.bf16.msra.mxu0 %v4705_v12  ;;  %3561 = vmatmul.msk.bf16.vlgmr.msra.gmra.mxu1 %vm414_vm0, %v339_v13  ;;  %v3641_v12 = vor.u32 %v4732_v7, %v3638_v9  ;;  %v3717_v13 = vor.u32 %v4754_v11, %v3716_v10  ;;  %v3612_v18 = vld [vmem:[%s6690_s24 + $0x60] sm:$0xf]  ;;  %v4726_v20 = vld [vmem:[%s6690_s24 + $0x64] sm:$0xf]  ;;  %v3614_v22 = vld [vmem:[%s6690_s24 + $0x78] sm:$0xf0] }
  0x5a   :  { %845 = vmatpush.bf16.msrb.mxu1 %v3741_v62  ;;  %v3692_v23 = vld [vmem:[%s6690_s24 + $0xf8] sm:$0xf]  ;;  %v4748_v24 = vld [vmem:[%s6690_s24 + $0x10c] sm:$0xf0]  ;;  %v3617_v25 = vor.u32 %v4726_v20, %v3614_v22  ;;  %v4739_v42 = vld [vmem:[%s6690_s24 + $0xcc] sm:$0xf] }
  0x5b   :  { %819 = vmatpush.bf16.msra.mxu2 %v3685_v50  ;;  %833 = vmatpush.bf16.msra.mxu3 %v3689_v52  ;;  %v3670_v43 = vld [vmem:[%s6690_s24 + $0xe0] sm:$0xf0]  ;;  %v3564_v45 = vld [vmem:[%s6690_s24] sm:$0xf]  ;;  %v4717_v46 = vld [vmem:[%s6690_s24 + $0x14] sm:$0xf0] }
  0x5c   :  { %v3673_v44 = vor.u32 %v4739_v42, %v3670_v43  ;;  %v4714_v47 = vld [vmem:[%s6690_s24 + $0x4] sm:$0xf]  ;;  %v3565_v49 = vor.u32 %v4717_v46, %v3564_v45  ;;  %v3566_v50 = vld [vmem:[%s6690_s24 + $0x18] sm:$0xf0]  ;;  %v3644_v51 = vld [vmem:[%s6690_s24 + $0x98] sm:$0xf] }
  0x5d   :  { %423 = vmatpush.bf16.msra.mxu0 %v4704_v14  ;;  %v4751_v14 = vld [vmem:[%s6690_s24 + $0x12c] sm:$0xf]  ;;  %v4736_v52 = vld [vmem:[%s6690_s24 + $0xac] sm:$0xf0]  ;;  %v3569_v54 = vor.u32 %v4714_v47, %v3566_v50  ;;  %v4733_v56 = vld [vmem:[%s6690_s24 + $0x9c] sm:$0xf] }
  0x5e   :  { %846 = vmatpush.bf16.msrb.mxu1 %v3717_v13  ;;  %v3645_v55 = vor.u32 %v4736_v52, %v3644_v51  ;;  %v3748_v58 = vld [vmem:[%s6690_s24 + $0x160] sm:$0xf]  ;;  %v4761_v60 = vld [vmem:[%s6690_s24 + $0x174] sm:$0xf0]  ;;  %v3750_v62 = vld [vmem:[%s6690_s24 + $0x178] sm:$0xf0] }
  0x5f   :  { %820 = vmatpush.bf16.msra.mxu2 %v3661_v57  ;;  %834 = vmatpush.bf16.msra.mxu3 %v3665_v61  ;;  %v3646_v57 = vld [vmem:[%s6690_s24 + $0xb0] sm:$0xf0]  ;;  %v4758_v61 = vld [vmem:[%s6690_s24 + $0x164] sm:$0xf]  ;;  %v3749_v63 = vor.u32 %v4761_v60, %v3748_v58  ;;  %v4730_v5 = vld [vmem:[%s6690_s24 + $0x7c] sm:$0xf0] }
  0x60   :  { %v3649_v59 = vor.u32 %v4733_v56, %v3646_v57  ;;  %v3753_v2 = vor.u32 %v4758_v61, %v3750_v62  ;;  %v4727_v6 = vld [vmem:[%s6690_s24 + $0x6c] sm:$0xf]  ;;  %v4755_v9 = vld [vmem:[%s6690_s24 + $0x144] sm:$0xf0]  ;;  %v4752_v13 = vld [vmem:[%s6690_s24 + $0x134] sm:$0xf] }
  0x61   :  { %424 = vmatpush.bf16.msra.mxu0 %v4703_v15  ;;  %v3718_v15 = vld [vmem:[%s6690_s24 + $0x140] sm:$0xf0]  ;;  %v4721_v20 = vld [vmem:[%s6690_s24 + $0x3c] sm:$0xf]  ;;  %v4743_v43 = vld [vmem:[%s6690_s24 + $0xe4] sm:$0xf0] }
  0x62   :  { %v3721_v17 = vor.u32 %v4751_v14, %v3718_v15  ;;  %v3726_v14 = vld [vmem:[%s6690_s24 + $0x148] sm:$0xf0]  ;;  %v3652_v51 = vld [vmem:[%s6690_s24 + $0xa0] sm:$0xf]  ;;  %v4737_v52 = vld [vmem:[%s6690_s24 + $0xb4] sm:$0xf0] }
  0x63   :  { %821 = vmatpush.bf16.msra.mxu2 %v3637_v8  ;;  %835 = vmatpush.bf16.msra.mxu3 %v3641_v12  ;;  %v3724_v8 = vld [vmem:[%s6690_s24 + $0x130] sm:$0xf]  ;;  %v3678_v45 = vld [vmem:[%s6690_s24 + $0xe8] sm:$0xf0]  ;;  %v3653_v57 = vor.u32 %v4737_v52, %v3652_v51  ;;  %v3654_v58 = vld [vmem:[%s6690_s24 + $0xb8] sm:$0xf0] }
  0x64   :  { %v3725_v12 = vor.u32 %v4755_v9, %v3724_v8  ;;  %v3628_v60 = vld [vmem:[%s6690_s24 + $0x70] sm:$0xf]  ;;  %v4731_v61 = vld [vmem:[%s6690_s24 + $0x84] sm:$0xf0]  ;;  %v4728_v62 = vld [vmem:[%s6690_s24 + $0x74] sm:$0xf] }
  0x65   :  { %425 = vmatpush.bf16.msra.mxu0 %v4702_v16  ;;  %v458_v16 = vsub.f32 1.0, %v457_v3 }
  0x67   :  { %836 = vmatpush.bf16.msra.mxu3 %v3617_v25  ;;  %v4749_v25 = vld [vmem:[%s6690_s24 + $0x114] sm:$0xf0] }
  0x68   :  { %426 = vmatmul.bf16.vlgmr.msra.gmra.mxu0 %v338_v19  ;;  %v4729_v19 = vld [vmem:[%s6690_s24 + $0x74] sm:$0xf0] }
  0x69   :  { %859 = vmatpush.bf16.msrb.mxu0 %v3745_v4  ;;  %v3613_v21 = vor.u32 %v4729_v19, %v3612_v18  ;;  %v3620_v4 = vld [vmem:[%s6690_s24 + $0x68] sm:$0xf]  ;;  %v3596_v18 = vld [vmem:[%s6690_s24 + $0x38] sm:$0xf]  ;;  %v4724_v19 = vld [vmem:[%s6690_s24 + $0x4c] sm:$0xf0] }
  0x6a   :  { %v3621_v7 = vor.u32 %v4730_v5, %v3620_v4  ;;  %v3629_v5 = vor.u32 %v4731_v61, %v3628_v60 }
  0x6b   :  { %822 = vmatpush.bf16.msra.mxu2 %v3613_v21 }
  0x6d   :  { %860 = vmatpush.bf16.msrb.mxu0 %v3721_v17 }
  0xd6   :  { %v441_v27 = vpop.f32.mrf.mxu1 }
  0xde   :  { %v443_v35 = vpop.f32.mrf.mxu1 }
  0xe5   :  { %v427_v28 = vpop.f32.mrf.mxu0 }
  0xe6   :  { %v428_v29 = vadd.f32 %v427_v28, %v340_v26  ;;  %v3693_v26 = vor.u32 %v4748_v24, %v3692_v23  ;;  %v3694_v28 = vld [vmem:[%s6690_s24 + $0x110] sm:$0xf0]  ;;  %v3700_v24 = vld [vmem:[%s6690_s24 + $0x100] sm:$0xf] }
  0xe7   :  { %v3598_v23 = vld [vmem:[%s6690_s24 + $0x50] sm:$0xf0] }
  0xe8   :  { %v5667_v30 = vadd.f32 %v441_v27, %v428_v29  ;;  %v4745_v27 = vld [vmem:[%s6690_s24 + $0xfc] sm:$0xf]  ;;  %847 = vmatpush.bf16.msrb.mxu1 %v3693_v26  ;;  %v3597_v26 = vor.u32 %v4724_v19, %v3596_v18  ;;  %v4716_v19 = vld [vmem:[%s6690_s24 + $0x14] sm:$0xf] }
  0xe9   :  { %v3697_v29 = vor.u32 %v4745_v27, %v3694_v28  ;;  %v3601_v27 = vor.u32 %v4721_v20, %v3598_v23  ;;  %v3701_v28 = vor.u32 %v4749_v25, %v3700_v24  ;;  %v3582_v20 = vld [vmem:[%s6690_s24 + $0x28] sm:$0xf0] }
  0xea   :  { %450 = vadd.xlane.f32.xlu0 %v5667_v30  ;;  %v465_v31 = vmul.f32 %v5667_v30, %v5667_v30  ;;  %v3585_v23 = vor.u32 %v4716_v19, %v3582_v20 }
  0xeb   :  { %861 = vmatpush.bf16.msrb.mxu0 %v3697_v29  ;;  %v4746_v29 = vld [vmem:[%s6690_s24 + $0x104] sm:$0xf] }
  0xec   :  { %467 = vadd.xlane.f32.xlu1 %v465_v31  ;;  %v3588_v31 = vld [vmem:[%s6690_s24 + $0x30] sm:$0xf] }
  0xed   :  { %v429_v33 = vpop.f32.mrf.mxu0 }
  0xee   :  { %v430_v34 = vadd.f32 %v429_v33, %v341_v32  ;;  %v4723_v32 = vld [vmem:[%s6690_s24 + $0x44] sm:$0xf0]  ;;  %v4720_v33 = vld [vmem:[%s6690_s24 + $0x34] sm:$0xf] }
  0xef   :  { %862 = vmatpush.bf16.msrb.mxu0 %v3673_v44  ;;  %v4740_v44 = vld [vmem:[%s6690_s24 + $0xd4] sm:$0xf] }
  0xf0   :  { %v5675_v36 = vadd.f32 %v443_v35, %v430_v34  ;;  %v459_v34 = vmul.f32 %v5706_v53, %v458_v16  ;;  %v3589_v35 = vor.u32 %v4723_v32, %v3588_v31  ;;  %v3729_v16 = vor.u32 %v4752_v13, %v3726_v14  ;;  %v3702_v31 = vld [vmem:[%s6690_s24 + $0x118] sm:$0xf0] }
  0xf2   :  { %v453_v37 = vsel %vm452_vm1, %v5675_v36, 0.0  ;;  %v466_v38 = vmul.f32 %v5675_v36, %v5675_v36  ;;  %823 = vmatpush.bf16.msra.mxu2 %v3589_v35  ;;  %v460_v48 = vadd.f32 %v5706_v53, %v459_v34  ;;  %v3572_v34 = vld [vmem:[%s6690_s24 + $0x8] sm:$0xf]  ;;  %v4718_v35 = vld [vmem:[%s6690_s24 + $0x1c] sm:$0xf0] }
  0xf3   :  { %454 = vadd.xlane.f32.xlu0 %v453_v37  ;;  %v3590_v37 = vld [vmem:[%s6690_s24 + $0x48] sm:$0xf0]  ;;  %863 = vmatpush.bf16.msrb.mxu0 %v3649_v59 }
  0xf4   :  { %v469_v39 = vsel %vm452_vm1, %v466_v38, 0.0  ;;  %v3668_v38 = vld [vmem:[%s6690_s24 + $0xc8] sm:$0xf]  ;;  %v3593_v40 = vor.u32 %v4720_v33, %v3590_v37  ;;  %v5845_v3 = vsel %vm461_vm2, %v5706_v53, %v460_v48  ;;  %v3622_v53 = vld [vmem:[%s6690_s24 + $0x80] sm:$0xf0]  ;;  %v3705_v33 = vor.u32 %v4746_v29, %v3702_v31 }
  0xf5   :  { %470 = vadd.xlane.f32.xlu1 %v469_v39  ;;  %v4742_v39 = vld [vmem:[%s6690_s24 + $0xdc] sm:$0xf0]  ;;  %v3625_v11 = vor.u32 %v4727_v6, %v3622_v53  ;;  %v4715_v37 = vld [vmem:[%s6690_s24 + $0xc] sm:$0xf]  ;;  %v3681_v48 = vor.u32 %v4740_v44, %v3678_v45  ;;  %v4725_v53 = vld [vmem:[%s6690_s24 + $0x54] sm:$0xf0] }
  0xf6   :  { %v3669_v41 = vor.u32 %v4742_v39, %v3668_v38  ;;  %837 = vmatpush.bf16.msra.mxu3 %v3593_v40  ;;  %824 = vmatpush.bf16.msra.mxu2 %v3565_v49  ;;  %v3573_v39 = vor.u32 %v4718_v35, %v3572_v34  ;;  %v3574_v40 = vld [vmem:[%s6690_s24 + $0x20] sm:$0xf0] }
  0xf7   :  { %864 = vmatpush.bf16.msrb.mxu0 %v3625_v11  ;;  %v3577_v42 = vor.u32 %v4715_v37, %v3574_v40  ;;  %v3606_v11 = vld [vmem:[%s6690_s24 + $0x58] sm:$0xf0] }
  0xf8   :  { %848 = vmatpush.bf16.msrb.mxu1 %v3669_v41  ;;  %v3676_v41 = vld [vmem:[%s6690_s24 + $0xd0] sm:$0xf] }
  0xf9   :  { %v3677_v47 = vor.u32 %v4743_v43, %v3676_v41 }
  0xfa   :  { %838 = vmatpush.bf16.msra.mxu3 %v3569_v54  ;;  %873 = vmatpush.bf16.msrb.mxu2 %v3749_v63  ;;  %v4734_v54 = vld [vmem:[%s6690_s24 + $0xa4] sm:$0xf] }
  0xfb   :  { %865 = vmatpush.bf16.msrb.mxu0 %v3601_v27  ;;  %v3657_v59 = vor.u32 %v4734_v54, %v3654_v58 }
  0xfc   :  { %849 = vmatpush.bf16.msrb.mxu1 %v3645_v55 }
  0xfe   :  { %887 = vmatpush.bf16.msrb.mxu3 %v3753_v2  ;;  %874 = vmatpush.bf16.msrb.mxu2 %v3725_v12  ;;  %v3630_v2 = vld [vmem:[%s6690_s24 + $0x88] sm:$0xf0] }
  0xff   :  { %866 = vmatpush.bf16.msrb.mxu0 %v3577_v42  ;;  %v3633_v6 = vor.u32 %v4728_v62, %v3630_v2 }
 0x100   :  { %850 = vmatpush.bf16.msrb.mxu1 %v3621_v7  ;;  %v3604_v7 = vld [vmem:[%s6690_s24 + $0x40] sm:$0xf] }
 0x101   :  { %v3605_v13 = vor.u32 %v4725_v53, %v3604_v7 }
 0x102   :  { %888 = vmatpush.bf16.msrb.mxu3 %v3729_v16  ;;  %875 = vmatpush.bf16.msrb.mxu2 %v3701_v28  ;;  %v3580_v16 = vld [vmem:[%s6690_s24 + $0x10] sm:$0xf] }
 0x104   :  { %851 = vmatpush.bf16.msrb.mxu1 %v3597_v26 }
 0x106   :  { %889 = vmatpush.bf16.msrb.mxu3 %v3705_v33  ;;  %876 = vmatpush.bf16.msrb.mxu2 %v3677_v47  ;;  %v5002_v33 = vld [vmem:[#allocation4] ss:$0 sm:$0xff] }
 0x108   :  { %852 = vmatpush.bf16.msrb.mxu1 %v3573_v39  ;;  %v5003_v39 = vld [vmem:[#allocation6] ss:$0 sm:$0xff] }
 0x10a   :  { %890 = vmatpush.bf16.msrb.mxu3 %v3681_v48  ;;  %877 = vmatpush.bf16.msrb.mxu2 %v3653_v57  ;;  %v563_v48 = vld [vmem:[#allocation7] sm:$0x3f]  ;;  %v270_v57 = vld [vmem:[%s6670_s21] ss:$0 sm:$0xff] }
 0x10b   :  { %v566_v58 = vperm.slane %v563_v48, 1 }
 0x10e   :  { %891 = vmatpush.bf16.msrb.mxu3 %v3657_v59  ;;  %878 = vmatpush.bf16.msrb.mxu2 %v3629_v5  ;;  %v565_v5 = vperm.slane %v563_v48, 0 }
 0x112   :  { %892 = vmatpush.bf16.msrb.mxu3 %v3633_v6  ;;  %879 = vmatpush.bf16.msrb.mxu2 %v3605_v13 }
 0x15d   :  { %v451_v10 = vpop.xlane.xlu0 %450 }
 0x15e   :  { %v5872_v15 = vmul.f32 %v5845_v3, %v451_v10  ;;  %v4722_v10 = vld [vmem:[%s6690_s24 + $0x44] sm:$0xf] }
 0x15f   :  { %v468_v17 = vpop.xlane.xlu1 %467  ;;  %v3609_v14 = vor.u32 %v4722_v10, %v3606_v11  ;;  %v569_v11 = vperm.slane %v563_v48, 4 }
 0x160   :  { %v474_v21 = vmul.f32 %v5872_v15, %v5872_v15  ;;  %v472_v22 = vmul.f32 %v468_v17, %v5845_v3  ;;  %v4719_v17 = vld [vmem:[%s6690_s24 + $0x24] sm:$0xf0]  ;;  %v478_v31 = vsub.f32 %v5667_v30, %v5872_v15  ;;  %v271_v15 = vlaneseq }
 0x161   :  { %893 = vmatpush.bf16.msrb.mxu3 %v3609_v14 }
 0x162   :  { %v476_v32 = vsub.f32 %v472_v22, %v474_v21  ;;  %v3581_v22 = vor.u32 %v4719_v17, %v3580_v16  ;;  %v272_v47 = vshrl.u32 %v271_v15, 7 }
 0x164   :  { %v5910_v38 = vadd.f32 1e-06, %v476_v32  ;;  %880 = vmatpush.bf16.msrb.mxu2 %v3581_v22  ;;  %4999 = vset.pattern.permute.xlu2 %v272_v47 }
 0x165   :  { %894 = vmatpush.bf16.msrb.mxu3 %v3585_v23  ;;  %v568_v23 = vperm.slane %v563_v48, 3 }
 0x166   :  { %5019 = vrsqrt.f32 %v5910_v38  ;;  %v455_v46 = vpop.xlane.xlu0 %454  ;;  %vm488_vm4 = vweird.f32 %v5910_v38 }
 0x167   :  { %v5929_v49 = vmul.f32 %v5845_v3, %v455_v46 }
 0x168   :  { %v471_v50 = vpop.xlane.xlu1 %470 }
 0x169   :  { %v475_v55 = vmul.f32 %v5929_v49, %v5929_v49  ;;  %v473_v56 = vmul.f32 %v471_v50, %v5845_v3  ;;  %v479_v37 = vsub.f32 %v5675_v36, %v5929_v49  ;;  %v292_v49 = vadd.s32 8, %v272_v47 }
 0x16a   :  { %v567_v50 = vperm.slane %v563_v48, 2 }
 0x16b   :  { %v477_v63 = vsub.f32 %v473_v56, %v475_v55  ;;  %5001 = vset.pattern.permute.xlu0 %v292_v49 }
 0x16c   :  { %v5020_v4 = vpop.eup %5019  ;;  %275 = vperm.xlu2 %4999, %v270_v57  }
 0x16d   :  { %v483_v8 = vmul.f32 %v5020_v4, %v5910_v38  ;;  %v481_v9 = vadd.f32 1e-06, %v477_v63  ;;  %vm489_vm3 = vweird.f32 %v5020_v4 }
 0x16e   :  { %vm490_vm5 = vmor %vm488_vm4, %vm489_vm3 }
 0x16f   :  { %v484_v12 = vmul.f32 %v5020_v4, %v483_v8  ;;  %5021 = vrsqrt.f32 %v481_v9  ;;  %vm498_vm7 = vweird.f32 %v481_v9 }
 0x171   :  { %v485_v18 = vmul.f32 0.5, %v484_v12  ;;  %v570_v12 = vperm.slane %v563_v48, 5 }
 0x173   :  { %v486_v21 = vsub.f32 1.5, %v485_v18 }
 0x174   :  { %5000 = vset.pattern.permute.xlu2 %v292_v49 }
 0x175   :  { %v5022_v24 = vpop.eup %5021  ;;  %v487_v25 = vmul.f32 %v5020_v4, %v486_v21 }
 0x176   :  { %v493_v26 = vmul.f32 %v5022_v24, %v481_v9  ;;  %vm499_vm6 = vweird.f32 %v5022_v24 }
 0x177   :  { %v491_v28 = vsel %vm490_vm5, %v5020_v4, %v487_v25  ;;  %vm500_vm8 = vmor %vm498_vm7, %vm499_vm6 }
 0x178   :  { %v494_v27 = vmul.f32 %v5022_v24, %v493_v26  ;;  %v502_v34 = vmul.f32 %v491_v28, %v478_v31 }
 0x17a   :  { %v495_v29 = vmul.f32 0.5, %v494_v27  ;;  %v507_v40 = vmul.f32 %v5002_v33, %v502_v34 }
 0x17c   :  { %v496_v32 = vsub.f32 1.5, %v495_v29  ;;  %v512_v43 = vadd.f32 %v5003_v39, %v507_v40  ;;  %294 = vperm.xlu2 %5000, %v270_v57  }
 0x17e   :  { %v497_v35 = vmul.f32 %v5022_v24, %v496_v32 }
 0x180   :  { %v501_v38 = vsel %vm500_vm8, %v5022_v24, %v497_v35 }
 0x181   :  { %v503_v41 = vmul.f32 %v501_v38, %v479_v37 }
 0x183   :  { %v508_v42 = vmul.f32 %v5002_v33, %v503_v41 }
 0x185   :  { %v513_v44 = vadd.f32 %v5003_v39, %v508_v42 }
 0x187   :  { %v562_v45 = vpack.c.bf16 %v513_v44, %v512_v43 }
 0x189   :  { %825 = vmatmul.bf16.vlgmr.msra.gmra.mxu2 %v562_v45  ;;  %839 = vmatmul.bf16.vlgmr.msra.gmra.mxu3 %v562_v45 }
 0x18a   :  { %853 = vmatmul.bf16.vlgmr.msrb.gmra.mxu1 %v562_v45  ;;  %867 = vmatmul.bf16.vlgmr.msrb.gmra.mxu0 %v562_v45 }
 0x199   :  { %881 = vmatmul.bf16.vlgmr.msrb.gmra.mxu2 %v562_v45  ;;  %895 = vmatmul.bf16.vlgmr.msrb.gmra.mxu3 %v562_v45 }
 0x1c6   :  { %v276_v28 = vpop.permute.xlu2 %275 }
 0x1c7   :  { %vm279_vm10 = vcmp.eq.s32.totalorder %v276_v28, %v270_v57  ;;  %v4774_v28 = vld [vmem:[%s6656_s7 + $0x60] sm:$0xff] }
 0x1c8   :  { %v284_v29 = vsel %vm279_vm10, %v28_v1, %v27_v0 }
 0x1c9   :  { %288 = vst [vmem:[#allocation22] sm:$0xff] %v284_v29 }
 0x1d6   :  { %v295_v31 = vpop.permute.xlu2 %294 }
 0x1d7   :  { %vm298_vm11 = vcmp.eq.s32.totalorder %v295_v31, %v270_v57  ;;  %v4773_v31 = vld [vmem:[%s6656_s7 + $0x58] sm:$0xff] }
 0x1d8   :  { %v303_v32 = vsel %vm298_vm11, %v28_v1, %v27_v0 }
 0x1d9   :  { %308 = vst [vmem:[#allocation22 + $0x8] sm:$0xff] %v303_v32  ;;  %v4772_v32 = vld [vmem:[%s6656_s7 + $0x50] sm:$0xff] }
 0x1e0   :  { %v447_v37 = vld [vmem:[#allocation22 + $0x8] sm:$0x3] }
 0x207   :  { %v854_v46 = vpop.f32.mrf.mxu1  ;;  %v868_v9 = vpop.f32.mrf.mxu0 }
 0x208   :  { %v855_v55 = vadd.f32 %v854_v46, %v567_v50  ;;  %v869_v26 = vadd.f32 %v868_v9, %v568_v23 }
 0x20c   :  { %v826_v51 = vpop.f32.mrf.mxu2  ;;  %v840_v52 = vpop.f32.mrf.mxu3 }
 0x20d   :  { %v841_v63 = vadd.f32 %v840_v52, %v566_v58  ;;  %v827_v7 = vadd.f32 %v826_v51, %v565_v5 }
 0x20f   :  { %v856_v54 = vpop.f32.mrf.mxu1  ;;  %v870_v20 = vpop.f32.mrf.mxu0 }
 0x210   :  { %v857_v56 = vadd.f32 %v856_v54, %v567_v50  ;;  %v871_v25 = vadd.f32 %v870_v20, %v568_v23 }
 0x212   :  { %v974_v59 = vpack.c.bf16 %v857_v56, %v855_v55  ;;  %v997_v27 = vpack.c.bf16 %v871_v25, %v869_v26  ;;  %v4764_v25 = vld [vmem:[%s6656_s7 + $0x10] sm:$0xff]  ;;  %v4775_v26 = vld [vmem:[%s6656_s7 + $0x68] sm:$0xff] }
 0x214   :  { %v828_v60 = vpop.f32.mrf.mxu2  ;;  %v842_v61 = vpop.f32.mrf.mxu3  ;;  %v980_v62 = vsel %vm978_vm9, %v974_v59, 0 }
 0x215   :  { %v843_v2 = vadd.f32 %v842_v61, %v566_v58  ;;  %989 = vmatpush.bf16.msra.mxu2 %v980_v62  ;;  %v829_v6 = vadd.f32 %v828_v60, %v565_v5  ;;  %v4769_v5 = vld [vmem:[%s6656_s7 + $0x38] sm:$0xff] }
 0x216   :  { %1168 = vmatpush.bf16.msra.mxu0 %v4769_v5  ;;  %v4804_v5 = vld [vmem:[#allocation13 + $0xcc] sm:$0xf0] }
 0x217   :  { %v934_v4 = vpack.c.bf16 %v843_v2, %v841_v63  ;;  %v933_v10 = vpack.c.bf16 %v829_v6, %v827_v7  ;;  %v4777_v6 = vld [vmem:[%s6656_s7 + $0x78] sm:$0xff]  ;;  %v4768_v7 = vld [vmem:[%s6656_s7 + $0x30] sm:$0xff] }
 0x218   :  { %1106 = vmatpush.bf16.msra.mxu3 %v4777_v6  ;;  %v4802_v6 = vld [vmem:[#allocation13 + $0xc4] sm:$0xf] }
 0x219   :  { %942 = vmatpush.bf16.xpose.msra.mxu1 %v934_v4 }
 0x21a   :  { %1169 = vmatpush.bf16.msra.mxu0 %v4768_v7 }
 0x21c   :  { %v882_v53 = vpop.f32.mrf.mxu2  ;;  %v896_v8 = vpop.f32.mrf.mxu3 }
 0x21d   :  { %v883_v16 = vadd.f32 %v882_v53, %v569_v11  ;;  %v897_v17 = vadd.f32 %v896_v8, %v570_v12  ;;  %v4767_v8 = vld [vmem:[%s6656_s7 + $0x28] sm:$0xff] }
 0x21e   :  { %1170 = vmatpush.bf16.msra.mxu0 %v4767_v8  ;;  %v3926_v8 = vld [vmem:[#allocation13 + $0xc8] sm:$0xf] }
 0x220   :  { %943 = vmatmul.bf16.vlgmr.msra.gmra.mxu1 %v933_v10  ;;  %v4766_v10 = vld [vmem:[%s6656_s7 + $0x20] sm:$0xff] }
 0x222   :  { %1171 = vmatpush.bf16.msra.mxu0 %v4766_v10 }
 0x224   :  { %v884_v13 = vpop.f32.mrf.mxu2  ;;  %v898_v14 = vpop.f32.mrf.mxu3 }
 0x225   :  { %v885_v18 = vadd.f32 %v884_v13, %v569_v11  ;;  %v899_v19 = vadd.f32 %v898_v14, %v570_v12 }
 0x227   :  { %v998_v21 = vpack.c.bf16 %v885_v18, %v883_v16  ;;  %v1036_v22 = vpack.c.bf16 %v899_v19, %v897_v17  ;;  %v4765_v16 = vld [vmem:[%s6656_s7 + $0x18] sm:$0xff] }
 0x228   :  { %1172 = vmatpush.bf16.msra.mxu0 %v4765_v16  ;;  %v3902_v16 = vld [vmem:[#allocation13 + $0xa0] sm:$0xf] }
 0x229   :  { %1006 = vmatpush.bf16.xpose.msrb.mxu1 %v998_v21  ;;  %v1041_v24 = vsel %vm978_vm9, %v1036_v22, 0 }
 0x22a   :  { %1050 = vmatpush.bf16.msrb.mxu2 %v1041_v24  ;;  %v4776_v24 = vld [vmem:[%s6656_s7 + $0x70] sm:$0xff] }
 0x22b   :  { %1107 = vmatpush.bf16.msra.mxu3 %v4776_v24 }
 0x22c   :  { %1173 = vmatpush.bf16.msra.mxu0 %v4764_v25  ;;  %v4799_v25 = vld [vmem:[#allocation13 + $0xac] sm:$0xf] }
 0x22f   :  { %1108 = vmatpush.bf16.msra.mxu3 %v4775_v26  ;;  %v3912_v26 = vld [vmem:[#allocation13 + $0xb8] sm:$0xf0] }
 0x230   :  { %1007 = vmatmul.bf16.vlgmr.msrb.gmra.mxu1 %v997_v27  ;;  %v4763_v27 = vld [vmem:[%s6656_s7 + $0x8] sm:$0xff] }
 0x231   :  { %1174 = vmatpush.bf16.msra.mxu0 %v4763_v27  ;;  %v3915_v27 = vor.u32 %v4799_v25, %v3912_v26  ;;  %v3824_v25 = vld [vmem:[#allocation13 + $0x10] sm:$0xf0] }
 0x233   :  { %1109 = vmatpush.bf16.msra.mxu3 %v4774_v28  ;;  %v3886_v28 = vld [vmem:[#allocation13 + $0x80] sm:$0xf] }
 0x237   :  { %1110 = vmatpush.bf16.msra.mxu3 %v4773_v31  ;;  %v4794_v31 = vld [vmem:[#allocation13 + $0x84] sm:$0xf] }
 0x23b   :  { %1111 = vmatpush.bf16.msra.mxu3 %v4772_v32 }
 0x29d   :  { %v944_v33 = vpop.f32.mrf.mxu1 }
 0x29e   :  { %v945_v34 = vadd.f32 %v944_v33, %v284_v29  ;;  %v4771_v33 = vld [vmem:[%s6656_s7 + $0x48] sm:$0xff] }
 0x29f   :  { %1112 = vmatpush.bf16.msra.mxu3 %v4771_v33  ;;  %v3888_v33 = vld [vmem:[#allocation13 + $0x90] sm:$0xf0] }
 0x2a0   :  { %v950_v35 = vsel %vm949_vm12, %v945_v34, -inf }
 0x2a1   :  { %951 = vmax.xlane.f32.xlu0 %v950_v35 }
 0x2a5   :  { %v946_v38 = vpop.f32.mrf.mxu1 }
 0x2a6   :  { %v947_v39 = vadd.f32 %v946_v38, %v447_v37 }
 0x2a8   :  { %v954_v40 = vsel %vm953_vm13, %v947_v39, -inf }
 0x2a9   :  { %955 = vmax.xlane.f32.xlu1 %v954_v40 }
 0x2ad   :  { %v1008_v41 = vpop.f32.mrf.mxu1 }
 0x2ae   :  { %v1009_v42 = vadd.f32 %v1008_v41, %v284_v29  ;;  %v4762_v29 = vld [vmem:[%s6656_s7] sm:$0xff] }
 0x2af   :  { %1175 = vmatpush.bf16.msra.mxu0 %v4762_v29  ;;  %v4796_v29 = vld [vmem:[#allocation13 + $0x8c] sm:$0xf0] }
 0x2b0   :  { %v1013_v43 = vsel %vm949_vm12, %v1009_v42, -inf  ;;  %v3887_v32 = vor.u32 %v4796_v29, %v3886_v28  ;;  %v3830_v29 = vld [vmem:[#allocation13 + $0x8] sm:$0xf] }
 0x2b1   :  { %1014 = vmax.xlane.f32.xlu2 %v1013_v43 }
 0x2b5   :  { %v1010_v0 = vpop.f32.mrf.mxu1 }
 0x2b6   :  { %v1011_v1 = vadd.f32 %v1010_v0, %v447_v37 }
 0x2b8   :  { %v1016_v44 = vsel %vm953_vm13, %v1011_v1, -inf }
 0x2b9   :  { %1017 = vmax.xlane.f32.xlu0 %v1016_v44 }
 0x314   :  { %v952_v45 = vpop.xlane.xlu0 %951 }
 0x315   :  { %v957_v15 = vsub.f32 %v945_v34, %v952_v45  ;;  %v4770_v34 = vld [vmem:[%s6656_s7 + $0x40] sm:$0xff] }
 0x316   :  { %1113 = vmatpush.bf16.msra.mxu3 %v4770_v34  ;;  %v3894_v34 = vld [vmem:[#allocation13 + $0x88] sm:$0xf] }
 0x317   :  { %v959_v46 = vmul.f32 1.442695, %v957_v15 }
 0x319   :  { %5023 = vpow2.f32 %v959_v46 }
 0x31c   :  { %v956_v47 = vpop.xlane.xlu1 %955 }
 0x31d   :  { %v958_v48 = vsub.f32 %v947_v39, %v956_v47 }
 0x31f   :  { %v5024_v49 = vpop.eup %5023  ;;  %v961_v50 = vmul.f32 1.442695, %v958_v48 }
 0x320   :  { %v963_v51 = vsel %vm949_vm12, %v5024_v49, 0.0 }
 0x321   :  { %5025 = vpow2.f32 %v961_v50  ;;  %964 = vadd.xlane.f32.xlu1 %v963_v51 }
 0x324   :  { %v1015_v52 = vpop.xlane.xlu2 %1014 }
 0x325   :  { %v1019_v54 = vsub.f32 %v1009_v42, %v1015_v52 }
 0x327   :  { %v5026_v55 = vpop.eup %5025  ;;  %v1021_v56 = vmul.f32 1.442695, %v1019_v54  ;;  %v3934_v54 = vld [vmem:[#allocation13 + $0xe0] sm:$0xf] }
 0x328   :  { %v966_v57 = vsel %vm953_vm13, %v5026_v55, 0.0 }
 0x329   :  { %5027 = vpow2.f32 %v1021_v56  ;;  %967 = vadd.xlane.f32.xlu0 %v966_v57  ;;  %v4806_v56 = vld [vmem:[#allocation13 + $0xe4] sm:$0xf]  ;;  %v3936_v57 = vld [vmem:[#allocation13 + $0xf0] sm:$0xf0] }
 0x32c   :  { %v1018_v58 = vpop.xlane.xlu0 %1017 }
 0x32d   :  { %v1020_v59 = vsub.f32 %v1011_v1, %v1018_v58  ;;  %v5004_v1 = vld [vmem:[#allocation9] ss:$0 sm:$0xff]  ;;  %v3942_v58 = vld [vmem:[#allocation13 + $0xe8] sm:$0xf] }
 0x32f   :  { %v5028_v60 = vpop.eup %5027  ;;  %v1023_v61 = vmul.f32 1.442695, %v1020_v59  ;;  %v4809_v59 = vld [vmem:[#allocation13 + $0xf4] sm:$0xf0] }
 0x330   :  { %v1025_v62 = vsel %vm949_vm12, %v5028_v60, 0.0 }
 0x331   :  { %5029 = vpow2.f32 %v1023_v61  ;;  %1026 = vadd.xlane.f32.xlu1 %v1025_v62  ;;  %v3943_v61 = vor.u32 %v4809_v59, %v3942_v58  ;;  %v4807_v62 = vld [vmem:[#allocation13 + $0xec] sm:$0xf]  ;;  %v3856_v58 = vld [vmem:[#allocation13 + $0x50] sm:$0xf0]  ;;  %v3862_v59 = vld [vmem:[#allocation13 + $0x48] sm:$0xf] }
 0x333   :  { %1479 = vmatpush.bf16.msrb.mxu3 %v3943_v61 }
 0x337   :  { %v5030_v63 = vpop.eup %5029 }
 0x338   :  { %v1028_v2 = vsel %vm953_vm13, %v5030_v63, 0.0 }
 0x339   :  { %1029 = vadd.xlane.f32.xlu0 %v1028_v2 }
 0x394   :  { %v965_v4 = vpop.xlane.xlu1 %964 }
 0x395   :  { %5031 = vrcp.f32 %v965_v4  ;;  %v3918_v4 = vld [vmem:[#allocation13 + $0xc0] sm:$0xf] }
 0x396   :  { %v3919_v7 = vor.u32 %v4804_v5, %v3918_v4 }
 0x39b   :  { %v5032_v9 = vpop.eup %5031 }
 0x39c   :  { %v968_v53 = vpop.xlane.xlu0 %967  ;;  %v971_v12 = vmul.f32 %v5032_v9, %v5024_v49  ;;  %v4805_v9 = vld [vmem:[#allocation13 + $0xd4] sm:$0xf0] }
 0x39d   :  { %5033 = vrcp.f32 %v968_v53  ;;  %v3920_v53 = vld [vmem:[#allocation13 + $0xd0] sm:$0xf0] }
 0x39e   :  { %v3923_v10 = vor.u32 %v4802_v6, %v3920_v53 }
 0x3a3   :  { %v5034_v11 = vpop.eup %5033 }
 0x3a4   :  { %v972_v13 = vmul.f32 %v5034_v11, %v5026_v55  ;;  %v1027_v17 = vpop.xlane.xlu1 %1026  ;;  %v4808_v55 = vld [vmem:[#allocation13 + $0xec] sm:$0xf0]  ;;  %v3927_v11 = vor.u32 %v4805_v9, %v3926_v8  ;;  %v3838_v8 = vld [vmem:[#allocation13 + $0x20] sm:$0xf] }
 0x3a5   :  { %5035 = vrcp.f32 %v1027_v17  ;;  %v4800_v17 = vld [vmem:[#allocation13 + $0xac] sm:$0xf0] }
 0x3a6   :  { %v973_v14 = vpack.c.bf16 %v972_v13, %v971_v12  ;;  %v4803_v12 = vld [vmem:[#allocation13 + $0xcc] sm:$0xf]  ;;  %v3928_v13 = vld [vmem:[#allocation13 + $0xd8] sm:$0xf0]  ;;  %1480 = vmatpush.bf16.msrb.mxu3 %v3927_v11  ;;  %v4784_v9 = vld [vmem:[#allocation13 + $0x2c] sm:$0xf0] }
 0x3a7   :  { %v3839_v11 = vor.u32 %v4784_v9, %v3838_v8  ;;  %v4825_v8 = vld [vmem:[#allocation16 + $0x78] sm:$0xff] }
 0x3a8   :  { %3754 = vmatmul.msk.bf16.vlgmr.msra.gmra.mxu2 %vm949_vm12, %v973_v14  ;;  %v3931_v14 = vor.u32 %v4803_v12, %v3928_v13  ;;  %v3840_v12 = vld [vmem:[#allocation13 + $0x30] sm:$0xf0]  ;;  %v3846_v13 = vld [vmem:[#allocation13 + $0x28] sm:$0xf]  ;;  %v4833_v9 = vld [vmem:[#allocation16 + $0xb8] sm:$0xff] }
 0x3ab   :  { %v5036_v19 = vpop.eup %5035 }
 0x3ac   :  { %v1030_v18 = vpop.xlane.xlu0 %1029  ;;  %v1033_v21 = vmul.f32 %v5036_v19, %v5028_v60  ;;  %v3939_v60 = vor.u32 %v4806_v56, %v3936_v57  ;;  %v3903_v19 = vor.u32 %v4800_v17, %v3902_v16  ;;  %v4788_v56 = vld [vmem:[#allocation13 + $0x4c] sm:$0xf0] }
 0x3ad   :  { %5037 = vrcp.f32 %v1030_v18  ;;  %v4798_v18 = vld [vmem:[#allocation13 + $0xa4] sm:$0xf] }
 0x3ae   :  { %1465 = vmatpush.bf16.msra.mxu2 %v3939_v60  ;;  %v4789_v60 = vld [vmem:[#allocation13 + $0x54] sm:$0xf0] }
 0x3b2   :  { %1466 = vmatpush.bf16.msra.mxu2 %v3923_v10  ;;  %v4782_v10 = vld [vmem:[#allocation13 + $0x24] sm:$0xf] }
 0x3b3   :  { %v5038_v20 = vpop.eup %5037  ;;  %v3843_v17 = vor.u32 %v4782_v10, %v3840_v12  ;;  %v4815_v10 = vld [vmem:[#allocation16 + $0x28] sm:$0xff]  ;;  %v4824_v12 = vld [vmem:[#allocation16 + $0x70] sm:$0xff] }
 0x3b4   :  { %v1034_v22 = vmul.f32 %v5038_v20, %v5030_v63  ;;  %v3944_v63 = vld [vmem:[#allocation13 + $0xf8] sm:$0xf0]  ;;  %v3904_v20 = vld [vmem:[#allocation13 + $0xb0] sm:$0xf0] }
 0x3b5   :  { %v3947_v2 = vor.u32 %v4807_v62, %v3944_v63  ;;  %v3863_v62 = vor.u32 %v4789_v60, %v3862_v59  ;;  %v4787_v63 = vld [vmem:[#allocation13 + $0x4c] sm:$0xf] }
 0x3b6   :  { %v1035_v23 = vpack.c.bf16 %v1034_v22, %v1033_v21  ;;  %v3910_v21 = vld [vmem:[#allocation13 + $0xa8] sm:$0xf]  ;;  %v4801_v22 = vld [vmem:[#allocation13 + $0xb4] sm:$0xf0] }
 0x3b7   :  { %1493 = vmatpush.bf16.msrb.mxu0 %v3947_v2  ;;  %v3911_v24 = vor.u32 %v4801_v22, %v3910_v21  ;;  %v3864_v2 = vld [vmem:[#allocation13 + $0x58] sm:$0xf0]  ;;  %v3822_v21 = vld [vmem:[#allocation13] sm:$0xf] }
 0x3b8   :  { %3755 = vmatmul.msk.bf16.vlgmr.msrb.gmra.mxu2 %vm949_vm12, %v1035_v23  ;;  %v3907_v23 = vor.u32 %v4798_v18, %v3904_v20  ;;  %v3867_v5 = vor.u32 %v4787_v63, %v3864_v2  ;;  %v3848_v20 = vld [vmem:[#allocation13 + $0x38] sm:$0xf0] }
 0x3b9   :  { %1481 = vmatpush.bf16.msrb.mxu3 %v3911_v24  ;;  %v4778_v24 = vld [vmem:[#allocation13 + $0x4] sm:$0xf] }
 0x3ba   :  { %1467 = vmatpush.bf16.msra.mxu2 %v3907_v23  ;;  %v4780_v23 = vld [vmem:[#allocation13 + $0xc] sm:$0xf0]  ;;  %v3827_v28 = vor.u32 %v4778_v24, %v3824_v25  ;;  %v4836_v24 = vld [vmem:[#allocation16 + $0xd0] sm:$0xff]  ;;  %v6092_v25 = vld [vmem:[#allocation15] sm:$0xf] }
 0x3bb   :  { %1494 = vmatpush.bf16.msrb.mxu0 %v3931_v14  ;;  %v4785_v14 = vld [vmem:[#allocation13 + $0x34] sm:$0xf0] }
 0x3bc   :  { %v3847_v18 = vor.u32 %v4785_v14, %v3846_v13  ;;  %v4832_v13 = vld [vmem:[#allocation16 + $0xb0] sm:$0xff]  ;;  %v4814_v14 = vld [vmem:[#allocation16 + $0x20] sm:$0xff] }
 0x3bf   :  { %1495 = vmatpush.bf16.msrb.mxu0 %v3915_v27  ;;  %v3823_v27 = vor.u32 %v4780_v23, %v3822_v21  ;;  %v4822_v21 = vld [vmem:[#allocation16 + $0x60] sm:$0xff]  ;;  %v4812_v23 = vld [vmem:[#allocation16 + $0x10] sm:$0xff] }
 0x42b   :  { %v991_v35 = vpop.f32.mrf.mxu2 }
 0x433   :  { %v993_v37 = vpop.f32.mrf.mxu2 }
 0x434   :  { %v996_v38 = vpack.c.bf16 %v993_v37, %v991_v35  ;;  %v4797_v35 = vld [vmem:[#allocation13 + $0x94] sm:$0xf0]  ;;  %v3891_v37 = vor.u32 %v4794_v31, %v3888_v33 }
 0x435   :  { %v4781_v31 = vld [vmem:[#allocation13 + $0x14] sm:$0xf0] }
 0x436   :  { %1176 = vmatmul.bf16.vlgmr.msra.gmra.mxu0 %v996_v38  ;;  %v3895_v38 = vor.u32 %v4797_v35, %v3894_v34  ;;  %1468 = vmatpush.bf16.msra.mxu2 %v3891_v37  ;;  %v3831_v33 = vor.u32 %v4781_v31, %v3830_v29  ;;  %v4779_v34 = vld [vmem:[#allocation13 + $0xc] sm:$0xf]  ;;  %v3832_v35 = vld [vmem:[#allocation13 + $0x18] sm:$0xf0]  ;;  %v4835_v29 = vld [vmem:[#allocation16 + $0xc8] sm:$0xff]  ;;  %v1283_v31 = vperm.slane %v6092_v25, 0 }
 0x437   :  { %v3835_v37 = vor.u32 %v4779_v34, %v3832_v35  ;;  %v4828_v34 = vld [vmem:[#allocation16 + $0x90] sm:$0xff] }
 0x438   :  { %1482 = vmatpush.bf16.msrb.mxu3 %v3895_v38 }
 0x43b   :  { %v1052_v39 = vpop.f32.mrf.mxu2 }
 0x443   :  { %v1054_v40 = vpop.f32.mrf.mxu2 }
 0x444   :  { %v1057_v41 = vpack.c.bf16 %v1054_v40, %v1052_v39  ;;  %v4795_v39 = vld [vmem:[#allocation13 + $0x8c] sm:$0xf]  ;;  %v3896_v40 = vld [vmem:[#allocation13 + $0x98] sm:$0xf0] }
 0x446   :  { %1114 = vmatmul.bf16.vlgmr.msra.gmra.mxu3 %v1057_v41 }
 0x4b3   :  { %v1177_v42 = vpop.f32.mrf.mxu0 }
 0x4bb   :  { %v1179_v15 = vpop.f32.mrf.mxu0 }
 0x4c9   :  { %v1115_v43 = vpop.f32.mrf.mxu3 }
 0x4ca   :  { %v1178_v0 = vadd.f32 %v1177_v42, %v1115_v43  ;;  %v3899_v42 = vor.u32 %v4795_v39, %v3896_v40  ;;  %v3870_v43 = vld [vmem:[#allocation13 + $0x60] sm:$0xf] }
 0x4cc   :  { %v1182_v44 = vadd.f32 %v1178_v0, %v5667_v30  ;;  %v4792_v0 = vld [vmem:[#allocation13 + $0x6c] sm:$0xf0]  ;;  %1496 = vmatpush.bf16.msrb.mxu0 %v3899_v42 }
 0x4ce   :  { %v6068_v45 = vadd.f32 %v5004_v1, %v1182_v44  ;;  %v3871_v44 = vor.u32 %v4792_v0, %v3870_v43 }
 0x4d0   :  { %1192 = vadd.xlane.f32.xlu1 %v6068_v45  ;;  %v1199_v50 = vmul.f32 %v6068_v45, %v6068_v45 }
 0x4d1   :  { %v1117_v46 = vpop.f32.mrf.mxu3 }
 0x4d2   :  { %v1180_v47 = vadd.f32 %v1179_v15, %v1117_v46  ;;  %v3872_v15 = vld [vmem:[#allocation13 + $0x70] sm:$0xf0]  ;;  %v3878_v46 = vld [vmem:[#allocation13 + $0x68] sm:$0xf] }
 0x4d4   :  { %v1183_v48 = vadd.f32 %v1180_v47, %v5675_v36  ;;  %v3935_v36 = vor.u32 %v4808_v55, %v3934_v54  ;;  %v4793_v47 = vld [vmem:[#allocation13 + $0x74] sm:$0xf0]  ;;  %v3854_v55 = vld [vmem:[#allocation13 + $0x40] sm:$0xf] }
 0x4d5   :  { %v3855_v57 = vor.u32 %v4788_v56, %v3854_v55 }
 0x4d6   :  { %v6072_v49 = vadd.f32 %v5004_v1, %v1183_v48  ;;  %1451 = vmatpush.bf16.msra.mxu1 %v3935_v36  ;;  %v4790_v1 = vld [vmem:[#allocation13 + $0x64] sm:$0xf] }
 0x4d7   :  { %v3875_v48 = vor.u32 %v4790_v1, %v3872_v15  ;;  %v4786_v36 = vld [vmem:[#allocation13 + $0x44] sm:$0xf] }
 0x4d8   :  { %1201 = vadd.xlane.f32.xlu1 %v1199_v50  ;;  %v1194_v51 = vsel %vm452_vm1, %v6072_v49, 0.0  ;;  %v1200_v30 = vmul.f32 %v6072_v49, %v6072_v49  ;;  %v3879_v50 = vor.u32 %v4793_v47, %v3878_v46  ;;  %v3859_v61 = vor.u32 %v4786_v36, %v3856_v58  ;;  %v5005_v36 = vld [vmem:[#allocation10] ss:$0 sm:$0xff] }
 0x4d9   :  { %1195 = vadd.xlane.f32.xlu0 %v1194_v51  ;;  %v4791_v51 = vld [vmem:[#allocation13 + $0x6c] sm:$0xf]  ;;  %1469 = vmatpush.bf16.msra.mxu2 %v3875_v48 }
 0x4da   :  { %v1203_v52 = vsel %vm452_vm1, %v1200_v30, 0.0  ;;  %1452 = vmatpush.bf16.msra.mxu1 %v3919_v7  ;;  %v3880_v30 = vld [vmem:[#allocation13 + $0x78] sm:$0xf0]  ;;  %1483 = vmatpush.bf16.msrb.mxu3 %v3879_v50 }
 0x4dd   :  { %1470 = vmatpush.bf16.msra.mxu2 %v3859_v61 }
 0x4de   :  { %1453 = vmatpush.bf16.msra.mxu1 %v3903_v19  ;;  %1484 = vmatpush.bf16.msrb.mxu3 %v3863_v62  ;;  %v4783_v19 = vld [vmem:[#allocation13 + $0x2c] sm:$0xf]  ;;  %v5006_v62 = vld [vmem:[#allocation12] ss:$0 sm:$0xff] }
 0x4df   :  { %v3851_v22 = vor.u32 %v4783_v19, %v3848_v20  ;;  %v4813_v19 = vld [vmem:[#allocation16 + $0x18] sm:$0xff] }
 0x4e0   :  { %v4837_v20 = vld [vmem:[#allocation16 + $0xd8] sm:$0xff] }
 0x4e1   :  { %1204 = vadd.xlane.f32.xlu0 %v1203_v52  ;;  %v3883_v52 = vor.u32 %v4791_v51, %v3880_v30  ;;  %1471 = vmatpush.bf16.msra.mxu2 %v3843_v17  ;;  %v4823_v17 = vld [vmem:[#allocation16 + $0x68] sm:$0xff] }
 0x4e2   :  { %1454 = vmatpush.bf16.msra.mxu1 %v3887_v32  ;;  %1485 = vmatpush.bf16.msrb.mxu3 %v3847_v18  ;;  %v4831_v18 = vld [vmem:[#allocation16 + $0xa8] sm:$0xff] }
 0x4e3   :  { %1497 = vmatpush.bf16.msrb.mxu0 %v3883_v52 }
 0x4e5   :  { %1472 = vmatpush.bf16.msra.mxu2 %v3827_v28  ;;  %v4811_v28 = vld [vmem:[#allocation16 + $0x8] sm:$0xff] }
 0x4e6   :  { %1455 = vmatpush.bf16.msra.mxu1 %v3871_v44  ;;  %1486 = vmatpush.bf16.msrb.mxu3 %v3831_v33  ;;  %v4820_v33 = vld [vmem:[#allocation16 + $0x50] sm:$0xff] }
 0x4e7   :  { %1498 = vmatpush.bf16.msrb.mxu0 %v3867_v5 }
 0x4e9   :  { %1853 = vmatpush.bf16.msrb.mxu2 %v4825_v8 }
 0x4ea   :  { %1456 = vmatpush.bf16.msra.mxu1 %v3855_v57  ;;  %1867 = vmatpush.bf16.msra.mxu3 %v4833_v9 }
 0x4eb   :  { %1499 = vmatpush.bf16.msrb.mxu0 %v3851_v22  ;;  %v4830_v22 = vld [vmem:[#allocation16 + $0xa0] sm:$0xff] }
 0x4ed   :  { %1854 = vmatpush.bf16.msrb.mxu2 %v4824_v12 }
 0x4ee   :  { %1457 = vmatpush.bf16.msra.mxu1 %v3839_v11  ;;  %v4839_v11 = vld [vmem:[#allocation16 + $0xe8] sm:$0xff]  ;;  %1868 = vmatpush.bf16.msra.mxu3 %v4832_v13 }
 0x4ef   :  { %1500 = vmatpush.bf16.msrb.mxu0 %v3835_v37  ;;  %v4810_v37 = vld [vmem:[#allocation16] sm:$0xff] }
 0x4f1   :  { %1855 = vmatpush.bf16.msrb.mxu2 %v4823_v17 }
 0x4f2   :  { %1458 = vmatpush.bf16.msra.mxu1 %v3823_v27  ;;  %1869 = vmatpush.bf16.msra.mxu3 %v4831_v18  ;;  %v4829_v27 = vld [vmem:[#allocation16 + $0x98] sm:$0xff] }
 0x4f5   :  { %1856 = vmatpush.bf16.msrb.mxu2 %v4822_v21 }
 0x4f6   :  { %1870 = vmatpush.bf16.msra.mxu3 %v4830_v22 }
 0x4fa   :  { %1871 = vmatpush.bf16.msra.mxu3 %v4829_v27 }
 0x4fe   :  { %1872 = vmatpush.bf16.msra.mxu3 %v4828_v34 }
 0x543   :  { %v1193_v41 = vpop.xlane.xlu1 %1192 }
 0x544   :  { %v6082_v54 = vmul.f32 %v1193_v41, %v5845_v3 }
 0x546   :  { %v1208_v6 = vmul.f32 %v6082_v54, %v6082_v54  ;;  %v1212_v52 = vsub.f32 %v6068_v45, %v6082_v54  ;;  %v4817_v54 = vld [vmem:[#allocation16 + $0x38] sm:$0xff] }
 0x547   :  { %1839 = vmatpush.bf16.msrb.mxu1 %v4817_v54 }
 0x54b   :  { %v1202_v4 = vpop.xlane.xlu1 %1201 }
 0x54c   :  { %v1206_v7 = vmul.f32 %v1202_v4, %v5845_v3  ;;  %v1196_v53 = vpop.xlane.xlu0 %1195 }
 0x54d   :  { %v1198_v32 = vmul.f32 %v1196_v53, %v5845_v3  ;;  %v4840_v53 = vld [vmem:[#allocation16 + $0xf0] sm:$0xff] }
 0x54e   :  { %v1210_v16 = vsub.f32 %v1206_v7, %v1208_v6  ;;  %v4841_v6 = vld [vmem:[#allocation16 + $0xf8] sm:$0xff]  ;;  %v4816_v7 = vld [vmem:[#allocation16 + $0x30] sm:$0xff] }
 0x54f   :  { %v1209_v39 = vmul.f32 %v1198_v32, %v1198_v32  ;;  %v1213_v58 = vsub.f32 %v6072_v49, %v1198_v32  ;;  %1881 = vmatpush.bf16.msra.mxu0 %v4841_v6  ;;  %1840 = vmatpush.bf16.msrb.mxu1 %v4816_v7  ;;  %v1286_v32 = vperm.slane %v6092_v25, 3 }
 0x550   :  { %v1214_v26 = vadd.f32 1e-06, %v1210_v16  ;;  %v4838_v16 = vld [vmem:[#allocation16 + $0xe0] sm:$0xff] }
 0x552   :  { %5039 = vrsqrt.f32 %v1214_v26  ;;  %vm1222_vm15 = vweird.f32 %v1214_v26 }
 0x553   :  { %1882 = vmatpush.bf16.msra.mxu0 %v4840_v53  ;;  %1841 = vmatpush.bf16.msrb.mxu1 %v4815_v10 }
 0x554   :  { %v1205_v38 = vpop.xlane.xlu0 %1204 }
 0x555   :  { %v1207_v40 = vmul.f32 %v1205_v38, %v5845_v3  ;;  %v4834_v38 = vld [vmem:[#allocation16 + $0xc0] sm:$0xff] }
 0x557   :  { %v1211_v41 = vsub.f32 %v1207_v40, %v1209_v39  ;;  %1883 = vmatpush.bf16.msra.mxu0 %v4839_v11  ;;  %1842 = vmatpush.bf16.msrb.mxu1 %v4814_v14 }
 0x558   :  { %v5040_v42 = vpop.eup %5039 }
 0x559   :  { %v1217_v43 = vmul.f32 %v5040_v42, %v1214_v26  ;;  %v1215_v0 = vadd.f32 1e-06, %v1211_v41  ;;  %vm1223_vm14 = vweird.f32 %v5040_v42  ;;  %v4821_v26 = vld [vmem:[#allocation16 + $0x58] sm:$0xff] }
 0x55a   :  { %vm1224_vm0 = vmor %vm1222_vm15, %vm1223_vm14  ;;  %1857 = vmatpush.bf16.msrb.mxu2 %v4821_v26 }
 0x55b   :  { %v1218_v1 = vmul.f32 %v5040_v42, %v1217_v43  ;;  %5041 = vrsqrt.f32 %v1215_v0  ;;  %vm1232_vm3 = vweird.f32 %v1215_v0  ;;  %1884 = vmatpush.bf16.msra.mxu0 %v4838_v16  ;;  %1843 = vmatpush.bf16.msrb.mxu1 %v4813_v19  ;;  %v4827_v43 = vld [vmem:[#allocation16 + $0x88] sm:$0xff] }
 0x55c   :  { %1873 = vmatpush.bf16.msra.mxu3 %v4827_v43 }
 0x55d   :  { %v1219_v44 = vmul.f32 0.5, %v1218_v1  ;;  %v1284_v1 = vperm.slane %v6092_v25, 1 }
 0x55e   :  { %1858 = vmatpush.bf16.msrb.mxu2 %v4820_v33 }
 0x55f   :  { %v1220_v15 = vsub.f32 1.5, %v1219_v44  ;;  %1885 = vmatpush.bf16.msra.mxu0 %v4837_v20  ;;  %1844 = vmatpush.bf16.msrb.mxu1 %v4812_v23 }
 0x561   :  { %v5042_v46 = vpop.eup %5041  ;;  %v1221_v47 = vmul.f32 %v5040_v42, %v1220_v15  ;;  %v1285_v15 = vperm.slane %v6092_v25, 2 }
 0x562   :  { %v1227_v48 = vmul.f32 %v5042_v46, %v1215_v0  ;;  %vm1233_vm2 = vweird.f32 %v5042_v46 }
 0x563   :  { %v1225_v51 = vsel %vm1224_vm0, %v5040_v42, %v1221_v47  ;;  %vm1234_vm4 = vmor %vm1232_vm3, %vm1233_vm2  ;;  %1886 = vmatpush.bf16.msra.mxu0 %v4836_v24  ;;  %1845 = vmatpush.bf16.msrb.mxu1 %v4811_v28  ;;  %v4819_v42 = vld [vmem:[#allocation16 + $0x48] sm:$0xff] }
 0x564   :  { %v1228_v50 = vmul.f32 %v5042_v46, %v1227_v48  ;;  %v1236_v56 = vmul.f32 %v1225_v51, %v1212_v52  ;;  %1859 = vmatpush.bf16.msrb.mxu2 %v4819_v42  ;;  %v4826_v51 = vld [vmem:[#allocation16 + $0x80] sm:$0xff] }
 0x565   :  { %1874 = vmatpush.bf16.msra.mxu3 %v4826_v51 }
 0x566   :  { %v1229_v30 = vmul.f32 0.5, %v1228_v50  ;;  %v1241_v61 = vmul.f32 %v5005_v36, %v1236_v56  ;;  %v4818_v50 = vld [vmem:[#allocation16 + $0x40] sm:$0xff] }
 0x567   :  { %1887 = vmatpush.bf16.msra.mxu0 %v4835_v29  ;;  %1846 = vmatpush.bf16.msrb.mxu1 %v4810_v37 }
 0x568   :  { %v1230_v55 = vsub.f32 1.5, %v1229_v30  ;;  %v1246_v2 = vadd.f32 %v5006_v62, %v1241_v61  ;;  %1860 = vmatpush.bf16.msrb.mxu2 %v4818_v50 }
 0x56a   :  { %v1231_v57 = vmul.f32 %v5042_v46, %v1230_v55 }
 0x56b   :  { %1888 = vmatpush.bf16.msra.mxu0 %v4834_v38 }
 0x56c   :  { %v1235_v59 = vsel %vm1234_vm4, %v5042_v46, %v1231_v57 }
 0x56d   :  { %v1237_v60 = vmul.f32 %v1235_v59, %v1213_v58 }
 0x56f   :  { %v1242_v63 = vmul.f32 %v5005_v36, %v1237_v60 }
 0x571   :  { %v1247_v4 = vadd.f32 %v5006_v62, %v1242_v63 }
 0x573   :  { %v1280_v5 = vpack.c.bf16 %v1247_v4, %v1246_v2 }
 0x575   :  { %1459 = vmatmul.bf16.vlgmr.msra.gmra.mxu1 %v1280_v5  ;;  %1473 = vmatmul.bf16.vlgmr.msra.gmra.mxu2 %v1280_v5 }
 0x576   :  { %1487 = vmatmul.bf16.vlgmr.msrb.gmra.mxu3 %v1280_v5  ;;  %1501 = vmatmul.bf16.vlgmr.msrb.gmra.mxu0 %v1280_v5 }
 0x5f2   :  { %v1460_v35 = vpop.f32.mrf.mxu1 }
 0x5f3   :  { %v6096_v39 = vadd.f32 %v1460_v35, %v1283_v31  ;;  %v1502_v40 = vpop.f32.mrf.mxu0 }
 0x5f4   :  { %v6098_v41 = vadd.f32 %v1502_v40, %v1286_v32 }
 0x5f5   :  { %v1507_v0 = vmul.f32 %v6096_v39, %v6096_v39 }
 0x5f6   :  { %v1510_v44 = vmul.f32 %v6098_v41, %v6098_v41 }
 0x5f7   :  { %v1515_v46 = vmul.f32 %v1507_v0, %v6096_v39 }
 0x5f8   :  { %v1518_v47 = vmul.f32 %v1510_v44, %v6098_v41  ;;  %v1474_v48 = vpop.f32.mrf.mxu2 }
 0x5f9   :  { %v1523_v30 = vmul.f32 0.044715, %v1515_v46  ;;  %v6108_v52 = vadd.f32 %v1474_v48, %v1284_v1  ;;  %v1488_v55 = vpop.f32.mrf.mxu3 }
 0x5fa   :  { %v1526_v56 = vmul.f32 0.044715, %v1518_v47  ;;  %v6110_v36 = vadd.f32 %v1488_v55, %v1285_v15  ;;  %v1462_v57 = vpop.f32.mrf.mxu1 }
 0x5fb   :  { %v1531_v58 = vadd.f32 %v1523_v30, %v6096_v39  ;;  %v1508_v59 = vmul.f32 %v6108_v52, %v6108_v52  ;;  %v6115_v60 = vadd.f32 %v1462_v57, %v1283_v31  ;;  %v1504_v61 = vpop.f32.mrf.mxu0 }
 0x5fc   :  { %v1534_v62 = vadd.f32 %v1526_v56, %v6098_v41  ;;  %v1509_v63 = vmul.f32 %v6110_v36, %v6110_v36  ;;  %v6120_v2 = vadd.f32 %v1504_v61, %v1286_v32 }
 0x5fd   :  { %v1539_v4 = vmul.f32 0.7978846, %v1531_v58  ;;  %v1516_v5 = vmul.f32 %v1508_v59, %v6108_v52  ;;  %v1511_v54 = vmul.f32 %v6115_v60, %v6115_v60 }
 0x5fe   :  { %v1542_v6 = vmul.f32 0.7978846, %v1534_v62  ;;  %v1517_v7 = vmul.f32 %v1509_v63, %v6110_v36  ;;  %v1514_v53 = vmul.f32 %v6120_v2, %v6120_v2 }
 0x5ff   :  { %v1524_v8 = vmul.f32 0.044715, %v1516_v5  ;;  %v1519_v9 = vmul.f32 %v1511_v54, %v6115_v60  ;;  %5043 = vtanh.f32 %v1539_v4 }
 0x600   :  { %v1525_v10 = vmul.f32 0.044715, %v1517_v7  ;;  %v1522_v11 = vmul.f32 %v1514_v53, %v6120_v2  ;;  %v1476_v12 = vpop.f32.mrf.mxu2  ;;  %5045 = vtanh.f32 %v1542_v6 }
 0x601   :  { %v1532_v13 = vadd.f32 %v1524_v8, %v6108_v52  ;;  %v1527_v14 = vmul.f32 0.044715, %v1519_v9  ;;  %v1477_v16 = vadd.f32 %v1476_v12, %v1284_v1  ;;  %v1490_v17 = vpop.f32.mrf.mxu3 }
 0x602   :  { %v1533_v18 = vadd.f32 %v1525_v10, %v6110_v36  ;;  %v1530_v19 = vmul.f32 0.044715, %v1522_v11  ;;  %v1491_v20 = vadd.f32 %v1490_v17, %v1285_v15 }
 0x603   :  { %v1540_v21 = vmul.f32 0.7978846, %v1532_v13  ;;  %v1535_v22 = vadd.f32 %v1527_v14, %v6115_v60  ;;  %v1512_v23 = vmul.f32 %v1477_v16, %v1477_v16  ;;  %v4887_v14 = vld [vmem:[%s6690_s24 + $0x2e4] sm:$0xf0] }
 0x604   :  { %v1541_v24 = vmul.f32 0.7978846, %v1533_v18  ;;  %v1538_v25 = vadd.f32 %v1530_v19, %v6120_v2  ;;  %v1513_v26 = vmul.f32 %v1491_v20, %v1491_v20 }
 0x605   :  { %5047 = vtanh.f32 %v1540_v21  ;;  %v1543_v27 = vmul.f32 0.7978846, %v1535_v22  ;;  %v1520_v28 = vmul.f32 %v1512_v23, %v1477_v16  ;;  %v5044_v32 = vpop.eup %5043 }
 0x606   :  { %5049 = vtanh.f32 %v1541_v24  ;;  %v1546_v29 = vmul.f32 0.7978846, %v1538_v25  ;;  %v1521_v31 = vmul.f32 %v1513_v26, %v1491_v20  ;;  %v5046_v34 = vpop.eup %5045  ;;  %v1555_v38 = vadd.f32 1.0, %v5044_v32  ;;  %v5007_v25 = vld [vmem:[#allocation18] ss:$0 sm:$0xff] }
 0x607   :  { %5051 = vtanh.f32 %v1543_v27  ;;  %v1528_v33 = vmul.f32 0.044715, %v1520_v28  ;;  %v1558_v43 = vadd.f32 1.0, %v5046_v34 }
 0x608   :  { %5053 = vtanh.f32 %v1546_v29  ;;  %v1529_v35 = vmul.f32 0.044715, %v1521_v31  ;;  %v1563_v47 = vmul.f32 0.5, %v1555_v38 }
 0x609   :  { %v1536_v37 = vadd.f32 %v1528_v33, %v1477_v16  ;;  %v1566_v50 = vmul.f32 0.5, %v1558_v43 }
 0x60a   :  { %v1537_v40 = vadd.f32 %v1529_v35, %v1491_v20  ;;  %v1571_v58 = vmul.f32 %v1563_v47, %v6096_v39  ;;  %v4246_v47 = vld [vmem:[%s6690_s24 + $0x270] sm:$0xf] }
 0x60b   :  { %v5048_v42 = vpop.eup %5047  ;;  %v1544_v0 = vmul.f32 0.7978846, %v1536_v37  ;;  %v1574_v62 = vmul.f32 %v1566_v50, %v6098_v41  ;;  %v4872_v50 = vld [vmem:[%s6690_s24 + $0x274] sm:$0xf] }
 0x60c   :  { %v5050_v1 = vpop.eup %5049  ;;  %v1545_v44 = vmul.f32 0.7978846, %v1537_v40  ;;  %v1556_v30 = vadd.f32 1.0, %v5048_v42 }
 0x60d   :  { %v5052_v15 = vpop.eup %5051  ;;  %5055 = vtanh.f32 %v1544_v0  ;;  %v1557_v56 = vadd.f32 1.0, %v5050_v1  ;;  %v4270_v0 = vld [vmem:[%s6690_s24 + $0x2a0] sm:$0xf]  ;;  %v4878_v1 = vld [vmem:[%s6690_s24 + $0x2a4] sm:$0xf] }
 0x60e   :  { %v5054_v46 = vpop.eup %5053  ;;  %v1559_v48 = vadd.f32 1.0, %v5052_v15  ;;  %5057 = vtanh.f32 %v1545_v44  ;;  %v1564_v5 = vmul.f32 0.5, %v1556_v30  ;;  %v4272_v15 = vld [vmem:[%s6690_s24 + $0x2b8] sm:$0xf0]  ;;  %v4248_v30 = vld [vmem:[%s6690_s24 + $0x288] sm:$0xf0] }
 0x60f   :  { %v1562_v51 = vadd.f32 1.0, %v5054_v46  ;;  %v1565_v7 = vmul.f32 0.5, %v1557_v56  ;;  %v4275_v46 = vor.u32 %v4878_v1, %v4272_v15  ;;  %v4222_v56 = vld [vmem:[%s6690_s24 + $0x240] sm:$0xf]  ;;  %v4206_v15 = vld [vmem:[%s6690_s24 + $0x218] sm:$0xf] }
 0x610   :  { %v1567_v55 = vmul.f32 0.5, %v1559_v48  ;;  %v1572_v39 = vmul.f32 %v1564_v5, %v6108_v52  ;;  %v4884_v52 = vld [vmem:[%s6690_s24 + $0x2d4] sm:$0xf]  ;;  %v4875_v48 = vld [vmem:[%s6690_s24 + $0x284] sm:$0xf0] }
 0x611   :  { %v1570_v57 = vmul.f32 0.5, %v1562_v51  ;;  %v4247_v51 = vor.u32 %v4875_v48, %v4246_v47 }
 0x612   :  { %v1575_v59 = vmul.f32 %v1567_v55, %v6115_v60  ;;  %v1573_v60 = vmul.f32 %v1565_v7, %v6110_v36  ;;  %v4296_v36 = vld [vmem:[%s6690_s24 + $0x2e8] sm:$0xf0]  ;;  %v4251_v55 = vor.u32 %v4872_v50, %v4248_v30  ;;  %v4861_v50 = vld [vmem:[%s6690_s24 + $0x21c] sm:$0xf]  ;;  %v4310_v30 = vld [vmem:[%s6690_s24 + $0x2e0] sm:$0xf] }
 0x613   :  { %v5056_v61 = vpop.eup %5055  ;;  %v1578_v63 = vmul.f32 %v1570_v57, %v6120_v2  ;;  %v4294_v2 = vld [vmem:[%s6690_s24 + $0x2d0] sm:$0xf]  ;;  %v4299_v17 = vor.u32 %v4884_v52, %v4296_v36  ;;  %v4869_v57 = vld [vmem:[%s6690_s24 + $0x254] sm:$0xf0]  ;;  %v4174_v52 = vld [vmem:[%s6690_s24 + $0x1e0] sm:$0xf] }
 0x614   :  { %v5058_v4 = vpop.eup %5057  ;;  %v1560_v54 = vadd.f32 1.0, %v5056_v61  ;;  %v1643_v6 = vpack.c.bf16 %v1575_v59, %v1571_v58  ;;  %v4866_v58 = vld [vmem:[%s6690_s24 + $0x244] sm:$0xf]  ;;  %v4223_v59 = vor.u32 %v4869_v57, %v4222_v56  ;;  %v4224_v61 = vld [vmem:[%s6690_s24 + $0x258] sm:$0xf0] }
 0x615   :  { %v1561_v53 = vadd.f32 1.0, %v5058_v4  ;;  %v1646_v8 = vpack.c.bf16 %v1578_v63, %v1574_v62  ;;  %2282 = vmatpush.bf16.msra.mxu2 %v4299_v17  ;;  %v4302_v62 = vld [vmem:[%s6690_s24 + $0x2d8] sm:$0xf]  ;;  %v4888_v63 = vld [vmem:[%s6690_s24 + $0x2ec] sm:$0xf0]  ;;  %v4227_v4 = vor.u32 %v4866_v58, %v4224_v61 }
 0x616   :  { %v1568_v9 = vmul.f32 0.5, %v1560_v54  ;;  %1847 = vmatmul.bf16.vlgmr.msrb.gmra.mxu1 %v1643_v6  ;;  %v4303_v5 = vor.u32 %v4888_v63, %v4302_v62  ;;  %v4885_v54 = vld [vmem:[%s6690_s24 + $0x2dc] sm:$0xf]  ;;  %v4304_v6 = vld [vmem:[%s6690_s24 + $0x2f0] sm:$0xf0] }
 0x617   :  { %v1569_v10 = vmul.f32 0.5, %v1561_v53  ;;  %1889 = vmatmul.bf16.vlgmr.msra.gmra.mxu0 %v1646_v8  ;;  %v4307_v7 = vor.u32 %v4885_v54, %v4304_v6  ;;  %v4198_v53 = vld [vmem:[%s6690_s24 + $0x210] sm:$0xf]  ;;  %v4863_v8 = vld [vmem:[%s6690_s24 + $0x224] sm:$0xf0] }
 0x618   :  { %v1576_v11 = vmul.f32 %v1568_v9, %v1477_v16  ;;  %v4295_v16 = vor.u32 %v4887_v14, %v4294_v2  ;;  %2296 = vmatpush.bf16.msrb.mxu3 %v4303_v5  ;;  %v4860_v9 = vld [vmem:[%s6690_s24 + $0x214] sm:$0xf]  ;;  %v4280_v2 = vld [vmem:[%s6690_s24 + $0x2c0] sm:$0xf0]  ;;  %v4889_v56 = vld [vmem:[%s6690_s24 + $0x2f4] sm:$0xf0] }
 0x619   :  { %v1577_v12 = vmul.f32 %v1569_v10, %v1491_v20  ;;  %2283 = vmatpush.bf16.msra.mxu2 %v4275_v46  ;;  %2310 = vmatpush.bf16.msrb.mxu0 %v4307_v7  ;;  %v4199_v10 = vor.u32 %v4863_v8, %v4198_v53  ;;  %v4854_v36 = vld [vmem:[%s6690_s24 + $0x1e4] sm:$0xf]  ;;  %v4864_v46 = vld [vmem:[%s6690_s24 + $0x22c] sm:$0xf0]  ;;  %v4312_v58 = vld [vmem:[%s6690_s24 + $0x2f8] sm:$0xf0] }
 0x61a   :  { %v1644_v41 = vpack.c.bf16 %v1576_v11, %v1572_v39  ;;  %2268 = vmatpush.bf16.msra.mxu1 %v4295_v16  ;;  %v4200_v39 = vld [vmem:[%s6690_s24 + $0x228] sm:$0xf0]  ;;  %v4278_v11 = vld [vmem:[%s6690_s24 + $0x2a8] sm:$0xf]  ;;  %v4857_v16 = vld [vmem:[%s6690_s24 + $0x1f4] sm:$0xf0]  ;;  %v4207_v48 = vor.u32 %v4864_v46, %v4206_v15 }
 0x61b   :  { %v1645_v13 = vpack.c.bf16 %v1577_v12, %v1573_v60  ;;  %v4882_v60 = vld [vmem:[%s6690_s24 + $0x2bc] sm:$0xf0]  ;;  %v4203_v12 = vor.u32 %v4860_v9, %v4200_v39  ;;  %v4175_v17 = vor.u32 %v4857_v16, %v4174_v52  ;;  %v4886_v57 = vld [vmem:[%s6690_s24 + $0x2e4] sm:$0xf]  ;;  %v4182_v62 = vld [vmem:[%s6690_s24 + $0x1e8] sm:$0xf] }
 0x61c   :  { %1861 = vmatmul.bf16.vlgmr.msrb.gmra.mxu2 %v1644_v41  ;;  %v4279_v41 = vor.u32 %v4882_v60, %v4278_v11  ;;  %v4315_v61 = vor.u32 %v4886_v57, %v4312_v58  ;;  %v4858_v63 = vld [vmem:[%s6690_s24 + $0x1fc] sm:$0xf0]  ;;  %v4184_v6 = vld [vmem:[%s6690_s24 + $0x200] sm:$0xf0]  ;;  %v4286_v7 = vld [vmem:[%s6690_s24 + $0x2b0] sm:$0xf] }
 0x61d   :  { %1875 = vmatmul.bf16.vlgmr.msra.gmra.mxu3 %v1645_v13  ;;  %2284 = vmatpush.bf16.msra.mxu2 %v4251_v55  ;;  %v4879_v13 = vld [vmem:[%s6690_s24 + $0x2ac] sm:$0xf]  ;;  %v4183_v54 = vor.u32 %v4858_v63, %v4182_v62  ;;  %v4883_v53 = vld [vmem:[%s6690_s24 + $0x2c4] sm:$0xf0]  ;;  %v4880_v39 = vld [vmem:[%s6690_s24 + $0x2b4] sm:$0xf] }
 0x61e   :  { %v4283_v14 = vor.u32 %v4879_v13, %v4280_v2  ;;  %2297 = vmatpush.bf16.msrb.mxu3 %v4279_v41  ;;  %v4288_v11 = vld [vmem:[%s6690_s24 + $0x2c8] sm:$0xf0]  ;;  %v4158_v2 = vld [vmem:[%s6690_s24 + $0x1b8] sm:$0xf]  ;;  %v4849_v52 = vld [vmem:[%s6690_s24 + $0x1bc] sm:$0xf] }
 0x61f   :  { %v4862_v15 = vld [vmem:[%s6690_s24 + $0x224] sm:$0xf]  ;;  %v4192_v58 = vld [vmem:[%s6690_s24 + $0x208] sm:$0xf0] }
 0x620   :  { %2311 = vmatpush.bf16.msrb.mxu0 %v4283_v14  ;;  %v4852_v14 = vld [vmem:[%s6690_s24 + $0x1cc] sm:$0xf0] }
 0x621   :  { %2285 = vmatpush.bf16.msra.mxu2 %v4227_v4  ;;  %v4855_v4 = vld [vmem:[%s6690_s24 + $0x1ec] sm:$0xf]  ;;  %v4159_v16 = vor.u32 %v4852_v14, %v4158_v2 }
 0x622   :  { %v4187_v9 = vor.u32 %v4855_v4, %v4184_v6  ;;  %v4850_v6 = vld [vmem:[%s6690_s24 + $0x1c4] sm:$0xf] }
 0x625   :  { %2286 = vmatpush.bf16.msra.mxu2 %v4203_v12  ;;  %v4291_v12 = vor.u32 %v4880_v39, %v4288_v11  ;;  %v4142_v11 = vld [vmem:[%s6690_s24 + $0x190] sm:$0xf] }
 0x693   :  { %v1848_v18 = vpop.f32.mrf.mxu1 }
 0x694   :  { %v1890_v22 = vpop.f32.mrf.mxu0 }
 0x69b   :  { %v1850_v27 = vpop.f32.mrf.mxu1 }
 0x69c   :  { %v1892_v35 = vpop.f32.mrf.mxu0 }
 0x69f   :  { %v1862_v19 = vpop.f32.mrf.mxu2 }
 0x6a0   :  { %v1863_v20 = vadd.f32 %v1862_v19, %v1848_v18  ;;  %v1876_v21 = vpop.f32.mrf.mxu3  ;;  %v4176_v18 = vld [vmem:[%s6690_s24 + $0x1f8] sm:$0xf0]  ;;  %v4254_v19 = vld [vmem:[%s6690_s24 + $0x278] sm:$0xf] }
 0x6a2   :  { %v1877_v23 = vadd.f32 %v1876_v21, %v1863_v20  ;;  %v4876_v20 = vld [vmem:[%s6690_s24 + $0x28c] sm:$0xf0]  ;;  %v4179_v21 = vor.u32 %v4854_v36, %v4176_v18  ;;  %v4160_v36 = vld [vmem:[%s6690_s24 + $0x1d0] sm:$0xf0]  ;;  %v4877_v18 = vld [vmem:[%s6690_s24 + $0x294] sm:$0xf0] }
 0x6a4   :  { %v1891_v24 = vadd.f32 %v1890_v22, %v1877_v23  ;;  %v4255_v22 = vor.u32 %v4876_v20, %v4254_v19  ;;  %v4873_v23 = vld [vmem:[%s6690_s24 + $0x27c] sm:$0xf]  ;;  %2287 = vmatpush.bf16.msra.mxu2 %v4179_v21  ;;  %v4163_v20 = vor.u32 %v4849_v52, %v4160_v36 }
 0x6a6   :  { %v1895_v26 = vadd.f32 %v1891_v24, %v6068_v45  ;;  %v4256_v24 = vld [vmem:[%s6690_s24 + $0x290] sm:$0xf0]  ;;  %2298 = vmatpush.bf16.msrb.mxu3 %v4255_v22  ;;  %v4874_v22 = vld [vmem:[%s6690_s24 + $0x284] sm:$0xf] }
 0x6a7   :  { %v1864_v28 = vpop.f32.mrf.mxu2 }
 0x6a8   :  { %v6153_v29 = vadd.f32 %v5007_v25, %v1895_v26  ;;  %v1865_v31 = vadd.f32 %v1864_v28, %v1850_v27  ;;  %v1878_v32 = vpop.f32.mrf.mxu3  ;;  %v4150_v26 = vld [vmem:[%s6690_s24 + $0x1b0] sm:$0xf]  ;;  %v4851_v27 = vld [vmem:[%s6690_s24 + $0x1c4] sm:$0xf0]  ;;  %v4848_v28 = vld [vmem:[%s6690_s24 + $0x1b4] sm:$0xf] }
 0x6aa   :  { %v1879_v33 = vadd.f32 %v1878_v32, %v1865_v31  ;;  %1907 = vadd.xlane.f32.xlu1 %v6153_v29  ;;  %v1914_v34 = vmul.f32 %v6153_v29, %v6153_v29  ;;  %v4151_v31 = vor.u32 %v4851_v27, %v4150_v26  ;;  %v4152_v32 = vld [vmem:[%s6690_s24 + $0x1c8] sm:$0xf0]  ;;  %v4134_v26 = vld [vmem:[%s6690_s24 + $0x188] sm:$0xf]  ;;  %v4846_v27 = vld [vmem:[%s6690_s24 + $0x19c] sm:$0xf0] }
 0x6ac   :  { %v1893_v37 = vadd.f32 %v1892_v35, %v1879_v33  ;;  %1916 = vadd.xlane.f32.xlu0 %v1914_v34  ;;  %v4230_v33 = vld [vmem:[%s6690_s24 + $0x248] sm:$0xf]  ;;  %v4870_v34 = vld [vmem:[%s6690_s24 + $0x25c] sm:$0xf0]  ;;  %v4155_v35 = vor.u32 %v4848_v28, %v4152_v32  ;;  %v4135_v28 = vor.u32 %v4846_v27, %v4134_v26  ;;  %v4136_v32 = vld [vmem:[%s6690_s24 + $0x1a0] sm:$0xf0] }
 0x6ad   :  { %v5009_v27 = vld [vmem:[#allocation6 + $0x1] ss:$0 sm:$0xff] }
 0x6ae   :  { %v1896_v38 = vadd.f32 %v1893_v37, %v6072_v49  ;;  %v4881_v49 = vld [vmem:[%s6690_s24 + $0x2b4] sm:$0xf0]  ;;  %v4231_v37 = vor.u32 %v4870_v34, %v4230_v33  ;;  %2288 = vmatpush.bf16.msra.mxu2 %v4155_v35  ;;  %v4238_v33 = vld [vmem:[%s6690_s24 + $0x250] sm:$0xf] }
 0x6af   :  { %v4271_v44 = vor.u32 %v4881_v49, %v4270_v0  ;;  %v4845_v0 = vld [vmem:[%s6690_s24 + $0x194] sm:$0xf0]  ;;  %v4842_v49 = vld [vmem:[%s6690_s24 + $0x184] sm:$0xf] }
 0x6b0   :  { %v6159_v40 = vadd.f32 %v5007_v25, %v1896_v38  ;;  %v4259_v25 = vor.u32 %v4873_v23, %v4256_v24  ;;  %v4867_v38 = vld [vmem:[%s6690_s24 + $0x24c] sm:$0xf]  ;;  %2299 = vmatpush.bf16.msrb.mxu3 %v4231_v37  ;;  %v4264_v23 = vld [vmem:[%s6690_s24 + $0x298] sm:$0xf0]  ;;  %v4871_v37 = vld [vmem:[%s6690_s24 + $0x264] sm:$0xf0] }
 0x6b1   :  { %2269 = vmatpush.bf16.msra.mxu1 %v4271_v44  ;;  %v4128_v44 = vld [vmem:[%s6690_s24 + $0x198] sm:$0xf0]  ;;  %v4267_v24 = vor.u32 %v4874_v22, %v4264_v23  ;;  %v5008_v22 = vld [vmem:[#allocation4 + $0x1] ss:$0 sm:$0xff] }
 0x6b2   :  { %v1909_v45 = vsel %vm452_vm1, %v6159_v40, 0.0  ;;  %v1915_v42 = vmul.f32 %v6159_v40, %v6159_v40  ;;  %2312 = vmatpush.bf16.msrb.mxu0 %v4259_v25  ;;  %v4131_v47 = vor.u32 %v4842_v49, %v4128_v44  ;;  %v4865_v44 = vld [vmem:[%s6690_s24 + $0x234] sm:$0xf0] }
 0x6b3   :  { %1910 = vadd.xlane.f32.xlu2 %v1909_v45  ;;  %v4232_v45 = vld [vmem:[%s6690_s24 + $0x260] sm:$0xf0] }
 0x6b4   :  { %v1918_v43 = vsel %vm452_vm1, %v1915_v42, 0.0  ;;  %v4235_v42 = vor.u32 %v4867_v38, %v4232_v45  ;;  %2289 = vmatpush.bf16.msra.mxu2 %v4131_v47  ;;  %2300 = vmatpush.bf16.msrb.mxu3 %v4207_v48  ;;  %v4868_v38 = vld [vmem:[%s6690_s24 + $0x254] sm:$0xf]  ;;  %v4240_v45 = vld [vmem:[%s6690_s24 + $0x268] sm:$0xf0] }
 0x6b5   :  { %1919 = vadd.xlane.f32.xlu1 %v1918_v43  ;;  %2270 = vmatpush.bf16.msra.mxu1 %v4247_v51  ;;  %v4126_v43 = vld [vmem:[%s6690_s24 + $0x180] sm:$0xf]  ;;  %v4208_v51 = vld [vmem:[%s6690_s24 + $0x230] sm:$0xf0]  ;;  %v4216_v48 = vld [vmem:[%s6690_s24 + $0x238] sm:$0xf0] }
 0x6b6   :  { %2313 = vmatpush.bf16.msrb.mxu0 %v4235_v42  ;;  %v4127_v1 = vor.u32 %v4845_v0, %v4126_v43  ;;  %v4211_v55 = vor.u32 %v4861_v50, %v4208_v51  ;;  %v4239_v43 = vor.u32 %v4871_v37, %v4238_v33  ;;  %v4243_v0 = vor.u32 %v4868_v38, %v4240_v45 }
 0x6b7   :  { %v4219_v51 = vor.u32 %v4862_v15, %v4216_v48 }
 0x6b8   :  { %2338 = vmatpush.bf16.msrb.mxu2 %v4315_v61  ;;  %2301 = vmatpush.bf16.msrb.mxu3 %v4183_v54  ;;  %v4853_v54 = vld [vmem:[%s6690_s24 + $0x1d4] sm:$0xf0] }
 0x6b9   :  { %2271 = vmatpush.bf16.msra.mxu1 %v4223_v59  ;;  %v4311_v59 = vor.u32 %v4889_v56, %v4310_v30  ;;  %v4190_v30 = vld [vmem:[%s6690_s24 + $0x1f0] sm:$0xf]  ;;  %v4856_v56 = vld [vmem:[%s6690_s24 + $0x1f4] sm:$0xf] }
 0x6ba   :  { %2314 = vmatpush.bf16.msrb.mxu0 %v4211_v55  ;;  %v4859_v55 = vld [vmem:[%s6690_s24 + $0x204] sm:$0xf0]  ;;  %v4195_v4 = vor.u32 %v4856_v56, %v4192_v58 }
 0x6bb   :  { %v4191_v63 = vor.u32 %v4859_v55, %v4190_v30 }
 0x6bc   :  { %2339 = vmatpush.bf16.msrb.mxu2 %v4291_v12  ;;  %2302 = vmatpush.bf16.msrb.mxu3 %v4159_v16  ;;  %v4844_v12 = vld [vmem:[%s6690_s24 + $0x194] sm:$0xf] }
 0x6bd   :  { %2272 = vmatpush.bf16.msra.mxu1 %v4199_v10  ;;  %v4287_v10 = vor.u32 %v4883_v53, %v4286_v7  ;;  %v4168_v7 = vld [vmem:[%s6690_s24 + $0x1d8] sm:$0xf0] }
 0x6be   :  { %2315 = vmatpush.bf16.msrb.mxu0 %v4187_v9  ;;  %v4171_v39 = vor.u32 %v4850_v6, %v4168_v7 }
 0x6c0   :  { %2340 = vmatpush.bf16.msrb.mxu2 %v4267_v24  ;;  %2303 = vmatpush.bf16.msrb.mxu3 %v4135_v28 }
 0x6c1   :  { %2273 = vmatpush.bf16.msra.mxu1 %v4175_v17  ;;  %v4262_v17 = vld [vmem:[%s6690_s24 + $0x280] sm:$0xf] }
 0x6c2   :  { %v4263_v21 = vor.u32 %v4877_v18, %v4262_v17  ;;  %2316 = vmatpush.bf16.msrb.mxu0 %v4163_v20 }
 0x6c4   :  { %2341 = vmatpush.bf16.msrb.mxu2 %v4243_v0 }
 0x6c5   :  { %2274 = vmatpush.bf16.msra.mxu1 %v4151_v31  ;;  %v4843_v31 = vld [vmem:[%s6690_s24 + $0x18c] sm:$0xf] }
 0x6c6   :  { %v4139_v35 = vor.u32 %v4843_v31, %v4136_v32 }
 0x6c8   :  { %2317 = vmatpush.bf16.msrb.mxu0 %v4139_v35  ;;  %2342 = vmatpush.bf16.msrb.mxu2 %v4219_v51 }
 0x6c9   :  { %2275 = vmatpush.bf16.msra.mxu1 %v4127_v1  ;;  %v4214_v1 = vld [vmem:[%s6690_s24 + $0x220] sm:$0xf] }
 0x6ca   :  { %v4215_v50 = vor.u32 %v4865_v44, %v4214_v1 }
 0x6cc   :  { %2343 = vmatpush.bf16.msrb.mxu2 %v4195_v4 }
 0x6cd   :  { %2324 = vmatpush.bf16.msrb.mxu1 %v4311_v59 }
 0x6d0   :  { %2344 = vmatpush.bf16.msrb.mxu2 %v4171_v39 }
 0x6d1   :  { %2325 = vmatpush.bf16.msrb.mxu1 %v4287_v10 }
 0x6d5   :  { %2326 = vmatpush.bf16.msrb.mxu1 %v4263_v21 }
 0x6d9   :  { %2327 = vmatpush.bf16.msrb.mxu1 %v4239_v43 }
 0x6dd   :  { %2328 = vmatpush.bf16.msrb.mxu1 %v4215_v50 }
 0x6e1   :  { %2329 = vmatpush.bf16.msrb.mxu1 %v4191_v63 }
 0x71d   :  { %v1908_v5 = vpop.xlane.xlu1 %1907 }
 0x71e   :  { %v6341_v8 = vmul.f32 %v1908_v5, %v5845_v3  ;;  %v4166_v5 = vld [vmem:[%s6690_s24 + $0x1c0] sm:$0xf] }
 0x71f   :  { %v1917_v60 = vpop.xlane.xlu0 %1916  ;;  %v4167_v10 = vor.u32 %v4853_v54, %v4166_v5 }
 0x720   :  { %v1923_v41 = vmul.f32 %v6341_v8, %v6341_v8  ;;  %v1921_v13 = vmul.f32 %v1917_v60, %v5845_v3  ;;  %v4847_v60 = vld [vmem:[%s6690_s24 + $0x1a4] sm:$0xf0]  ;;  %v1927_v20 = vsub.f32 %v6153_v29, %v6341_v8 }
 0x721   :  { %2330 = vmatpush.bf16.msrb.mxu1 %v4167_v10  ;;  %v4143_v14 = vor.u32 %v4847_v60, %v4142_v11 }
 0x722   :  { %v1925_v19 = vsub.f32 %v1921_v13, %v1923_v41  ;;  %v4144_v41 = vld [vmem:[%s6690_s24 + $0x1a8] sm:$0xf0] }
 0x723   :  { %v4147_v52 = vor.u32 %v4844_v12, %v4144_v41 }
 0x724   :  { %v6376_v25 = vadd.f32 1e-06, %v1925_v19 }
 0x725   :  { %2331 = vmatpush.bf16.msrb.mxu1 %v4143_v14  ;;  %2345 = vmatpush.bf16.msrb.mxu2 %v4147_v52  ;;  %v5103_v14 = vld [vmem:[#allocation22] sm:$0xff] }
 0x726   :  { %5059 = vrsqrt.f32 %v6376_v25  ;;  %v1911_v34 = vpop.xlane.xlu2 %1910  ;;  %vm1937_vm6 = vweird.f32 %v6376_v25 }
 0x727   :  { %v6404_v42 = vmul.f32 %v1911_v34, %v5845_v3 }
 0x728   :  { %v1920_v49 = vpop.xlane.xlu1 %1919 }
 0x729   :  { %v1924_v46 = vmul.f32 %v6404_v42, %v6404_v42  ;;  %v1922_v47 = vmul.f32 %v1920_v49, %v5845_v3  ;;  %v1928_v26 = vsub.f32 %v6159_v40, %v6404_v42  ;;  %v2014_v42 = vld [vmem:[#allocation7 + $0x6] sm:$0x3f] }
 0x72a   :  { %v2017_v43 = vperm.slane %v2014_v42, 1  ;;  %v2018_v0 = vperm.slane %v2014_v42, 2  ;;  %v2016_v30 = vperm.slane %v2014_v42, 0  ;;  %v2020_v58 = vperm.slane %v2014_v42, 4 }
 0x72b   :  { %v1926_v57 = vsub.f32 %v1922_v47, %v1924_v46  ;;  %v2021_v6 = vperm.slane %v2014_v42, 5 }
 0x72c   :  { %v5060_v59 = vpop.eup %5059 }
 0x72d   :  { %v1932_v61 = vmul.f32 %v5060_v59, %v6376_v25  ;;  %v1930_v62 = vadd.f32 1e-06, %v1926_v57  ;;  %vm1938_vm5 = vweird.f32 %v5060_v59 }
 0x72e   :  { %vm1939_vm7 = vmor %vm1937_vm6, %vm1938_vm5 }
 0x72f   :  { %v1933_v53 = vmul.f32 %v5060_v59, %v1932_v61  ;;  %5061 = vrsqrt.f32 %v1930_v62  ;;  %vm1947_vm10 = vweird.f32 %v1930_v62 }
 0x731   :  { %v1934_v9 = vmul.f32 0.5, %v1933_v53  ;;  %v2019_v53 = vperm.slane %v2014_v42, 3 }
 0x733   :  { %v1935_v13 = vsub.f32 1.5, %v1934_v9 }
 0x735   :  { %v5062_v2 = vpop.eup %5061  ;;  %v1936_v16 = vmul.f32 %v5060_v59, %v1935_v13 }
 0x736   :  { %v1942_v36 = vmul.f32 %v5062_v2, %v1930_v62  ;;  %vm1948_vm8 = vweird.f32 %v5062_v2 }
 0x737   :  { %v1940_v18 = vsel %vm1939_vm7, %v5060_v59, %v1936_v16  ;;  %vm1949_vm11 = vmor %vm1947_vm10, %vm1948_vm8 }
 0x738   :  { %v1943_v17 = vmul.f32 %v5062_v2, %v1942_v36  ;;  %v1951_v23 = vmul.f32 %v1940_v18, %v1927_v20  ;;  %v5104_v20 = vld [vmem:[#allocation22 + $0x8] sm:$0x3] }
 0x73a   :  { %v1944_v19 = vmul.f32 0.5, %v1943_v17  ;;  %v1956_v28 = vmul.f32 %v5008_v22, %v1951_v23 }
 0x73c   :  { %v1945_v21 = vsub.f32 1.5, %v1944_v19  ;;  %v1961_v33 = vadd.f32 %v5009_v27, %v1956_v28 }
 0x73e   :  { %v1946_v24 = vmul.f32 %v5062_v2, %v1945_v21 }
 0x740   :  { %v1950_v25 = vsel %vm1949_vm11, %v5062_v2, %v1946_v24 }
 0x741   :  { %v1952_v31 = vmul.f32 %v1950_v25, %v1928_v26 }
 0x743   :  { %v1957_v32 = vmul.f32 %v5008_v22, %v1952_v31 }
 0x745   :  { %v1962_v34 = vadd.f32 %v5009_v27, %v1957_v32 }
 0x747   :  { %v2012_v35 = vpack.c.bf16 %v1962_v34, %v1961_v33 }
 0x749   :  { %2276 = vmatmul.bf16.vlgmr.msra.gmra.mxu1 %v2012_v35  ;;  %2290 = vmatmul.bf16.vlgmr.msra.gmra.mxu2 %v2012_v35 }
 0x74a   :  { %2304 = vmatmul.bf16.vlgmr.msrb.gmra.mxu3 %v2012_v35  ;;  %2318 = vmatmul.bf16.vlgmr.msrb.gmra.mxu0 %v2012_v35 }
 0x759   :  { %2332 = vmatmul.bf16.vlgmr.msrb.gmra.mxu1 %v2012_v35  ;;  %2346 = vmatmul.bf16.vlgmr.msrb.gmra.mxu2 %v2012_v35 }
 0x7c6   :  { %v2277_v8 = vpop.f32.mrf.mxu1 }
 0x7c7   :  { %v2319_v50 = vpop.f32.mrf.mxu0  ;;  %v2278_v59 = vadd.f32 %v2277_v8, %v2016_v30 }
 0x7c8   :  { %v2320_v60 = vadd.f32 %v2319_v50, %v2019_v53  ;;  %v4896_v50 = vld [vmem:[%s6656_s7 + $0xb0] sm:$0xff] }
 0x7cc   :  { %v2291_v37 = vpop.f32.mrf.mxu2 }
 0x7cd   :  { %v2305_v38 = vpop.f32.mrf.mxu3  ;;  %v2292_v1 = vadd.f32 %v2291_v37, %v2017_v43 }
 0x7ce   :  { %v2279_v45 = vpop.f32.mrf.mxu1  ;;  %v2306_v46 = vadd.f32 %v2305_v38, %v2018_v0 }
 0x7cf   :  { %v2280_v56 = vadd.f32 %v2279_v45, %v2016_v30  ;;  %v2321_v54 = vpop.f32.mrf.mxu0  ;;  %v4895_v30 = vld [vmem:[%s6656_s7 + $0xa8] sm:$0xff] }
 0x7d0   :  { %v2322_v9 = vadd.f32 %v2321_v54, %v2019_v53 }
 0x7d1   :  { %v2385_v62 = vpack.c.bf16 %v2280_v56, %v2278_v59  ;;  %v4894_v56 = vld [vmem:[%s6656_s7 + $0xa0] sm:$0xff]  ;;  %v4893_v59 = vld [vmem:[%s6656_s7 + $0x98] sm:$0xff] }
 0x7d2   :  { %v2446_v41 = vpack.c.bf16 %v2322_v9, %v2320_v60  ;;  %v4892_v60 = vld [vmem:[%s6656_s7 + $0x90] sm:$0xff] }
 0x7d4   :  { %v2293_v49 = vpop.f32.mrf.mxu2 }
 0x7d5   :  { %v2294_v44 = vadd.f32 %v2293_v49, %v2017_v43  ;;  %v2307_v15 = vpop.f32.mrf.mxu3 }
 0x7d6   :  { %v2308_v47 = vadd.f32 %v2307_v15, %v2018_v0  ;;  %v2333_v48 = vpop.f32.mrf.mxu1 }
 0x7d7   :  { %v2386_v51 = vpack.c.bf16 %v2294_v44, %v2292_v1  ;;  %v2334_v4 = vadd.f32 %v2333_v48, %v2020_v58  ;;  %v4905_v48 = vld [vmem:[%s6656_s7 + $0xf8] sm:$0xff] }
 0x7d8   :  { %v2424_v55 = vpack.c.bf16 %v2308_v47, %v2306_v46  ;;  %v4897_v47 = vld [vmem:[%s6656_s7 + $0xb8] sm:$0xff] }
 0x7d9   :  { %2394 = vmatpush.bf16.xpose.msra.mxu3 %v2386_v51  ;;  %v4904_v51 = vld [vmem:[%s6656_s7 + $0xf0] sm:$0xff] }
 0x7da   :  { %v2429_v57 = vsel %vm978_vm9, %v2424_v55, 0  ;;  %v4903_v55 = vld [vmem:[%s6656_s7 + $0xe8] sm:$0xff] }
 0x7db   :  { %2438 = vmatpush.bf16.msra.mxu0 %v2429_v57  ;;  %v4902_v57 = vld [vmem:[%s6656_s7 + $0xe0] sm:$0xff] }
 0x7dc   :  { %v2347_v61 = vpop.f32.mrf.mxu2 }
 0x7dd   :  { %v2348_v39 = vadd.f32 %v2347_v61, %v2021_v6 }
 0x7de   :  { %v2335_v63 = vpop.f32.mrf.mxu1 }
 0x7df   :  { %v2336_v5 = vadd.f32 %v2335_v63, %v2020_v58  ;;  %2617 = vmatpush.bf16.msrb.mxu0 %v4897_v47  ;;  %v4512_v47 = vld [vmem:[#allocation13 + $0x1c0] sm:$0xf] }
 0x7e0   :  { %2395 = vmatmul.bf16.vlgmr.msra.gmra.mxu3 %v2385_v62 }
 0x7e1   :  { %v2447_v7 = vpack.c.bf16 %v2336_v5, %v2334_v4  ;;  %2555 = vmatpush.bf16.msrb.mxu3 %v4905_v48  ;;  %v4932_v48 = vld [vmem:[#allocation13 + $0x1cc] sm:$0xf0] }
 0x7e3   :  { %2455 = vmatpush.bf16.xpose.msra.mxu1 %v2447_v7  ;;  %2618 = vmatpush.bf16.msrb.mxu0 %v4896_v50  ;;  %v4930_v50 = vld [vmem:[#allocation13 + $0x1c4] sm:$0xf] }
 0x7e4   :  { %v2349_v10 = vpop.f32.mrf.mxu2 }
 0x7e5   :  { %v2350_v11 = vadd.f32 %v2349_v10, %v2021_v6  ;;  %2556 = vmatpush.bf16.msrb.mxu3 %v4904_v51  ;;  %v4513_v51 = vor.u32 %v4932_v48, %v4512_v47 }
 0x7e7   :  { %v2485_v12 = vpack.c.bf16 %v2350_v11, %v2348_v39  ;;  %2619 = vmatpush.bf16.msrb.mxu0 %v4895_v30  ;;  %v4514_v30 = vld [vmem:[#allocation13 + $0x1d0] sm:$0xf0] }
 0x7e9   :  { %v2490_v13 = vsel %vm978_vm9, %v2485_v12, 0  ;;  %2557 = vmatpush.bf16.msrb.mxu3 %v4903_v55  ;;  %v4901_v12 = vld [vmem:[%s6656_s7 + $0xd8] sm:$0xff] }
 0x7ea   :  { %2456 = vmatmul.bf16.vlgmr.msra.gmra.mxu1 %v2446_v41  ;;  %2499 = vmatpush.bf16.msra.mxu2 %v2490_v13  ;;  %v4891_v41 = vld [vmem:[%s6656_s7 + $0x88] sm:$0xff]  ;;  %v4900_v13 = vld [vmem:[%s6656_s7 + $0xd0] sm:$0xff]  ;;  %v4520_v55 = vld [vmem:[#allocation13 + $0x1c8] sm:$0xf] }
 0x7eb   :  { %2620 = vmatpush.bf16.msrb.mxu0 %v4894_v56  ;;  %v4933_v56 = vld [vmem:[#allocation13 + $0x1d4] sm:$0xf0] }
 0x7ed   :  { %2558 = vmatpush.bf16.msrb.mxu3 %v4902_v57  ;;  %v4517_v57 = vor.u32 %v4930_v50, %v4514_v30  ;;  %v4432_v30 = vld [vmem:[#allocation13 + $0x120] sm:$0xf] }
 0x7ef   :  { %2621 = vmatpush.bf16.msrb.mxu0 %v4893_v59  ;;  %v4931_v59 = vld [vmem:[#allocation13 + $0x1cc] sm:$0xf] }
 0x7f1   :  { %2559 = vmatpush.bf16.msrb.mxu3 %v4901_v12  ;;  %v4480_v12 = vld [vmem:[#allocation13 + $0x180] sm:$0xf] }
 0x7f3   :  { %2622 = vmatpush.bf16.msrb.mxu0 %v4892_v60 }
 0x7f5   :  { %2560 = vmatpush.bf16.msrb.mxu3 %v4900_v13  ;;  %v4922_v13 = vld [vmem:[#allocation13 + $0x184] sm:$0xf] }
 0x7f7   :  { %2623 = vmatpush.bf16.msrb.mxu0 %v4891_v41  ;;  %v4924_v41 = vld [vmem:[#allocation13 + $0x18c] sm:$0xf0] }
 0x863   :  { %v2396_v2 = vpop.f32.mrf.mxu3 }
 0x864   :  { %v2397_v52 = vadd.f32 %v5103_v14, %v2396_v2  ;;  %v4890_v2 = vld [vmem:[%s6656_s7 + $0x80] sm:$0xff] }
 0x865   :  { %2624 = vmatpush.bf16.msrb.mxu0 %v4890_v2  ;;  %v4481_v2 = vor.u32 %v4924_v41, %v4480_v12  ;;  %v4424_v12 = vld [vmem:[#allocation13 + $0x108] sm:$0xf]  ;;  %v4909_v41 = vld [vmem:[#allocation13 + $0x114] sm:$0xf0] }
 0x866   :  { %v2401_v16 = vsel %vm949_vm12, %v2397_v52, -inf }
 0x867   :  { %v2457_v36 = vpop.f32.mrf.mxu1  ;;  %2402 = vmax.xlane.f32.xlu1 %v2401_v16 }
 0x868   :  { %v2458_v17 = vadd.f32 %v5103_v14, %v2457_v36  ;;  %v4899_v14 = vld [vmem:[%s6656_s7 + $0xc8] sm:$0xff] }
 0x869   :  { %2561 = vmatpush.bf16.msrb.mxu3 %v4899_v14  ;;  %v4482_v14 = vld [vmem:[#allocation13 + $0x190] sm:$0xf0] }
 0x86a   :  { %v2462_v18 = vsel %vm949_vm12, %v2458_v17, -inf }
 0x86b   :  { %2463 = vmax.xlane.f32.xlu2 %v2462_v18  ;;  %v2398_v19 = vpop.f32.mrf.mxu3 }
 0x86c   :  { %v2399_v21 = vadd.f32 %v5104_v20, %v2398_v19 }
 0x86e   :  { %v2404_v26 = vsel %vm953_vm13, %v2399_v21, -inf }
 0x86f   :  { %v2459_v22 = vpop.f32.mrf.mxu1 }
 0x870   :  { %v2460_v23 = vadd.f32 %v5104_v20, %v2459_v22 }
 0x872   :  { %v2465_v24 = vsel %vm953_vm13, %v2460_v23, -inf }
 0x873   :  { %2466 = vmax.xlane.f32.xlu0 %v2465_v24  ;;  %2405 = vmax.xlane.f32.xlu2 %v2404_v26  ;;  %v5010_v24 = vld [vmem:[#allocation9 + $0x1] ss:$0 sm:$0xff] }
 0x8da   :  { %v2403_v25 = vpop.xlane.xlu1 %2402 }
 0x8db   :  { %v2407_v27 = vsub.f32 %v2397_v52, %v2403_v25  ;;  %v4898_v52 = vld [vmem:[%s6656_s7 + $0xc0] sm:$0xff] }
 0x8dc   :  { %2562 = vmatpush.bf16.msrb.mxu3 %v4898_v52  ;;  %v4488_v52 = vld [vmem:[#allocation13 + $0x188] sm:$0xf] }
 0x8dd   :  { %v2409_v28 = vmul.f32 1.442695, %v2407_v27 }
 0x8de   :  { %v2464_v31 = vpop.xlane.xlu2 %2463 }
 0x8df   :  { %5063 = vpow2.f32 %v2409_v28  ;;  %v2468_v32 = vsub.f32 %v2458_v17, %v2464_v31 }
 0x8e1   :  { %v2470_v33 = vmul.f32 1.442695, %v2468_v32 }
 0x8e3   :  { %5065 = vpow2.f32 %v2470_v33 }
 0x8e5   :  { %v5064_v34 = vpop.eup %5063 }
 0x8e6   :  { %v2467_v35 = vpop.xlane.xlu0 %2466  ;;  %v2406_v8 = vpop.xlane.xlu2 %2405  ;;  %v2413_v37 = vsel %vm949_vm12, %v5064_v34, 0.0 }
 0x8e7   :  { %v2469_v38 = vsub.f32 %v2460_v23, %v2467_v35  ;;  %v2408_v45 = vsub.f32 %v2399_v21, %v2406_v8  ;;  %2414 = vadd.xlane.f32.xlu2 %v2413_v37  ;;  %v4528_v37 = vld [vmem:[#allocation13 + $0x1e0] sm:$0xf] }
 0x8e9   :  { %v5066_v42 = vpop.eup %5065  ;;  %v2472_v43 = vmul.f32 1.442695, %v2469_v38  ;;  %v2411_v0 = vmul.f32 1.442695, %v2408_v45  ;;  %v4936_v38 = vld [vmem:[#allocation13 + $0x1ec] sm:$0xf0] }
 0x8ea   :  { %v2474_v49 = vsel %vm949_vm12, %v5066_v42, 0.0  ;;  %v4934_v45 = vld [vmem:[#allocation13 + $0x1e4] sm:$0xf] }
 0x8eb   :  { %5067 = vpow2.f32 %v2472_v43  ;;  %2475 = vadd.xlane.f32.xlu0 %v2474_v49  ;;  %v4530_v43 = vld [vmem:[#allocation13 + $0x1f0] sm:$0xf0]  ;;  %v4937_v49 = vld [vmem:[#allocation13 + $0x1f4] sm:$0xf0] }
 0x8ec   :  { %5069 = vpow2.f32 %v2411_v0  ;;  %v4536_v0 = vld [vmem:[#allocation13 + $0x1e8] sm:$0xf] }
 0x8f1   :  { %v5068_v1 = vpop.eup %5067 }
 0x8f2   :  { %v5070_v44 = vpop.eup %5069  ;;  %v2477_v15 = vsel %vm953_vm13, %v5068_v1, 0.0 }
 0x8f3   :  { %v2416_v46 = vsel %vm953_vm13, %v5070_v44, 0.0  ;;  %2478 = vadd.xlane.f32.xlu1 %v2477_v15  ;;  %v4538_v15 = vld [vmem:[#allocation13 + $0x1f8] sm:$0xf0] }
 0x8f4   :  { %2417 = vadd.xlane.f32.xlu0 %v2416_v46 }
 0x95a   :  { %v2415_v61 = vpop.xlane.xlu2 %2414 }
 0x95e   :  { %v2476_v58 = vpop.xlane.xlu0 %2475 }
 0x95f   :  { %5071 = vrcp.f32 %v2476_v58  ;;  %v4521_v58 = vor.u32 %v4933_v56, %v4520_v55  ;;  %v4912_v55 = vld [vmem:[#allocation13 + $0x12c] sm:$0xf0]  ;;  %v4910_v56 = vld [vmem:[#allocation13 + $0x124] sm:$0xf] }
 0x960   :  { %5073 = vrcp.f32 %v2415_v61  ;;  %v4522_v61 = vld [vmem:[#allocation13 + $0x1d8] sm:$0xf0] }
 0x965   :  { %v5072_v4 = vpop.eup %5071 }
 0x966   :  { %v2479_v62 = vpop.xlane.xlu1 %2478  ;;  %v5074_v5 = vpop.eup %5073  ;;  %v2482_v7 = vmul.f32 %v5072_v4, %v5066_v42  ;;  %v4529_v42 = vor.u32 %v4936_v38, %v4528_v37  ;;  %v4928_v4 = vld [vmem:[#allocation13 + $0x1ac] sm:$0xf0]  ;;  %v4914_v38 = vld [vmem:[#allocation13 + $0x144] sm:$0xf] }
 0x967   :  { %v2418_v63 = vpop.xlane.xlu0 %2417  ;;  %5075 = vrcp.f32 %v2479_v62  ;;  %v2421_v9 = vmul.f32 %v5074_v5, %v5064_v34  ;;  %v4525_v62 = vor.u32 %v4931_v59, %v4522_v61  ;;  %v4926_v5 = vld [vmem:[#allocation13 + $0x1a4] sm:$0xf]  ;;  %v4916_v37 = vld [vmem:[#allocation13 + $0x14c] sm:$0xf0]  ;;  %v4440_v59 = vld [vmem:[#allocation13 + $0x128] sm:$0xf] }
 0x968   :  { %5077 = vrcp.f32 %v2418_v63  ;;  %2905 = vmatpush.bf16.msrb.mxu1 %v4529_v42  ;;  %v4496_v63 = vld [vmem:[#allocation13 + $0x1a0] sm:$0xf]  ;;  %v4913_v61 = vld [vmem:[#allocation13 + $0x134] sm:$0xf0] }
 0x96c   :  { %2906 = vmatpush.bf16.msrb.mxu1 %v4513_v51 }
 0x96d   :  { %v5076_v54 = vpop.eup %5075 }
 0x96e   :  { %v5078_v6 = vpop.eup %5077  ;;  %v2483_v53 = vmul.f32 %v5076_v54, %v5068_v1  ;;  %v4537_v1 = vor.u32 %v4937_v49, %v4536_v0  ;;  %v4497_v54 = vor.u32 %v4928_v4, %v4496_v63  ;;  %v4456_v0 = vld [vmem:[#allocation13 + $0x148] sm:$0xf]  ;;  %v4917_v49 = vld [vmem:[#allocation13 + $0x154] sm:$0xf0]  ;;  %v4441_v4 = vor.u32 %v4913_v61, %v4440_v59 }
 0x96f   :  { %v2422_v10 = vmul.f32 %v5078_v6, %v5070_v44  ;;  %v4935_v44 = vld [vmem:[#allocation13 + $0x1ec] sm:$0xf]  ;;  %v4498_v6 = vld [vmem:[#allocation13 + $0x1b0] sm:$0xf0]  ;;  %v4952_v59 = vld [vmem:[#allocation16 + $0x170] sm:$0xff] }
 0x970   :  { %v2484_v39 = vpack.c.bf16 %v2483_v53, %v2482_v7  ;;  %v4541_v46 = vor.u32 %v4935_v44, %v4538_v15  ;;  %2933 = vmatpush.bf16.msra.mxu3 %v4537_v1  ;;  %v4504_v7 = vld [vmem:[#allocation13 + $0x1a8] sm:$0xf]  ;;  %v4929_v53 = vld [vmem:[#allocation13 + $0x1b4] sm:$0xf0]  ;;  %2907 = vmatpush.bf16.msrb.mxu1 %v4497_v54  ;;  %v4457_v44 = vor.u32 %v4917_v49, %v4456_v0  ;;  %v4915_v15 = vld [vmem:[#allocation13 + $0x14c] sm:$0xf] }
 0x971   :  { %v2423_v11 = vpack.c.bf16 %v2422_v10, %v2421_v9  ;;  %v4501_v9 = vor.u32 %v4926_v5, %v4498_v6  ;;  %v4505_v10 = vor.u32 %v4929_v53, %v4504_v7  ;;  %v4911_v5 = vld [vmem:[#allocation13 + $0x12c] sm:$0xf]  ;;  %v4442_v54 = vld [vmem:[#allocation13 + $0x138] sm:$0xf0]  ;;  %v4416_v6 = vld [vmem:[#allocation13 + $0x100] sm:$0xf] }
 0x972   :  { %4349 = vmatmul.msk.bf16.vlgmr.msra.gmra.mxu2 %vm949_vm12, %v2484_v39  ;;  %v4927_v39 = vld [vmem:[#allocation13 + $0x1ac] sm:$0xf]  ;;  %v4445_v7 = vor.u32 %v4911_v5, %v4442_v54  ;;  %v4908_v53 = vld [vmem:[#allocation13 + $0x10c] sm:$0xf0]  ;;  %v4960_v61 = vld [vmem:[#allocation16 + $0x1b0] sm:$0xff] }
 0x973   :  { %4348 = vmatmul.msk.bf16.vlgmr.msra.gmra.mxu0 %vm949_vm12, %v2423_v11  ;;  %v4506_v11 = vld [vmem:[#allocation13 + $0x1b8] sm:$0xf0]  ;;  %v4959_v5 = vld [vmem:[#allocation16 + $0x1a8] sm:$0xff]  ;;  %v4941_v54 = vld [vmem:[#allocation16 + $0x118] sm:$0xff] }
 0x974   :  { %2947 = vmatpush.bf16.msra.mxu0 %v4541_v46  ;;  %2934 = vmatpush.bf16.msra.mxu3 %v4521_v58  ;;  %v4509_v60 = vor.u32 %v4927_v39, %v4506_v11  ;;  %v4458_v46 = vld [vmem:[#allocation13 + $0x158] sm:$0xf0]  ;;  %v4434_v58 = vld [vmem:[#allocation13 + $0x130] sm:$0xf0]  ;;  %v4417_v11 = vor.u32 %v4908_v53, %v4416_v6  ;;  %v4965_v6 = vld [vmem:[#allocation16 + $0x1d8] sm:$0xff] }
 0x975   :  { %2908 = vmatpush.bf16.msrb.mxu1 %v4481_v2  ;;  %v4461_v48 = vor.u32 %v4915_v15, %v4458_v46  ;;  %v4437_v63 = vor.u32 %v4910_v56, %v4434_v58  ;;  %v4907_v2 = vld [vmem:[#allocation13 + $0x10c] sm:$0xf]  ;;  %v4961_v56 = vld [vmem:[#allocation16 + $0x1b8] sm:$0xff]  ;;  %v4967_v58 = vld [vmem:[#allocation16 + $0x1e8] sm:$0xff] }
 0x976   :  { %v4958_v53 = vld [vmem:[#allocation16 + $0x1a0] sm:$0xff] }
 0x978   :  { %2948 = vmatpush.bf16.msra.mxu0 %v4525_v62  ;;  %2935 = vmatpush.bf16.msra.mxu3 %v4505_v10  ;;  %v4418_v10 = vld [vmem:[#allocation13 + $0x110] sm:$0xf0] }
 0x97c   :  { %2949 = vmatpush.bf16.msra.mxu0 %v4509_v60 }
 0x9f0   :  { %v2440_v16 = vpop.f32.mrf.mxu0 }
 0x9f5   :  { %v2501_v36 = vpop.f32.mrf.mxu2 }
 0x9f8   :  { %v2442_v17 = vpop.f32.mrf.mxu0 }
 0x9f9   :  { %v2445_v18 = vpack.c.bf16 %v2442_v17, %v2440_v16  ;;  %v4925_v16 = vld [vmem:[#allocation13 + $0x194] sm:$0xf0] }
 0x9fa   :  { %v4489_v17 = vor.u32 %v4925_v16, %v4488_v52 }
 0x9fb   :  { %2625 = vmatmul.bf16.vlgmr.msrb.gmra.mxu0 %v2445_v18  ;;  %v4923_v18 = vld [vmem:[#allocation13 + $0x18c] sm:$0xf] }
 0x9fc   :  { %2936 = vmatpush.bf16.msra.mxu3 %v4489_v17 }
 0x9fd   :  { %v2503_v19 = vpop.f32.mrf.mxu2 }
 0x9fe   :  { %v2506_v20 = vpack.c.bf16 %v2503_v19, %v2501_v36  ;;  %v4485_v36 = vor.u32 %v4922_v13, %v4482_v14  ;;  %v4490_v19 = vld [vmem:[#allocation13 + $0x198] sm:$0xf0]  ;;  %v4425_v13 = vor.u32 %v4909_v41, %v4424_v12  ;;  %v4939_v12 = vld [vmem:[#allocation16 + $0x108] sm:$0xff] }
 0x9ff   :  { %v4426_v14 = vld [vmem:[#allocation13 + $0x118] sm:$0xf0]  ;;  %v4963_v41 = vld [vmem:[#allocation16 + $0x1c8] sm:$0xff] }
 0xa00   :  { %2563 = vmatmul.bf16.vlgmr.msrb.gmra.mxu3 %v2506_v20  ;;  %v4493_v20 = vor.u32 %v4923_v18, %v4490_v19  ;;  %v4429_v16 = vor.u32 %v4907_v2, %v4426_v14  ;;  %v4948_v14 = vld [vmem:[#allocation16 + $0x150] sm:$0xff] }
 0xa02   :  { %2950 = vmatpush.bf16.msra.mxu0 %v4493_v20 }
 0xa78   :  { %v2626_v21 = vpop.f32.mrf.mxu0 }
 0xa80   :  { %v2628_v28 = vpop.f32.mrf.mxu0 }
 0xa83   :  { %v2564_v22 = vpop.f32.mrf.mxu3 }
 0xa84   :  { %v2627_v23 = vadd.f32 %v2626_v21, %v2564_v22  ;;  %v4464_v21 = vld [vmem:[#allocation13 + $0x160] sm:$0xf]  ;;  %v4920_v22 = vld [vmem:[#allocation13 + $0x16c] sm:$0xf0] }
 0xa86   :  { %v2631_v26 = vadd.f32 %v2627_v23, %v6153_v29  ;;  %v4918_v23 = vld [vmem:[#allocation13 + $0x164] sm:$0xf] }
 0xa88   :  { %v6524_v25 = vadd.f32 %v5010_v24, %v2631_v26  ;;  %v4466_v26 = vld [vmem:[#allocation13 + $0x170] sm:$0xf0] }
 0xa8a   :  { %2644 = vadd.xlane.f32.xlu1 %v6524_v25  ;;  %v2651_v27 = vmul.f32 %v6524_v25, %v6524_v25 }
 0xa8b   :  { %v2566_v31 = vpop.f32.mrf.mxu3 }
 0xa8c   :  { %v2629_v32 = vadd.f32 %v2628_v28, %v2566_v31  ;;  %2653 = vadd.xlane.f32.xlu0 %v2651_v27  ;;  %v4472_v27 = vld [vmem:[#allocation13 + $0x168] sm:$0xf]  ;;  %v4921_v28 = vld [vmem:[#allocation13 + $0x174] sm:$0xf0]  ;;  %v4469_v31 = vor.u32 %v4918_v23, %v4466_v26 }
 0xa8e   :  { %v2632_v33 = vadd.f32 %v2629_v32, %v6159_v40  ;;  %v4533_v40 = vor.u32 %v4934_v45, %v4530_v43  ;;  %v4473_v32 = vor.u32 %v4921_v28, %v4472_v27  ;;  %v4450_v43 = vld [vmem:[#allocation13 + $0x150] sm:$0xf0] }
 0xa8f   :  { %v4453_v1 = vor.u32 %v4914_v38, %v4450_v43 }
 0xa90   :  { %v6530_v34 = vadd.f32 %v5010_v24, %v2632_v33  ;;  %2919 = vmatpush.bf16.msrb.mxu2 %v4533_v40  ;;  %v4465_v24 = vor.u32 %v4920_v22, %v4464_v21  ;;  %v4919_v33 = vld [vmem:[#allocation13 + $0x16c] sm:$0xf]  ;;  %2937 = vmatpush.bf16.msra.mxu3 %v4473_v32 }
 0xa92   :  { %v2646_v35 = vsel %vm452_vm1, %v6530_v34, 0.0  ;;  %v2652_v29 = vmul.f32 %v6530_v34, %v6530_v34  ;;  %2909 = vmatpush.bf16.msrb.mxu1 %v4465_v24 }
 0xa93   :  { %2647 = vadd.xlane.f32.xlu2 %v2646_v35  ;;  %v4474_v35 = vld [vmem:[#allocation13 + $0x178] sm:$0xf0] }
 0xa94   :  { %v2655_v8 = vsel %vm452_vm1, %v2652_v29, 0.0  ;;  %2920 = vmatpush.bf16.msrb.mxu2 %v4517_v57  ;;  %v4477_v29 = vor.u32 %v4919_v33, %v4474_v35  ;;  %2938 = vmatpush.bf16.msra.mxu3 %v4457_v44  ;;  %v4433_v57 = vor.u32 %v4912_v55, %v4432_v30  ;;  %v5012_v44 = vld [vmem:[#allocation12 + $0x1] ss:$0 sm:$0xff]  ;;  %v4953_v55 = vld [vmem:[#allocation16 + $0x178] sm:$0xff] }
 0xa95   :  { %2656 = vadd.xlane.f32.xlu1 %v2655_v8  ;;  %v4448_v8 = vld [vmem:[#allocation13 + $0x140] sm:$0xf]  ;;  %v4968_v30 = vld [vmem:[#allocation16 + $0x1f0] sm:$0xff] }
 0xa96   :  { %2951 = vmatpush.bf16.msra.mxu0 %v4477_v29  ;;  %v4449_v42 = vor.u32 %v4916_v37, %v4448_v8 }
 0xa98   :  { %2921 = vmatpush.bf16.msrb.mxu2 %v4501_v9  ;;  %2910 = vmatpush.bf16.msrb.mxu1 %v4449_v42  ;;  %v4906_v9 = vld [vmem:[#allocation13 + $0x104] sm:$0xf] }
 0xa99   :  { %2939 = vmatpush.bf16.msra.mxu3 %v4441_v4  ;;  %v4421_v60 = vor.u32 %v4906_v9, %v4418_v10  ;;  %v4951_v4 = vld [vmem:[#allocation16 + $0x168] sm:$0xff]  ;;  %v4940_v9 = vld [vmem:[#allocation16 + $0x110] sm:$0xff] }
 0xa9a   :  { %2952 = vmatpush.bf16.msra.mxu0 %v4461_v48  ;;  %v4964_v10 = vld [vmem:[#allocation16 + $0x1d0] sm:$0xff] }
 0xa9c   :  { %2922 = vmatpush.bf16.msrb.mxu2 %v4485_v36  ;;  %2911 = vmatpush.bf16.msrb.mxu1 %v4433_v57  ;;  %v4943_v57 = vld [vmem:[#allocation16 + $0x128] sm:$0xff] }
 0xa9d   :  { %2940 = vmatpush.bf16.msra.mxu3 %v4425_v13 }
 0xa9e   :  { %2953 = vmatpush.bf16.msra.mxu0 %v4445_v7  ;;  %v4950_v7 = vld [vmem:[#allocation16 + $0x160] sm:$0xff] }
 0xaa0   :  { %2923 = vmatpush.bf16.msrb.mxu2 %v4469_v31  ;;  %2912 = vmatpush.bf16.msrb.mxu1 %v4417_v11  ;;  %v4949_v11 = vld [vmem:[#allocation16 + $0x158] sm:$0xff] }
 0xaa1   :  { %3322 = vmatpush.bf16.msrb.mxu3 %v4961_v56 }
 0xaa2   :  { %2954 = vmatpush.bf16.msra.mxu0 %v4429_v16 }
 0xaa4   :  { %2924 = vmatpush.bf16.msrb.mxu2 %v4453_v1 }
 0xaa5   :  { %3323 = vmatpush.bf16.msrb.mxu3 %v4960_v61 }
 0xaa8   :  { %2925 = vmatpush.bf16.msrb.mxu2 %v4437_v63  ;;  %v4966_v63 = vld [vmem:[#allocation16 + $0x1e0] sm:$0xff] }
 0xaa9   :  { %3324 = vmatpush.bf16.msrb.mxu3 %v4959_v5 }
 0xaac   :  { %2926 = vmatpush.bf16.msrb.mxu2 %v4421_v60  ;;  %v4957_v60 = vld [vmem:[#allocation16 + $0x198] sm:$0xff] }
 0xaad   :  { %3325 = vmatpush.bf16.msrb.mxu3 %v4958_v53 }
 0xab0   :  { %3308 = vmatpush.bf16.msra.mxu2 %v4953_v55 }
 0xab1   :  { %3326 = vmatpush.bf16.msrb.mxu3 %v4957_v60 }
 0xab4   :  { %3309 = vmatpush.bf16.msra.mxu2 %v4952_v59 }
 0xab8   :  { %3310 = vmatpush.bf16.msra.mxu2 %v4951_v4 }
 0xabc   :  { %3311 = vmatpush.bf16.msra.mxu2 %v4950_v7 }
 0xac0   :  { %3312 = vmatpush.bf16.msra.mxu2 %v4949_v11 }
 0xac4   :  { %3313 = vmatpush.bf16.msra.mxu2 %v4948_v14 }
 0xafd   :  { %v2645_v45 = vpop.xlane.xlu1 %2644 }
 0xafe   :  { %v6538_v40 = vmul.f32 %v2645_v45, %v5845_v3  ;;  %v5011_v45 = vld [vmem:[#allocation10 + $0x1] ss:$0 sm:$0xff] }
 0xaff   :  { %v2654_v47 = vpop.xlane.xlu0 %2653 }
 0xb00   :  { %v2660_v50 = vmul.f32 %v6538_v40, %v6538_v40  ;;  %v2658_v51 = vmul.f32 %v2654_v47, %v5845_v3  ;;  %v2664_v8 = vsub.f32 %v6524_v25, %v6538_v40  ;;  %v4945_v40 = vld [vmem:[#allocation16 + $0x138] sm:$0xff] }
 0xb01   :  { %3294 = vmatpush.bf16.msra.mxu1 %v4945_v40 }
 0xb02   :  { %v2662_v62 = vsub.f32 %v2658_v51, %v2660_v50  ;;  %v4969_v50 = vld [vmem:[#allocation16 + $0x1f8] sm:$0xff]  ;;  %v4944_v51 = vld [vmem:[#allocation16 + $0x130] sm:$0xff] }
 0xb03   :  { %3336 = vmatpush.bf16.msrb.mxu0 %v4969_v50 }
 0xb04   :  { %v2666_v39 = vadd.f32 1e-06, %v2662_v62  ;;  %v4942_v62 = vld [vmem:[#allocation16 + $0x120] sm:$0xff] }
 0xb05   :  { %3295 = vmatpush.bf16.msra.mxu1 %v4944_v51 }
 0xb06   :  { %5079 = vrsqrt.f32 %v2666_v39  ;;  %v2648_v52 = vpop.xlane.xlu2 %2647  ;;  %vm2674_vm12 = vweird.f32 %v2666_v39 }
 0xb07   :  { %v2650_v36 = vmul.f32 %v2648_v52, %v5845_v3  ;;  %3337 = vmatpush.bf16.msrb.mxu0 %v4968_v30  ;;  %v4956_v52 = vld [vmem:[#allocation16 + $0x190] sm:$0xff] }
 0xb08   :  { %v2657_v17 = vpop.xlane.xlu1 %2656  ;;  %3327 = vmatpush.bf16.msrb.mxu3 %v4956_v52 }
 0xb09   :  { %v2661_v18 = vmul.f32 %v2650_v36, %v2650_v36  ;;  %v2659_v19 = vmul.f32 %v2657_v17, %v5845_v3  ;;  %v2665_v43 = vsub.f32 %v6530_v34, %v2650_v36  ;;  %3296 = vmatpush.bf16.msra.mxu1 %v4943_v57  ;;  %v4938_v36 = vld [vmem:[#allocation16 + $0x100] sm:$0xff] }
 0xb0a   :  { %v4962_v17 = vld [vmem:[#allocation16 + $0x1c0] sm:$0xff] }
 0xb0b   :  { %v2663_v20 = vsub.f32 %v2659_v19, %v2661_v18  ;;  %3338 = vmatpush.bf16.msrb.mxu0 %v4967_v58 }
 0xb0c   :  { %v5080_v21 = vpop.eup %5079 }
 0xb0d   :  { %v2669_v22 = vmul.f32 %v5080_v21, %v2666_v39  ;;  %v2667_v23 = vadd.f32 1e-06, %v2663_v20  ;;  %vm2675_vm9 = vweird.f32 %v5080_v21  ;;  %3297 = vmatpush.bf16.msra.mxu1 %v4942_v62  ;;  %v6548_v39 = vld [vmem:[#allocation15 + $0x4] sm:$0xf] }
 0xb0e   :  { %vm2676_vm13 = vmor %vm2674_vm12, %vm2675_vm9  ;;  %v2737_v13 = vperm.slane %v6548_v39, 0  ;;  %v2740_v2 = vperm.slane %v6548_v39, 3 }
 0xb0f   :  { %v2670_v24 = vmul.f32 %v5080_v21, %v2669_v22  ;;  %5081 = vrsqrt.f32 %v2667_v23  ;;  %vm2684_vm15 = vweird.f32 %v2667_v23  ;;  %3339 = vmatpush.bf16.msrb.mxu0 %v4966_v63  ;;  %v4955_v22 = vld [vmem:[#allocation16 + $0x188] sm:$0xff] }
 0xb10   :  { %3328 = vmatpush.bf16.msrb.mxu3 %v4955_v22 }
 0xb11   :  { %v2671_v26 = vmul.f32 0.5, %v2670_v24  ;;  %3298 = vmatpush.bf16.msra.mxu1 %v4941_v54  ;;  %v2738_v24 = vperm.slane %v6548_v39, 1 }
 0xb13   :  { %v2672_v27 = vsub.f32 1.5, %v2671_v26  ;;  %3340 = vmatpush.bf16.msrb.mxu0 %v4965_v6 }
 0xb15   :  { %v5082_v28 = vpop.eup %5081  ;;  %v2673_v31 = vmul.f32 %v5080_v21, %v2672_v27  ;;  %3299 = vmatpush.bf16.msra.mxu1 %v4940_v9  ;;  %v2739_v27 = vperm.slane %v6548_v39, 2 }
 0xb16   :  { %v2679_v32 = vmul.f32 %v5082_v28, %v2667_v23  ;;  %vm2685_vm14 = vweird.f32 %v5082_v28 }
 0xb17   :  { %v2677_v35 = vsel %vm2676_vm13, %v5080_v21, %v2673_v31  ;;  %vm2686_vm0 = vmor %vm2684_vm15, %vm2685_vm14  ;;  %3341 = vmatpush.bf16.msrb.mxu0 %v4964_v10  ;;  %v4947_v21 = vld [vmem:[#allocation16 + $0x148] sm:$0xff] }
 0xb18   :  { %v2680_v33 = vmul.f32 %v5082_v28, %v2679_v32  ;;  %v2688_v38 = vmul.f32 %v2677_v35, %v2664_v8  ;;  %3314 = vmatpush.bf16.msra.mxu2 %v4947_v21  ;;  %v4954_v35 = vld [vmem:[#allocation16 + $0x180] sm:$0xff] }
 0xb19   :  { %3300 = vmatpush.bf16.msra.mxu1 %v4939_v12  ;;  %3329 = vmatpush.bf16.msrb.mxu3 %v4954_v35 }
 0xb1a   :  { %v2681_v29 = vmul.f32 0.5, %v2680_v33  ;;  %v2693_v1 = vmul.f32 %v5011_v45, %v2688_v38  ;;  %v4946_v33 = vld [vmem:[#allocation16 + $0x140] sm:$0xff] }
 0xb1b   :  { %3342 = vmatpush.bf16.msrb.mxu0 %v4963_v41 }
 0xb1c   :  { %v2682_v37 = vsub.f32 1.5, %v2681_v29  ;;  %v2698_v46 = vadd.f32 %v5012_v44, %v2693_v1  ;;  %3315 = vmatpush.bf16.msra.mxu2 %v4946_v33 }
 0xb1d   :  { %3301 = vmatpush.bf16.msra.mxu1 %v4938_v36 }
 0xb1e   :  { %v2683_v42 = vmul.f32 %v5082_v28, %v2682_v37 }
 0xb1f   :  { %3343 = vmatpush.bf16.msrb.mxu0 %v4962_v17 }
 0xb20   :  { %v2687_v0 = vsel %vm2686_vm0, %v5082_v28, %v2683_v42 }
 0xb21   :  { %v2689_v49 = vmul.f32 %v2687_v0, %v2665_v43 }
 0xb23   :  { %v2694_v15 = vmul.f32 %v5011_v45, %v2689_v49 }
 0xb25   :  { %v2699_v47 = vadd.f32 %v5012_v44, %v2694_v15 }
 0xb27   :  { %v2733_v48 = vpack.c.bf16 %v2699_v47, %v2698_v46 }
 0xb29   :  { %2913 = vmatmul.bf16.vlgmr.msrb.gmra.mxu1 %v2733_v48  ;;  %2927 = vmatmul.bf16.vlgmr.msrb.gmra.mxu2 %v2733_v48 }
 0xb2a   :  { %2941 = vmatmul.bf16.vlgmr.msra.gmra.mxu3 %v2733_v48  ;;  %2955 = vmatmul.bf16.vlgmr.msra.gmra.mxu0 %v2733_v48 }
 0xba6   :  { %v2914_v16 = vpop.f32.mrf.mxu1 }
 0xba7   :  { %v6552_v18 = vadd.f32 %v2914_v16, %v2737_v13  ;;  %v2956_v19 = vpop.f32.mrf.mxu0 }
 0xba8   :  { %v6554_v20 = vadd.f32 %v2956_v19, %v2740_v2 }
 0xba9   :  { %v2961_v23 = vmul.f32 %v6552_v18, %v6552_v18 }
 0xbaa   :  { %v2964_v26 = vmul.f32 %v6554_v20, %v6554_v20 }
 0xbab   :  { %v2969_v28 = vmul.f32 %v2961_v23, %v6552_v18 }
 0xbac   :  { %v2972_v31 = vmul.f32 %v2964_v26, %v6554_v20  ;;  %v2928_v32 = vpop.f32.mrf.mxu2 }
 0xbad   :  { %v2977_v29 = vmul.f32 0.044715, %v2969_v28  ;;  %v6564_v8 = vadd.f32 %v2928_v32, %v2738_v24  ;;  %v2942_v37 = vpop.f32.mrf.mxu3 }
 0xbae   :  { %v2980_v38 = vmul.f32 0.044715, %v2972_v31  ;;  %v6566_v45 = vadd.f32 %v2942_v37, %v2739_v27  ;;  %v2916_v42 = vpop.f32.mrf.mxu1 }
 0xbaf   :  { %v2985_v43 = vadd.f32 %v2977_v29, %v6552_v18  ;;  %v2962_v0 = vmul.f32 %v6564_v8, %v6564_v8  ;;  %v6571_v49 = vadd.f32 %v2916_v42, %v2737_v13  ;;  %v2958_v1 = vpop.f32.mrf.mxu0 }
 0xbb0   :  { %v2988_v44 = vadd.f32 %v2980_v38, %v6554_v20  ;;  %v2963_v15 = vmul.f32 %v6566_v45, %v6566_v45  ;;  %v6576_v46 = vadd.f32 %v2958_v1, %v2740_v2 }
 0xbb1   :  { %v2993_v47 = vmul.f32 0.7978846, %v2985_v43  ;;  %v2970_v48 = vmul.f32 %v2962_v0, %v6564_v8  ;;  %v2965_v40 = vmul.f32 %v6571_v49, %v6571_v49 }
 0xbb2   :  { %v2996_v50 = vmul.f32 0.7978846, %v2988_v44  ;;  %v2971_v51 = vmul.f32 %v2963_v15, %v6566_v45  ;;  %v2968_v30 = vmul.f32 %v6576_v46, %v6576_v46 }
 0xbb3   :  { %v2978_v55 = vmul.f32 0.044715, %v2970_v48  ;;  %v2973_v56 = vmul.f32 %v2965_v40, %v6571_v49  ;;  %5083 = vtanh.f32 %v2993_v47 }
 0xbb4   :  { %v2979_v57 = vmul.f32 0.044715, %v2971_v51  ;;  %v2976_v58 = vmul.f32 %v2968_v30, %v6576_v46  ;;  %v2930_v59 = vpop.f32.mrf.mxu2  ;;  %5085 = vtanh.f32 %v2996_v50 }
 0xbb5   :  { %v2986_v61 = vadd.f32 %v2978_v55, %v6564_v8  ;;  %v2981_v62 = vmul.f32 0.044715, %v2973_v56  ;;  %v2931_v63 = vadd.f32 %v2930_v59, %v2738_v24  ;;  %v2944_v4 = vpop.f32.mrf.mxu3 }
 0xbb6   :  { %v2987_v5 = vadd.f32 %v2979_v57, %v6566_v45  ;;  %v2984_v54 = vmul.f32 0.044715, %v2976_v58  ;;  %v2945_v6 = vadd.f32 %v2944_v4, %v2739_v27 }
 0xbb7   :  { %v2994_v7 = vmul.f32 0.7978846, %v2986_v61  ;;  %v2989_v53 = vadd.f32 %v2981_v62, %v6571_v49  ;;  %v2966_v9 = vmul.f32 %v2931_v63, %v2931_v63 }
 0xbb8   :  { %v2995_v10 = vmul.f32 0.7978846, %v2987_v5  ;;  %v2992_v39 = vadd.f32 %v2984_v54, %v6576_v46  ;;  %v2967_v11 = vmul.f32 %v2945_v6, %v2945_v6 }
 0xbb9   :  { %5087 = vtanh.f32 %v2994_v7  ;;  %v2997_v60 = vmul.f32 0.7978846, %v2989_v53  ;;  %v2974_v12 = vmul.f32 %v2966_v9, %v2931_v63  ;;  %v5084_v2 = vpop.eup %5083  ;;  %v5013_v9 = vld [vmem:[#allocation18 + $0x1] ss:$0 sm:$0xff] }
 0xbba   :  { %5089 = vtanh.f32 %v2995_v10  ;;  %v3000_v41 = vmul.f32 0.7978846, %v2992_v39  ;;  %v2975_v13 = vmul.f32 %v2967_v11, %v2945_v6  ;;  %v5086_v52 = vpop.eup %5085  ;;  %v3009_v17 = vadd.f32 1.0, %v5084_v2 }
 0xbbb   :  { %5091 = vtanh.f32 %v2997_v60  ;;  %v2982_v14 = vmul.f32 0.044715, %v2974_v12  ;;  %v3012_v22 = vadd.f32 1.0, %v5086_v52 }
 0xbbc   :  { %5093 = vtanh.f32 %v3000_v41  ;;  %v2983_v16 = vmul.f32 0.044715, %v2975_v13  ;;  %v3017_v31 = vmul.f32 0.5, %v3009_v17  ;;  %v4974_v17 = vld [vmem:[%s6666_s17 + $0x20] sm:$0xff] }
 0xbbd   :  { %v2990_v36 = vadd.f32 %v2982_v14, %v2931_v63  ;;  %v3020_v33 = vmul.f32 0.5, %v3012_v22  ;;  %v4972_v22 = vld [vmem:[%s6666_s17 + $0x10] sm:$0xff] }
 0xbbe   :  { %v2991_v19 = vadd.f32 %v2983_v16, %v2945_v6  ;;  %v3025_v43 = vmul.f32 %v3017_v31, %v6552_v18  ;;  %v4977_v16 = vld [vmem:[%s6666_s17 + $0x38] sm:$0xff] }
 0xbbf   :  { %v5088_v21 = vpop.eup %5087  ;;  %v2998_v23 = vmul.f32 0.7978846, %v2990_v36  ;;  %v3028_v44 = vmul.f32 %v3020_v33, %v6554_v20  ;;  %3486 = vmatpush.bf16.msrb.mxu1 %v4977_v16  ;;  %v4975_v36 = vld [vmem:[%s6666_s17 + $0x28] sm:$0xff] }
 0xbc0   :  { %v5090_v24 = vpop.eup %5089  ;;  %v2999_v26 = vmul.f32 0.7978846, %v2991_v19  ;;  %v3010_v29 = vadd.f32 1.0, %v5088_v21  ;;  %v4973_v19 = vld [vmem:[%s6666_s17 + $0x18] sm:$0xff] }
 0xbc1   :  { %v5092_v27 = vpop.eup %5091  ;;  %5095 = vtanh.f32 %v2998_v23  ;;  %v3011_v38 = vadd.f32 1.0, %v5090_v24 }
 0xbc2   :  { %v5094_v28 = vpop.eup %5093  ;;  %v3013_v32 = vadd.f32 1.0, %v5092_v27  ;;  %5097 = vtanh.f32 %v2999_v26  ;;  %v3018_v48 = vmul.f32 0.5, %v3010_v29 }
 0xbc3   :  { %v3016_v35 = vadd.f32 1.0, %v5094_v28  ;;  %v3019_v51 = vmul.f32 0.5, %v3011_v38  ;;  %v4971_v28 = vld [vmem:[%s6666_s17 + $0x8] sm:$0xff] }
 0xbc4   :  { %v3021_v37 = vmul.f32 0.5, %v3013_v32  ;;  %v3026_v18 = vmul.f32 %v3018_v48, %v6564_v8  ;;  %v4970_v32 = vld [vmem:[%s6666_s17] sm:$0xff] }
 0xbc5   :  { %v3024_v42 = vmul.f32 0.5, %v3016_v35 }
 0xbc6   :  { %v3029_v0 = vmul.f32 %v3021_v37, %v6571_v49  ;;  %v3027_v49 = vmul.f32 %v3019_v51, %v6566_v45 }
 0xbc7   :  { %v5096_v1 = vpop.eup %5095  ;;  %v3032_v15 = vmul.f32 %v3024_v42, %v6576_v46 }
 0xbc8   :  { %v5098_v47 = vpop.eup %5097  ;;  %v3014_v40 = vadd.f32 1.0, %v5096_v1  ;;  %v3098_v50 = vpack.c.bf16 %v3029_v0, %v3025_v43 }
 0xbc9   :  { %v3015_v30 = vadd.f32 1.0, %v5098_v47  ;;  %v3101_v55 = vpack.c.bf16 %v3032_v15, %v3028_v44 }
 0xbca   :  { %v3022_v56 = vmul.f32 0.5, %v3014_v40  ;;  %3302 = vmatmul.bf16.vlgmr.msra.gmra.mxu1 %v3098_v50 }
 0xbcb   :  { %v3023_v57 = vmul.f32 0.5, %v3015_v30  ;;  %3344 = vmatmul.bf16.vlgmr.msrb.gmra.mxu0 %v3101_v55 }
 0xbcc   :  { %v3030_v58 = vmul.f32 %v3022_v56, %v2931_v63 }
 0xbcd   :  { %v3031_v59 = vmul.f32 %v3023_v57, %v2945_v6 }
 0xbce   :  { %v3099_v20 = vpack.c.bf16 %v3030_v58, %v3026_v18  ;;  %v5014_v58 = vld [vmem:[%s6692_s25] ss:$0 sm:$0xff] }
 0xbcf   :  { %v3100_v61 = vpack.c.bf16 %v3031_v59, %v3027_v49 }
 0xbd0   :  { %3316 = vmatmul.bf16.vlgmr.msra.gmra.mxu2 %v3099_v20 }
 0xbd1   :  { %3330 = vmatmul.bf16.vlgmr.msrb.gmra.mxu3 %v3100_v61 }
 0xc47   :  { %v3303_v46 = vpop.f32.mrf.mxu1 }
 0xc48   :  { %v3345_v54 = vpop.f32.mrf.mxu0 }
 0xc4f   :  { %v3305_v39 = vpop.f32.mrf.mxu1 }
 0xc50   :  { %v3347_v12 = vpop.f32.mrf.mxu0 }
 0xc53   :  { %v3317_v62 = vpop.f32.mrf.mxu2 }
 0xc54   :  { %v3318_v4 = vadd.f32 %v3317_v62, %v3303_v46  ;;  %v3331_v5 = vpop.f32.mrf.mxu3  ;;  %v5015_v62 = vld [vmem:[#allocation19] ss:$0 sm:$0xff] }
 0xc56   :  { %v3332_v7 = vadd.f32 %v3331_v5, %v3318_v4 }
 0xc58   :  { %v3346_v53 = vadd.f32 %v3345_v54, %v3332_v7 }
 0xc5a   :  { %v3350_v10 = vadd.f32 %v3346_v53, %v6524_v25  ;;  %v5016_v53 = vld [vmem:[#allocation21] ss:$0 sm:$0xff] }
 0xc5b   :  { %v3319_v8 = vpop.f32.mrf.mxu2 }
 0xc5c   :  { %v3320_v63 = vadd.f32 %v3319_v8, %v3305_v39  ;;  %v6597_v11 = vadd.f32 %v5013_v9, %v3350_v10  ;;  %v3333_v45 = vpop.f32.mrf.mxu3 }
 0xc5e   :  { %v3334_v6 = vadd.f32 %v3333_v45, %v3320_v63  ;;  %3361 = vadd.xlane.f32.xlu2 %v6597_v11  ;;  %v3368_v60 = vmul.f32 %v6597_v11, %v6597_v11 }
 0xc60   :  { %v3348_v41 = vadd.f32 %v3347_v12, %v3334_v6  ;;  %3370 = vadd.xlane.f32.xlu1 %v3368_v60 }
 0xc62   :  { %v3351_v13 = vadd.f32 %v3348_v41, %v6530_v34  ;;  %v4976_v34 = vld [vmem:[%s6666_s17 + $0x30] sm:$0xff] }
 0xc63   :  { %3487 = vmatpush.bf16.msrb.mxu1 %v4976_v34 }
 0xc64   :  { %v6603_v2 = vadd.f32 %v5013_v9, %v3351_v13 }
 0xc66   :  { %v3363_v25 = vsel %vm452_vm1, %v6603_v2, 0.0  ;;  %v3369_v14 = vmul.f32 %v6603_v2, %v6603_v2 }
 0xc67   :  { %3364 = vadd.xlane.f32.xlu0 %v3363_v25  ;;  %3488 = vmatpush.bf16.msrb.mxu1 %v4975_v36 }
 0xc68   :  { %v3372_v52 = vsel %vm452_vm1, %v3369_v14, 0.0 }
 0xc69   :  { %3373 = vadd.xlane.f32.xlu2 %v3372_v52 }
 0xc6b   :  { %3489 = vmatpush.bf16.msrb.mxu1 %v4974_v17 }
 0xc6f   :  { %3490 = vmatpush.bf16.msrb.mxu1 %v4973_v19 }
 0xc73   :  { %3491 = vmatpush.bf16.msrb.mxu1 %v4972_v22 }
 0xc77   :  { %3492 = vmatpush.bf16.msrb.mxu1 %v4971_v28 }
 0xc7b   :  { %3493 = vmatpush.bf16.msrb.mxu1 %v4970_v32 }
 0xcd1   :  { %v3362_v21 = vpop.xlane.xlu2 %3361 }
 0xcd2   :  { %v3366_v23 = vmul.f32 %v3362_v21, %v5845_v3 }
 0xcd3   :  { %v3371_v24 = vpop.xlane.xlu1 %3370 }
 0xcd4   :  { %v3377_v26 = vmul.f32 %v3366_v23, %v3366_v23  ;;  %v3375_v27 = vmul.f32 %v3371_v24, %v5845_v3  ;;  %v3381_v57 = vsub.f32 %v6597_v11, %v3366_v23 }
 0xcd6   :  { %v3379_v31 = vsub.f32 %v3375_v27, %v3377_v26 }
 0xcd8   :  { %v3383_v33 = vadd.f32 1e-06, %v3379_v31 }
 0xcda   :  { %5099 = vrsqrt.f32 %v3383_v33  ;;  %v3365_v35 = vpop.xlane.xlu0 %3364  ;;  %vm3391_vm2 = vweird.f32 %v3383_v33 }
 0xcdb   :  { %v3367_v29 = vmul.f32 %v3365_v35, %v5845_v3 }
 0xcdc   :  { %v3374_v37 = vpop.xlane.xlu2 %3373 }
 0xcdd   :  { %v3378_v38 = vmul.f32 %v3367_v29, %v3367_v29  ;;  %v3376_v42 = vmul.f32 %v3374_v37, %v5845_v3  ;;  %v3382_v59 = vsub.f32 %v6603_v2, %v3367_v29 }
 0xcdf   :  { %v3380_v43 = vsub.f32 %v3376_v42, %v3378_v38 }
 0xce0   :  { %v5100_v0 = vpop.eup %5099 }
 0xce1   :  { %v3386_v1 = vmul.f32 %v5100_v0, %v3383_v33  ;;  %v3384_v44 = vadd.f32 1e-06, %v3380_v43  ;;  %vm3392_vm1 = vweird.f32 %v5100_v0 }
 0xce2   :  { %vm3393_vm3 = vmor %vm3391_vm2, %vm3392_vm1 }
 0xce3   :  { %v3387_v15 = vmul.f32 %v5100_v0, %v3386_v1  ;;  %5101 = vrsqrt.f32 %v3384_v44  ;;  %vm3401_vm5 = vweird.f32 %v3384_v44 }
 0xce5   :  { %v3388_v47 = vmul.f32 0.5, %v3387_v15 }
 0xce7   :  { %v3389_v48 = vsub.f32 1.5, %v3388_v47 }
 0xce9   :  { %v5102_v40 = vpop.eup %5101  ;;  %v3390_v50 = vmul.f32 %v5100_v0, %v3389_v48 }
 0xcea   :  { %v3396_v51 = vmul.f32 %v5102_v40, %v3384_v44  ;;  %vm3402_vm4 = vweird.f32 %v5102_v40 }
 0xceb   :  { %v3394_v55 = vsel %vm3393_vm3, %v5100_v0, %v3390_v50  ;;  %vm3403_vm6 = vmor %vm3401_vm5, %vm3402_vm4 }
 0xcec   :  { %v3397_v30 = vmul.f32 %v5102_v40, %v3396_v51  ;;  %v3405_v18 = vmul.f32 %v3394_v55, %v3381_v57 }
 0xcee   :  { %v3398_v56 = vmul.f32 0.5, %v3397_v30  ;;  %v3410_v46 = vmul.f32 %v5014_v58, %v3405_v18 }
 0xcf0   :  { %v3399_v3 = vsub.f32 1.5, %v3398_v56  ;;  %v3415_v5 = vadd.f32 %v5015_v62, %v3410_v46 }
 0xcf2   :  { %v3400_v49 = vmul.f32 %v5102_v40, %v3399_v3 }
 0xcf4   :  { %v3404_v20 = vsel %vm3403_vm6, %v5102_v40, %v3400_v49 }
 0xcf5   :  { %v3406_v61 = vmul.f32 %v3404_v20, %v3382_v59 }
 0xcf7   :  { %v3411_v4 = vmul.f32 %v5014_v58, %v3406_v61 }
 0xcf9   :  { %v3416_v54 = vadd.f32 %v5015_v62, %v3411_v4 }
 0xcfb   :  { %v3433_v7 = vpack.c.bf16 %v3416_v54, %v3415_v5 }
 0xcfd   :  { %3494 = vmatmul.bf16.vlgmr.msrb.gmra.mxu1 %v3433_v7 }
 0xd7a   :  { %v3495_v9 = vpop.f32.mrf.mxu1 }
 0xd7b   :  { %v3496_v10 = vadd.f32 %v5016_v53, %v3495_v9 }
 0xd7d   :  { %3500 = vst [vmem:[%s6693_s1] sm:$0xff] %v3496_v10 }
 0xd82   :  { %v3497_v39 = vpop.f32.mrf.mxu1 }
 0xd83   :  { %v3498_v8 = vadd.f32 %v5016_v53, %v3497_v39 }
 0xd85   :  { %3501 = vst [vmem:[%s6693_s1 + $0x8] sm:$0x3] %v3498_v8 }
 0xd86   :  { %3506 = vsyncpa [#allocation3], 1 }
 0xd87   :  { %3507 = vsyncpa [#allocation5], 1 }
 0xd88   :  { %3508 = vsyncpa [#allocation8], 1 }
 0xd89   :  { %3509 = vsyncpa [#allocation11], 1 }
 0xd8a   :  { %3510 = vsyncpa [#allocation14], 1 }
 0xd8b   :  { %3511 = vsyncpa [#allocation17], 1 }
 0xd8c   :  { %3512 = vsyncpa [#allocation20], 1 }

</bundles_post_ra>
